<compile_context>
chip_gen: v6e
topology: v6e:2x2x1
jax: 0.10.0
libtpu: 0.0.40
codegen_flags: <defaults>
</compile_context>

<pallas_src>
import numpy as np
import jax
import jax.numpy as jnp
from jax.experimental import pallas as pl
from jax.experimental.pallas import tpu as pltpu

NEG_SLOPE = 0.01  # PyTorch LeakyReLU default


def _leaky_relu(v):
    return jnp.where(v >= 0, v, NEG_SLOPE * v)


def _sigmoid(v):
    # exp and the approximate reciprocal both run on the (otherwise idle) EUP.
    # Clamp the exp argument so adversarially negative activations give 0, not
    # inf/NaN, through the approximate reciprocal.
    return pl.reciprocal(1.0 + jnp.exp(jnp.minimum(-v, 80.0)), approx=True)


def _ecbam_block(per_batch_pieces, w_eca, m_ref, feat_ref):
    """One ECBAM block (ECA channel attention + spatial attention).

    per_batch_pieces : list over the Bt batch elements; each entry is a list of
        (Ci, HW) f32 arrays whose channel concatenation is that batch element's
        input to the block.  The output is returned in the same structure
        (channel identity is preserved by ECBAM, so piece boundaries persist).
    w_eca    : scalar ECA Conv1d(1,1,1) weight.
    m_ref    : (2*HW, HW) bf16 VMEM ref - unrolled spatial-conv (Toeplitz) matrix.
    feat_ref : (Bt, 2*HW) f32 VMEM scratch used to stack the per-batch
        [channel-mean | channel-max] rows so the spatial conv runs as a single
        (Bt, 2*HW) x (2*HW, HW) MXU matmul instead of Bt M=1 matmuls.
    """
    hw = m_ref.shape[1]
    bt = len(per_batch_pieces)
    t1_all = []
    for b, pieces in enumerate(per_batch_pieces):
        t1 = []
        ssum, smax, nchan = None, None, 0
        for p in pieces:
            # --- ECA channel attention: per-(batch,channel) spatial avg & max ---
            avg_c = jnp.mean(p, axis=1, keepdims=True)            # (Ci, 1)
            max_c = jnp.max(p, axis=1, keepdims=True)             # (Ci, 1)
            ca = _sigmoid(_leaky_relu(w_eca * avg_c) + _leaky_relu(w_eca * max_c))
            u = p * ca                                            # (Ci, HW)
            t1.append(u)
            # running channel-sum / channel-max across the pieces
            ps = jnp.sum(u, axis=0, keepdims=True)                # (1, HW)
            pm = jnp.max(u, axis=0, keepdims=True)                # (1, HW)
            ssum = ps if ssum is None else ssum + ps
            smax = pm if smax is None else jnp.maximum(smax, pm)
            nchan += p.shape[0]
        t1_all.append(t1)
        # Stage this batch element's [mean | max] feature row (lane-aligned stores).
        feat_ref[b:b + 1, 0:hw] = ssum * (1.0 / nchan)
        feat_ref[b:b + 1, hw:2 * hw] = smax

    # --- Spatial attention: Conv2d(2->1, k, SAME) as ONE batched MXU matmul ---
    feat = feat_ref[...].astype(jnp.bfloat16)                     # (Bt, 2*HW)
    s = jnp.dot(feat, m_ref[...], preferred_element_type=jnp.float32)  # (Bt, HW)
    sa = _sigmoid(_leaky_relu(s))                                 # (Bt, HW)
    return [[u * sa[b:b + 1, :] for u in t1_all[b]] for b in range(bt)]


def _multi_ecbam_kernel(x_ref, eca_ref, m2_ref, m3_ref, m4_ref, w7_ref, b_ref,
                        out_ref, feat_ref):
    bt = x_ref.shape[1]
    xs = [x_ref[0, b].astype(jnp.float32) for b in range(bt)]     # (C, HW) each

    a2 = _ecbam_block([[xb] for xb in xs], eca_ref[0], m2_ref, feat_ref)
    a3 = _ecbam_block([a2[b] + [xs[b]] for b in range(bt)], eca_ref[1], m3_ref, feat_ref)
    a4 = _ecbam_block([a3[b] + [xs[b]] for b in range(bt)], eca_ref[2], m4_ref, feat_ref)

    # Final 1x1 conv (7C -> C) + bias + ReLU: accumulate W_seg @ seg per channel
    # segment in the PyTorch concat order [a2 | a3 | a4 | x] (no slab, no
    # column permutation), one lane-dense store per batch element.
    w7 = [w7_ref[i] for i in range(7)]                            # 7 x (C, C)
    bias = b_ref[...]                                             # (C, 1)
    for b in range(bt):
        pieces = a2[b] + a3[b] + a4[b] + [xs[b]]                  # 7 x (C, HW)
        acc = bias + jnp.dot(w7[0], pieces[0], preferred_element_type=jnp.float32)
        for i in range(1, 7):
            acc = acc + jnp.dot(w7[i], pieces[i], preferred_element_type=jnp.float32)
        out_ref[0, b] = jnp.maximum(acc, 0.0).astype(out_ref.dtype)


# ---------------- host-side, weight-only preprocessing ----------------
def _spatial_conv_matrix(sa_w, H, W):
    """Unrolled Conv2d(2->1, k, padding=k//2, bias=False) as a (2*H*W, H*W)
    bf16 matrix M such that  out_flat = [avg_flat | max_flat] @ M."""
    w = np.asarray(sa_w, np.float32)                              # (2, k, k)
    k = w.shape[-1]
    p = k // 2
    HW = H * W
    m = np.zeros((2 * HW, HW), np.float32)
    for ci in range(2):
        for dy in range(k):
            for dx in range(k):
                wv = float(w[ci, dy, dx])
                y0, y1 = max(0, p - dy), min(H, H + p - dy)
                x0, x1 = max(0, p - dx), min(W, W + p - dx)
                xs = np.arange(x0, x1)
                for y in range(y0, y1):
                    out_idx = y * W + xs
                    in_idx = (y + dy - p) * W + xs + (dx - p)
                    m[ci * HW + in_idx, out_idx] += wv
    return jnp.asarray(m, jnp.bfloat16)


def _pick_block_batch(B):
    """Fold several batch elements per grid step (amortizes per-step overhead
    and gives the Toeplitz matmuls a multi-row LHS); keep >= 2 grid steps when
    B >= 4 so v7x's two TensorCores can both be used."""
    cap = min(8, B if B < 4 else max(1, B // 2))
    for bt in range(cap, 0, -1):
        if B % bt == 0:
            return bt
    return 1


def multi_ecbam(x, params, block_batch=None):
    """x: (B, C, H, W) f32.  Returns (B, C, H, W) f32."""
    B, C, H, W = x.shape
    HW = H * W
    eca_w, sa_w2, sa_w3, sa_w4, conv_w, conv_b = params

    Bt = block_batch if block_batch is not None else _pick_block_batch(B)
    assert B % Bt == 0
    G = B // Bt

    # Weight-only host prep (independent of activations).
    m2 = _spatial_conv_matrix(np.asarray(sa_w2).reshape(2, 3, 3), H, W)
    m3 = _spatial_conv_matrix(np.asarray(sa_w3).reshape(2, 5, 5), H, W)
    m4 = _spatial_conv_matrix(np.asarray(sa_w4).reshape(2, 7, 7), H, W)
    # Fuse-conv weight split into 7 (C, C) blocks, one per input segment
    # [a2 | a3(p1) | a3(p2) | a4(p1) | a4(p2) | a4(p3) | x] = torch concat order.
    w7 = jnp.asarray(conv_w, jnp.float32).reshape(C, 7, C).transpose(1, 0, 2)
    b_col = jnp.asarray(conv_b, jnp.float32).reshape(C, 1)
    eca_w = jnp.asarray(eca_w, jnp.float32)

    x_r = x.reshape(G, Bt, C, HW)                                 # HW on the lane axis

    io_spec = pl.BlockSpec((1, Bt, C, HW), lambda g: (g, 0, 0, 0))
    # Grid-invariant operands: whole-array VMEM residency, no double buffering.
    vmem_resident = pl.BlockSpec(memory_space=pltpu.MemorySpace.VMEM)
    smem_resident = pl.BlockSpec(memory_space=pltpu.MemorySpace.SMEM)

    out = pl.pallas_call(
        _multi_ecbam_kernel,
        out_shape=jax.ShapeDtypeStruct((G, Bt, C, HW), jnp.float32),
        grid=(G,),
        in_specs=[
            io_spec,                 # x block (pipelined over the grid)
            smem_resident,           # ECA scalar weights (3,)
            vmem_resident,           # Toeplitz spatial conv k=3 (bf16)
            vmem_resident,           # Toeplitz spatial conv k=5 (bf16)
            vmem_resident,           # Toeplitz spatial conv k=7 (bf16)
            vmem_resident,           # fuse 1x1 conv weight blocks (7, C, C)
            vmem_resident,           # fuse bias (C, 1)
        ],
        out_specs=io_spec,
        scratch_shapes=[pltpu.VMEM((Bt, 2 * HW), jnp.float32)],   # feature staging
        compiler_params=pltpu.CompilerParams(
            dimension_semantics=("parallel",),
            # Residency at demo sizes: 3 bf16 Toeplitz matrices (~0.8 MiB,
            # single-buffered) + double-buffered (Bt,C,HW) I/O blocks + tiny
            # scratch.  32 MiB fits every generation (v5e default is only 16).
            vmem_limit_bytes=32 * 1024 * 1024),
    )(x_r, eca_w, m2, m3, m4, w7, b_col)
    return out.reshape(B, C, H, W)


# ---------------- pure-JAX reference (for verification only) ----------------
def _ecbam_ref(t, w_eca, sa_w):
    lr = lambda v: jnp.where(v >= 0, v, NEG_SLOPE * v)
    sig = jax.nn.sigmoid
    avg_c = jnp.mean(t, axis=(2, 3), keepdims=True)
    max_c = jnp.max(t, axis=(2, 3), keepdims=True)
    ca = sig(lr(w_eca * avg_c) + lr(w_eca * max_c))
    t1 = t * ca
    avg_s = jnp.mean(t1, axis=1, keepdims=True)
    max_s = jnp.max(t1, axis=1, keepdims=True)
    s_in = jnp.concatenate([avg_s, max_s], axis=1)
    s = jax.lax.conv_general_dilated(
        s_in, sa_w[None], window_strides=(1, 1), padding="SAME",
        dimension_numbers=("NCHW", "OIHW", "NCHW"))
    return t1 * sig(lr(s))


def multi_ecbam_ref(x, params):
    eca_w, sa_w2, sa_w3, sa_w4, conv_w, conv_b = params
    C = x.shape[1]
    a2 = _ecbam_ref(x, eca_w[0], sa_w2.reshape(2, 3, 3))
    m1 = jnp.concatenate([a2, x], axis=1)
    a3 = _ecbam_ref(m1, eca_w[1], sa_w3.reshape(2, 5, 5))
    m2 = jnp.concatenate([a3, x], axis=1)
    a4 = _ecbam_ref(m2, eca_w[2], sa_w4.reshape(2, 7, 7))
    y = jnp.concatenate([a2, a3, a4, x], axis=1)
    wmat = conv_w.reshape(C, 7 * C)
    out = jnp.einsum("oc,bchw->bohw", wmat, y) + conv_b[None, :, None, None]
    return jnp.maximum(out, 0.0)


if __name__ == "__main__":
    B, C, H, W = 2, 4, 16, 16
    key = jax.random.PRNGKey(0)
    ks = jax.random.split(key, 7)

    x = jax.random.normal(ks[0], (B, C, H, W), jnp.float32)
    # Deterministic synthetic weights (shapes from the module's __init__):
    eca_w = jax.random.normal(ks[1], (3,), jnp.float32) * 0.5            # 3 x Conv1d(1,1,1)
    sa_w2 = jax.random.normal(ks[2], (2 * 3 * 3,), jnp.float32) * 0.2    # Conv2d(2,1,3)
    sa_w3 = jax.random.normal(ks[3], (2 * 5 * 5,), jnp.float32) * 0.2    # Conv2d(2,1,5)
    sa_w4 = jax.random.normal(ks[4], (2 * 7 * 7,), jnp.float32) * 0.2    # Conv2d(2,1,7)
    conv_w = jax.random.normal(ks[5], (C * 7 * C,), jnp.float32) * 0.2   # Conv2d(7C,C,1)
    conv_b = jax.random.normal(ks[6], (C,), jnp.float32) * 0.1
    params = (eca_w, sa_w2, sa_w3, sa_w4, conv_w, conv_b)

    out = jax.block_until_ready(multi_ecbam(x, params))
    ref = multi_ecbam_ref(x, params)
    assert out.shape == (B, C, H, W)
    max_err = float(jnp.max(jnp.abs(out - ref)))
    # Tolerance covers the bf16 Toeplitz spatial-conv matmuls and the EUP
    # approximate-reciprocal sigmoids; everything else is exact f32.
    assert max_err < 6e-2, max_err
    print("KERNEL_OK")
</pallas_src>

<mosaic_0001>
module attributes {stable_mosaic.version = 11 : i64} {
  func.func @_multi_ecbam_kernel(%arg0: i32, %arg1: memref<1x2x4x256xf32, #tpu.memory_space<vmem>>, %arg2: memref<3xf32, #tpu.memory_space<smem>>, %arg3: memref<512x256xbf16, #tpu.memory_space<vmem>>, %arg4: memref<512x256xbf16, #tpu.memory_space<vmem>>, %arg5: memref<512x256xbf16, #tpu.memory_space<vmem>>, %arg6: memref<7x4x4xf32, #tpu.memory_space<vmem>>, %arg7: memref<4x1xf32, #tpu.memory_space<vmem>>, %arg8: memref<1x2x4x256xf32, #tpu.memory_space<vmem>>, %arg9: memref<2x512xf32, #tpu.memory_space<vmem>>) attributes {dimension_semantics = [#tpu.dimension_semantics<parallel>], iteration_bounds = array<i64: 1>, scalar_prefetch = 0 : i64, scratch_operands = 1 : i64, tpu.core_type = #tpu.core_type<tc>, window_params = [{transform_indices = @transform_0, window_bounds = array<i64: 1, 2, 4, 256>}, {transform_indices = @transform_1, window_bounds = array<i64: 3>}, {pipeline_mode = #tpu.pipeline_mode<synchronous>, transform_indices = @transform_2, window_bounds = array<i64: 512, 256>}, {pipeline_mode = #tpu.pipeline_mode<synchronous>, transform_indices = @transform_3, window_bounds = array<i64: 512, 256>}, {pipeline_mode = #tpu.pipeline_mode<synchronous>, transform_indices = @transform_4, window_bounds = array<i64: 512, 256>}, {pipeline_mode = #tpu.pipeline_mode<synchronous>, transform_indices = @transform_5, window_bounds = array<i64: 7, 4, 4>}, {pipeline_mode = #tpu.pipeline_mode<synchronous>, transform_indices = @transform_6, window_bounds = array<i64: 4, 1>}, {transform_indices = @transform_7, window_bounds = array<i64: 1, 2, 4, 256>}]} {
    %c0 = arith.constant 0 : index
    %c0_0 = arith.constant 0 : index
    %c0_1 = arith.constant 0 : index
    %c0_2 = arith.constant 0 : index
    %0 = vector.load %arg1[%c0, %c0_0, %c0_1, %c0_2] : memref<1x2x4x256xf32, #tpu.memory_space<vmem>>, vector<1x1x4x256xf32>
    %1 = vector.shape_cast %0 : vector<1x1x4x256xf32> to vector<4x256xf32>
    %c0_3 = arith.constant 0 : index
    %c1 = arith.constant 1 : index
    %c0_4 = arith.constant 0 : index
    %c0_5 = arith.constant 0 : index
    %2 = vector.load %arg1[%c0_3, %c1, %c0_4, %c0_5] : memref<1x2x4x256xf32, #tpu.memory_space<vmem>>, vector<1x1x4x256xf32>
    %3 = vector.shape_cast %2 : vector<1x1x4x256xf32> to vector<4x256xf32>
    %c0_6 = arith.constant 0 : index
    %4 = memref.load %arg2[%c0_6] : memref<3xf32, #tpu.memory_space<smem>>
    %cst = arith.constant dense<0.000000e+00> : vector<4xf32>
    %5 = vector.multi_reduction <add>, %1, %cst [1] : vector<4x256xf32> to vector<4xf32>
    %6 = vector.shape_cast %5 : vector<4xf32> to vector<4x1xf32>
    %cst_7 = arith.constant 2.560000e+02 : f32
    %7 = vector.broadcast %cst_7 : f32 to vector<4x1xf32>
    %8 = arith.divf %6, %7 : vector<4x1xf32>
    %cst_8 = arith.constant dense<0xFF800000> : vector<4xf32>
    %9 = vector.multi_reduction <maximumf>, %1, %cst_8 [1] : vector<4x256xf32> to vector<4xf32>
    %10 = vector.shape_cast %9 : vector<4xf32> to vector<4x1xf32>
    %11 = vector.broadcast %4 : f32 to vector<4x1xf32>
    %12 = arith.mulf %11, %8 : vector<4x1xf32>
    %cst_9 = arith.constant 0.000000e+00 : f32
    %13 = vector.broadcast %cst_9 : f32 to vector<4x1xf32>
    %14 = arith.cmpf oge, %12, %13 : vector<4x1xf32>
    %cst_10 = arith.constant 0.00999999977 : f32
    %15 = vector.broadcast %cst_10 : f32 to vector<4x1xf32>
    %16 = arith.mulf %15, %12 : vector<4x1xf32>
    %17 = arith.select %14, %12, %16 : vector<4x1xi1>, vector<4x1xf32>
    %18 = vector.broadcast %4 : f32 to vector<4x1xf32>
    %19 = arith.mulf %18, %10 : vector<4x1xf32>
    %cst_11 = arith.constant 0.000000e+00 : f32
    %20 = vector.broadcast %cst_11 : f32 to vector<4x1xf32>
    %21 = arith.cmpf oge, %19, %20 : vector<4x1xf32>
    %cst_12 = arith.constant 0.00999999977 : f32
    %22 = vector.broadcast %cst_12 : f32 to vector<4x1xf32>
    %23 = arith.mulf %22, %19 : vector<4x1xf32>
    %24 = arith.select %21, %19, %23 : vector<4x1xi1>, vector<4x1xf32>
    %25 = arith.addf %17, %24 : vector<4x1xf32>
    %cst_13 = arith.constant 0.000000e+00 : f32
    %26 = vector.broadcast %cst_13 : f32 to vector<4x1xf32>
    %27 = arith.subf %26, %25 : vector<4x1xf32>
    %cst_14 = arith.constant 8.000000e+01 : f32
    %28 = vector.broadcast %cst_14 : f32 to vector<4x1xf32>
    %29 = arith.minimumf %27, %28 : vector<4x1xf32>
    %30 = math.exp %29 : vector<4x1xf32>
    %cst_15 = arith.constant 1.000000e+00 : f32
    %31 = vector.broadcast %cst_15 : f32 to vector<4x1xf32>
    %32 = arith.addf %31, %30 : vector<4x1xf32>
    %33 = tpu.reciprocal %32 {approx = true} : vector<4x1xf32> -> vector<4x1xf32>
    %34 = vector.broadcast %33 : vector<4x1xf32> to vector<4x256xf32>
    %35 = arith.mulf %1, %34 : vector<4x256xf32>
    %cst_16 = arith.constant dense<0.000000e+00> : vector<256xf32>
    %36 = vector.multi_reduction <add>, %35, %cst_16 [0] : vector<4x256xf32> to vector<256xf32>
    %37 = vector.shape_cast %36 : vector<256xf32> to vector<1x256xf32>
    %cst_17 = arith.constant dense<0xFF800000> : vector<256xf32>
    %38 = vector.multi_reduction <maximumf>, %35, %cst_17 [0] : vector<4x256xf32> to vector<256xf32>
    %39 = vector.shape_cast %38 : vector<256xf32> to vector<1x256xf32>
    %cst_18 = arith.constant 2.500000e-01 : f32
    %40 = vector.broadcast %cst_18 : f32 to vector<1x256xf32>
    %41 = arith.mulf %37, %40 : vector<1x256xf32>
    %c0_19 = arith.constant 0 : index
    %c0_20 = arith.constant 0 : index
    %42 = vector.load %arg9[%c0_19, %c0_20] : memref<2x512xf32, #tpu.memory_space<vmem>>, vector<1x256xf32>
    tpu.vector_store %arg9[%c0_19, %c0_20], %41 {strides = array<i32>} : memref<2x512xf32, #tpu.memory_space<vmem>>, vector<1x256xf32>,
    %c0_21 = arith.constant 0 : index
    %c256 = arith.constant 256 : index
    %43 = vector.load %arg9[%c0_21, %c256] : memref<2x512xf32, #tpu.memory_space<vmem>>, vector<1x256xf32>
    tpu.vector_store %arg9[%c0_21, %c256], %39 {strides = array<i32>} : memref<2x512xf32, #tpu.memory_space<vmem>>, vector<1x256xf32>,
    %cst_22 = arith.constant dense<0.000000e+00> : vector<4xf32>
    %44 = vector.multi_reduction <add>, %3, %cst_22 [1] : vector<4x256xf32> to vector<4xf32>
    %45 = vector.shape_cast %44 : vector<4xf32> to vector<4x1xf32>
    %cst_23 = arith.constant 2.560000e+02 : f32
    %46 = vector.broadcast %cst_23 : f32 to vector<4x1xf32>
    %47 = arith.divf %45, %46 : vector<4x1xf32>
    %cst_24 = arith.constant dense<0xFF800000> : vector<4xf32>
    %48 = vector.multi_reduction <maximumf>, %3, %cst_24 [1] : vector<4x256xf32> to vector<4xf32>
    %49 = vector.shape_cast %48 : vector<4xf32> to vector<4x1xf32>
    %50 = vector.broadcast %4 : f32 to vector<4x1xf32>
    %51 = arith.mulf %50, %47 : vector<4x1xf32>
    %cst_25 = arith.constant 0.000000e+00 : f32
    %52 = vector.broadcast %cst_25 : f32 to vector<4x1xf32>
    %53 = arith.cmpf oge, %51, %52 : vector<4x1xf32>
    %cst_26 = arith.constant 0.00999999977 : f32
    %54 = vector.broadcast %cst_26 : f32 to vector<4x1xf32>
    %55 = arith.mulf %54, %51 : vector<4x1xf32>
    %56 = arith.select %53, %51, %55 : vector<4x1xi1>, vector<4x1xf32>
    %57 = vector.broadcast %4 : f32 to vector<4x1xf32>
    %58 = arith.mulf %57, %49 : vector<4x1xf32>
    %cst_27 = arith.constant 0.000000e+00 : f32
    %59 = vector.broadcast %cst_27 : f32 to vector<4x1xf32>
    %60 = arith.cmpf oge, %58, %59 : vector<4x1xf32>
    %cst_28 = arith.constant 0.00999999977 : f32
    %61 = vector.broadcast %cst_28 : f32 to vector<4x1xf32>
    %62 = arith.mulf %61, %58 : vector<4x1xf32>
    %63 = arith.select %60, %58, %62 : vector<4x1xi1>, vector<4x1xf32>
    %64 = arith.addf %56, %63 : vector<4x1xf32>
    %cst_29 = arith.constant 0.000000e+00 : f32
    %65 = vector.broadcast %cst_29 : f32 to vector<4x1xf32>
    %66 = arith.subf %65, %64 : vector<4x1xf32>
    %cst_30 = arith.constant 8.000000e+01 : f32
    %67 = vector.broadcast %cst_30 : f32 to vector<4x1xf32>
    %68 = arith.minimumf %66, %67 : vector<4x1xf32>
    %69 = math.exp %68 : vector<4x1xf32>
    %cst_31 = arith.constant 1.000000e+00 : f32
    %70 = vector.broadcast %cst_31 : f32 to vector<4x1xf32>
    %71 = arith.addf %70, %69 : vector<4x1xf32>
    %72 = tpu.reciprocal %71 {approx = true} : vector<4x1xf32> -> vector<4x1xf32>
    %73 = vector.broadcast %72 : vector<4x1xf32> to vector<4x256xf32>
    %74 = arith.mulf %3, %73 : vector<4x256xf32>
    %cst_32 = arith.constant dense<0.000000e+00> : vector<256xf32>
    %75 = vector.multi_reduction <add>, %74, %cst_32 [0] : vector<4x256xf32> to vector<256xf32>
    %76 = vector.shape_cast %75 : vector<256xf32> to vector<1x256xf32>
    %cst_33 = arith.constant dense<0xFF800000> : vector<256xf32>
    %77 = vector.multi_reduction <maximumf>, %74, %cst_33 [0] : vector<4x256xf32> to vector<256xf32>
    %78 = vector.shape_cast %77 : vector<256xf32> to vector<1x256xf32>
    %cst_34 = arith.constant 2.500000e-01 : f32
    %79 = vector.broadcast %cst_34 : f32 to vector<1x256xf32>
    %80 = arith.mulf %76, %79 : vector<1x256xf32>
    %c1_35 = arith.constant 1 : index
    %c0_36 = arith.constant 0 : index
    %81 = vector.load %arg9[%c1_35, %c0_36] : memref<2x512xf32, #tpu.memory_space<vmem>>, vector<1x256xf32>
    tpu.vector_store %arg9[%c1_35, %c0_36], %80 {strides = array<i32>} : memref<2x512xf32, #tpu.memory_space<vmem>>, vector<1x256xf32>,
    %c1_37 = arith.constant 1 : index
    %c256_38 = arith.constant 256 : index
    %82 = vector.load %arg9[%c1_37, %c256_38] : memref<2x512xf32, #tpu.memory_space<vmem>>, vector<1x256xf32>
    tpu.vector_store %arg9[%c1_37, %c256_38], %78 {strides = array<i32>} : memref<2x512xf32, #tpu.memory_space<vmem>>, vector<1x256xf32>,
    %c0_39 = arith.constant 0 : index
    %c0_40 = arith.constant 0 : index
    %83 = vector.load %arg9[%c0_39, %c0_40] : memref<2x512xf32, #tpu.memory_space<vmem>>, vector<2x512xf32>
    %84 = arith.truncf %83 : vector<2x512xf32> to vector<2x512xbf16>
    %c0_41 = arith.constant 0 : index
    %c0_42 = arith.constant 0 : index
    %85 = vector.load %arg3[%c0_41, %c0_42] : memref<512x256xbf16, #tpu.memory_space<vmem>>, vector<512x256xbf16>
    %cst_43 = arith.constant dense<0.000000e+00> : vector<2x256xf32>
    %86 = tpu.matmul %84, %85, %cst_43 {dimension_numbers = #tpu.dot_dimension_numbers<[1], [0], [0], [1], [0, 0, 1, 1], [], []>} : vector<2x512xbf16>, vector<512x256xbf16>, vector<2x256xf32> -> vector<2x256xf32>
    %cst_44 = arith.constant 0.000000e+00 : f32
    %87 = vector.broadcast %cst_44 : f32 to vector<2x256xf32>
    %88 = arith.cmpf oge, %86, %87 : vector<2x256xf32>
    %cst_45 = arith.constant 0.00999999977 : f32
    %89 = vector.broadcast %cst_45 : f32 to vector<2x256xf32>
    %90 = arith.mulf %89, %86 : vector<2x256xf32>
    %91 = arith.select %88, %86, %90 : vector<2x256xi1>, vector<2x256xf32>
    %cst_46 = arith.constant 0.000000e+00 : f32
    %92 = vector.broadcast %cst_46 : f32 to vector<2x256xf32>
    %93 = arith.subf %92, %91 : vector<2x256xf32>
    %cst_47 = arith.constant 8.000000e+01 : f32
    %94 = vector.broadcast %cst_47 : f32 to vector<2x256xf32>
    %95 = arith.minimumf %93, %94 : vector<2x256xf32>
    %96 = math.exp %95 : vector<2x256xf32>
    %cst_48 = arith.constant 1.000000e+00 : f32
    %97 = vector.broadcast %cst_48 : f32 to vector<2x256xf32>
    %98 = arith.addf %97, %96 : vector<2x256xf32>
    %99 = tpu.reciprocal %98 {approx = true} : vector<2x256xf32> -> vector<2x256xf32>
    %100 = vector.extract_strided_slice %99 {offsets = [0, 0], sizes = [1, 256], strides = [1, 1]} : vector<2x256xf32> to vector<1x256xf32>
    %101 = vector.broadcast %100 : vector<1x256xf32> to vector<4x256xf32>
    %102 = arith.mulf %35, %101 : vector<4x256xf32>
    %103 = vector.extract_strided_slice %99 {offsets = [1, 0], sizes = [1, 256], strides = [1, 1]} : vector<2x256xf32> to vector<1x256xf32>
    %104 = vector.broadcast %103 : vector<1x256xf32> to vector<4x256xf32>
    %105 = arith.mulf %74, %104 : vector<4x256xf32>
    %c1_49 = arith.constant 1 : index
    %106 = memref.load %arg2[%c1_49] : memref<3xf32, #tpu.memory_space<smem>>
    %cst_50 = arith.constant dense<0.000000e+00> : vector<4xf32>
    %107 = vector.multi_reduction <add>, %102, %cst_50 [1] : vector<4x256xf32> to vector<4xf32>
    %108 = vector.shape_cast %107 : vector<4xf32> to vector<4x1xf32>
    %cst_51 = arith.constant 2.560000e+02 : f32
    %109 = vector.broadcast %cst_51 : f32 to vector<4x1xf32>
    %110 = arith.divf %108, %109 : vector<4x1xf32>
    %cst_52 = arith.constant dense<0xFF800000> : vector<4xf32>
    %111 = vector.multi_reduction <maximumf>, %102, %cst_52 [1] : vector<4x256xf32> to vector<4xf32>
    %112 = vector.shape_cast %111 : vector<4xf32> to vector<4x1xf32>
    %113 = vector.broadcast %106 : f32 to vector<4x1xf32>
    %114 = arith.mulf %113, %110 : vector<4x1xf32>
    %cst_53 = arith.constant 0.000000e+00 : f32
    %115 = vector.broadcast %cst_53 : f32 to vector<4x1xf32>
    %116 = arith.cmpf oge, %114, %115 : vector<4x1xf32>
    %cst_54 = arith.constant 0.00999999977 : f32
    %117 = vector.broadcast %cst_54 : f32 to vector<4x1xf32>
    %118 = arith.mulf %117, %114 : vector<4x1xf32>
    %119 = arith.select %116, %114, %118 : vector<4x1xi1>, vector<4x1xf32>
    %120 = vector.broadcast %106 : f32 to vector<4x1xf32>
    %121 = arith.mulf %120, %112 : vector<4x1xf32>
    %cst_55 = arith.constant 0.000000e+00 : f32
    %122 = vector.broadcast %cst_55 : f32 to vector<4x1xf32>
    %123 = arith.cmpf oge, %121, %122 : vector<4x1xf32>
    %cst_56 = arith.constant 0.00999999977 : f32
    %124 = vector.broadcast %cst_56 : f32 to vector<4x1xf32>
    %125 = arith.mulf %124, %121 : vector<4x1xf32>
    %126 = arith.select %123, %121, %125 : vector<4x1xi1>, vector<4x1xf32>
    %127 = arith.addf %119, %126 : vector<4x1xf32>
    %cst_57 = arith.constant 0.000000e+00 : f32
    %128 = vector.broadcast %cst_57 : f32 to vector<4x1xf32>
    %129 = arith.subf %128, %127 : vector<4x1xf32>
    %cst_58 = arith.constant 8.000000e+01 : f32
    %130 = vector.broadcast %cst_58 : f32 to vector<4x1xf32>
    %131 = arith.minimumf %129, %130 : vector<4x1xf32>
    %132 = math.exp %131 : vector<4x1xf32>
    %cst_59 = arith.constant 1.000000e+00 : f32
    %133 = vector.broadcast %cst_59 : f32 to vector<4x1xf32>
    %134 = arith.addf %133, %132 : vector<4x1xf32>
    %135 = tpu.reciprocal %134 {approx = true} : vector<4x1xf32> -> vector<4x1xf32>
    %136 = vector.broadcast %135 : vector<4x1xf32> to vector<4x256xf32>
    %137 = arith.mulf %102, %136 : vector<4x256xf32>
    %cst_60 = arith.constant dense<0.000000e+00> : vector<256xf32>
    %138 = vector.multi_reduction <add>, %137, %cst_60 [0] : vector<4x256xf32> to vector<256xf32>
    %139 = vector.shape_cast %138 : vector<256xf32> to vector<1x256xf32>
    %cst_61 = arith.constant dense<0xFF800000> : vector<256xf32>
    %140 = vector.multi_reduction <maximumf>, %137, %cst_61 [0] : vector<4x256xf32> to vector<256xf32>
    %141 = vector.shape_cast %140 : vector<256xf32> to vector<1x256xf32>
    %cst_62 = arith.constant dense<0.000000e+00> : vector<4xf32>
    %142 = vector.multi_reduction <add>, %1, %cst_62 [1] : vector<4x256xf32> to vector<4xf32>
    %143 = vector.shape_cast %142 : vector<4xf32> to vector<4x1xf32>
    %cst_63 = arith.constant 2.560000e+02 : f32
    %144 = vector.broadcast %cst_63 : f32 to vector<4x1xf32>
    %145 = arith.divf %143, %144 : vector<4x1xf32>
    %cst_64 = arith.constant dense<0xFF800000> : vector<4xf32>
    %146 = vector.multi_reduction <maximumf>, %1, %cst_64 [1] : vector<4x256xf32> to vector<4xf32>
    %147 = vector.shape_cast %146 : vector<4xf32> to vector<4x1xf32>
    %148 = vector.broadcast %106 : f32 to vector<4x1xf32>
    %149 = arith.mulf %148, %145 : vector<4x1xf32>
    %cst_65 = arith.constant 0.000000e+00 : f32
    %150 = vector.broadcast %cst_65 : f32 to vector<4x1xf32>
    %151 = arith.cmpf oge, %149, %150 : vector<4x1xf32>
    %cst_66 = arith.constant 0.00999999977 : f32
    %152 = vector.broadcast %cst_66 : f32 to vector<4x1xf32>
    %153 = arith.mulf %152, %149 : vector<4x1xf32>
    %154 = arith.select %151, %149, %153 : vector<4x1xi1>, vector<4x1xf32>
    %155 = vector.broadcast %106 : f32 to vector<4x1xf32>
    %156 = arith.mulf %155, %147 : vector<4x1xf32>
    %cst_67 = arith.constant 0.000000e+00 : f32
    %157 = vector.broadcast %cst_67 : f32 to vector<4x1xf32>
    %158 = arith.cmpf oge, %156, %157 : vector<4x1xf32>
    %cst_68 = arith.constant 0.00999999977 : f32
    %159 = vector.broadcast %cst_68 : f32 to vector<4x1xf32>
    %160 = arith.mulf %159, %156 : vector<4x1xf32>
    %161 = arith.select %158, %156, %160 : vector<4x1xi1>, vector<4x1xf32>
    %162 = arith.addf %154, %161 : vector<4x1xf32>
    %cst_69 = arith.constant 0.000000e+00 : f32
    %163 = vector.broadcast %cst_69 : f32 to vector<4x1xf32>
    %164 = arith.subf %163, %162 : vector<4x1xf32>
    %cst_70 = arith.constant 8.000000e+01 : f32
    %165 = vector.broadcast %cst_70 : f32 to vector<4x1xf32>
    %166 = arith.minimumf %164, %165 : vector<4x1xf32>
    %167 = math.exp %166 : vector<4x1xf32>
    %cst_71 = arith.constant 1.000000e+00 : f32
    %168 = vector.broadcast %cst_71 : f32 to vector<4x1xf32>
    %169 = arith.addf %168, %167 : vector<4x1xf32>
    %170 = tpu.reciprocal %169 {approx = true} : vector<4x1xf32> -> vector<4x1xf32>
    %171 = vector.broadcast %170 : vector<4x1xf32> to vector<4x256xf32>
    %172 = arith.mulf %1, %171 : vector<4x256xf32>
    %cst_72 = arith.constant dense<0.000000e+00> : vector<256xf32>
    %173 = vector.multi_reduction <add>, %172, %cst_72 [0] : vector<4x256xf32> to vector<256xf32>
    %174 = vector.shape_cast %173 : vector<256xf32> to vector<1x256xf32>
    %cst_73 = arith.constant dense<0xFF800000> : vector<256xf32>
    %175 = vector.multi_reduction <maximumf>, %172, %cst_73 [0] : vector<4x256xf32> to vector<256xf32>
    %176 = vector.shape_cast %175 : vector<256xf32> to vector<1x256xf32>
    %177 = arith.addf %139, %174 : vector<1x256xf32>
    %178 = arith.maximumf %141, %176 : vector<1x256xf32>
    %cst_74 = arith.constant 1.250000e-01 : f32
    %179 = vector.broadcast %cst_74 : f32 to vector<1x256xf32>
    %180 = arith.mulf %177, %179 : vector<1x256xf32>
    %c0_75 = arith.constant 0 : index
    %c0_76 = arith.constant 0 : index
    %181 = vector.load %arg9[%c0_75, %c0_76] : memref<2x512xf32, #tpu.memory_space<vmem>>, vector<1x256xf32>
    tpu.vector_store %arg9[%c0_75, %c0_76], %180 {strides = array<i32>} : memref<2x512xf32, #tpu.memory_space<vmem>>, vector<1x256xf32>,
    %c0_77 = arith.constant 0 : index
    %c256_78 = arith.constant 256 : index
    %182 = vector.load %arg9[%c0_77, %c256_78] : memref<2x512xf32, #tpu.memory_space<vmem>>, vector<1x256xf32>
    tpu.vector_store %arg9[%c0_77, %c256_78], %178 {strides = array<i32>} : memref<2x512xf32, #tpu.memory_space<vmem>>, vector<1x256xf32>,
    %cst_79 = arith.constant dense<0.000000e+00> : vector<4xf32>
    %183 = vector.multi_reduction <add>, %105, %cst_79 [1] : vector<4x256xf32> to vector<4xf32>
    %184 = vector.shape_cast %183 : vector<4xf32> to vector<4x1xf32>
    %cst_80 = arith.constant 2.560000e+02 : f32
    %185 = vector.broadcast %cst_80 : f32 to vector<4x1xf32>
    %186 = arith.divf %184, %185 : vector<4x1xf32>
    %cst_81 = arith.constant dense<0xFF800000> : vector<4xf32>
    %187 = vector.multi_reduction <maximumf>, %105, %cst_81 [1] : vector<4x256xf32> to vector<4xf32>
    %188 = vector.shape_cast %187 : vector<4xf32> to vector<4x1xf32>
    %189 = vector.broadcast %106 : f32 to vector<4x1xf32>
    %190 = arith.mulf %189, %186 : vector<4x1xf32>
    %cst_82 = arith.constant 0.000000e+00 : f32
    %191 = vector.broadcast %cst_82 : f32 to vector<4x1xf32>
    %192 = arith.cmpf oge, %190, %191 : vector<4x1xf32>
    %cst_83 = arith.constant 0.00999999977 : f32
    %193 = vector.broadcast %cst_83 : f32 to vector<4x1xf32>
    %194 = arith.mulf %193, %190 : vector<4x1xf32>
    %195 = arith.select %192, %190, %194 : vector<4x1xi1>, vector<4x1xf32>
    %196 = vector.broadcast %106 : f32 to vector<4x1xf32>
    %197 = arith.mulf %196, %188 : vector<4x1xf32>
    %cst_84 = arith.constant 0.000000e+00 : f32
    %198 = vector.broadcast %cst_84 : f32 to vector<4x1xf32>
    %199 = arith.cmpf oge, %197, %198 : vector<4x1xf32>
    %cst_85 = arith.constant 0.00999999977 : f32
    %200 = vector.broadcast %cst_85 : f32 to vector<4x1xf32>
    %201 = arith.mulf %200, %197 : vector<4x1xf32>
    %202 = arith.select %199, %197, %201 : vector<4x1xi1>, vector<4x1xf32>
    %203 = arith.addf %195, %202 : vector<4x1xf32>
    %cst_86 = arith.constant 0.000000e+00 : f32
    %204 = vector.broadcast %cst_86 : f32 to vector<4x1xf32>
    %205 = arith.subf %204, %203 : vector<4x1xf32>
    %cst_87 = arith.constant 8.000000e+01 : f32
    %206 = vector.broadcast %cst_87 : f32 to vector<4x1xf32>
    %207 = arith.minimumf %205, %206 : vector<4x1xf32>
    %208 = math.exp %207 : vector<4x1xf32>
    %cst_88 = arith.constant 1.000000e+00 : f32
    %209 = vector.broadcast %cst_88 : f32 to vector<4x1xf32>
    %210 = arith.addf %209, %208 : vector<4x1xf32>
    %211 = tpu.reciprocal %210 {approx = true} : vector<4x1xf32> -> vector<4x1xf32>
    %212 = vector.broadcast %211 : vector<4x1xf32> to vector<4x256xf32>
    %213 = arith.mulf %105, %212 : vector<4x256xf32>
    %cst_89 = arith.constant dense<0.000000e+00> : vector<256xf32>
    %214 = vector.multi_reduction <add>, %213, %cst_89 [0] : vector<4x256xf32> to vector<256xf32>
    %215 = vector.shape_cast %214 : vector<256xf32> to vector<1x256xf32>
    %cst_90 = arith.constant dense<0xFF800000> : vector<256xf32>
    %216 = vector.multi_reduction <maximumf>, %213, %cst_90 [0] : vector<4x256xf32> to vector<256xf32>
    %217 = vector.shape_cast %216 : vector<256xf32> to vector<1x256xf32>
    %cst_91 = arith.constant dense<0.000000e+00> : vector<4xf32>
    %218 = vector.multi_reduction <add>, %3, %cst_91 [1] : vector<4x256xf32> to vector<4xf32>
    %219 = vector.shape_cast %218 : vector<4xf32> to vector<4x1xf32>
    %cst_92 = arith.constant 2.560000e+02 : f32
    %220 = vector.broadcast %cst_92 : f32 to vector<4x1xf32>
    %221 = arith.divf %219, %220 : vector<4x1xf32>
    %cst_93 = arith.constant dense<0xFF800000> : vector<4xf32>
    %222 = vector.multi_reduction <maximumf>, %3, %cst_93 [1] : vector<4x256xf32> to vector<4xf32>
    %223 = vector.shape_cast %222 : vector<4xf32> to vector<4x1xf32>
    %224 = vector.broadcast %106 : f32 to vector<4x1xf32>
    %225 = arith.mulf %224, %221 : vector<4x1xf32>
    %cst_94 = arith.constant 0.000000e+00 : f32
    %226 = vector.broadcast %cst_94 : f32 to vector<4x1xf32>
    %227 = arith.cmpf oge, %225, %226 : vector<4x1xf32>
    %cst_95 = arith.constant 0.00999999977 : f32
    %228 = vector.broadcast %cst_95 : f32 to vector<4x1xf32>
    %229 = arith.mulf %228, %225 : vector<4x1xf32>
    %230 = arith.select %227, %225, %229 : vector<4x1xi1>, vector<4x1xf32>
    %231 = vector.broadcast %106 : f32 to vector<4x1xf32>
    %232 = arith.mulf %231, %223 : vector<4x1xf32>
    %cst_96 = arith.constant 0.000000e+00 : f32
    %233 = vector.broadcast %cst_96 : f32 to vector<4x1xf32>
    %234 = arith.cmpf oge, %232, %233 : vector<4x1xf32>
    %cst_97 = arith.constant 0.00999999977 : f32
    %235 = vector.broadcast %cst_97 : f32 to vector<4x1xf32>
    %236 = arith.mulf %235, %232 : vector<4x1xf32>
    %237 = arith.select %234, %232, %236 : vector<4x1xi1>, vector<4x1xf32>
    %238 = arith.addf %230, %237 : vector<4x1xf32>
    %cst_98 = arith.constant 0.000000e+00 : f32
    %239 = vector.broadcast %cst_98 : f32 to vector<4x1xf32>
    %240 = arith.subf %239, %238 : vector<4x1xf32>
    %cst_99 = arith.constant 8.000000e+01 : f32
    %241 = vector.broadcast %cst_99 : f32 to vector<4x1xf32>
    %242 = arith.minimumf %240, %241 : vector<4x1xf32>
    %243 = math.exp %242 : vector<4x1xf32>
    %cst_100 = arith.constant 1.000000e+00 : f32
    %244 = vector.broadcast %cst_100 : f32 to vector<4x1xf32>
    %245 = arith.addf %244, %243 : vector<4x1xf32>
    %246 = tpu.reciprocal %245 {approx = true} : vector<4x1xf32> -> vector<4x1xf32>
    %247 = vector.broadcast %246 : vector<4x1xf32> to vector<4x256xf32>
    %248 = arith.mulf %3, %247 : vector<4x256xf32>
    %cst_101 = arith.constant dense<0.000000e+00> : vector<256xf32>
    %249 = vector.multi_reduction <add>, %248, %cst_101 [0] : vector<4x256xf32> to vector<256xf32>
    %250 = vector.shape_cast %249 : vector<256xf32> to vector<1x256xf32>
    %cst_102 = arith.constant dense<0xFF800000> : vector<256xf32>
    %251 = vector.multi_reduction <maximumf>, %248, %cst_102 [0] : vector<4x256xf32> to vector<256xf32>
    %252 = vector.shape_cast %251 : vector<256xf32> to vector<1x256xf32>
    %253 = arith.addf %215, %250 : vector<1x256xf32>
    %254 = arith.maximumf %217, %252 : vector<1x256xf32>
    %cst_103 = arith.constant 1.250000e-01 : f32
    %255 = vector.broadcast %cst_103 : f32 to vector<1x256xf32>
    %256 = arith.mulf %253, %255 : vector<1x256xf32>
    %c1_104 = arith.constant 1 : index
    %c0_105 = arith.constant 0 : index
    %257 = vector.load %arg9[%c1_104, %c0_105] : memref<2x512xf32, #tpu.memory_space<vmem>>, vector<1x256xf32>
    tpu.vector_store %arg9[%c1_104, %c0_105], %256 {strides = array<i32>} : memref<2x512xf32, #tpu.memory_space<vmem>>, vector<1x256xf32>,
    %c1_106 = arith.constant 1 : index
    %c256_107 = arith.constant 256 : index
    %258 = vector.load %arg9[%c1_106, %c256_107] : memref<2x512xf32, #tpu.memory_space<vmem>>, vector<1x256xf32>
    tpu.vector_store %arg9[%c1_106, %c256_107], %254 {strides = array<i32>} : memref<2x512xf32, #tpu.memory_space<vmem>>, vector<1x256xf32>,
    %c0_108 = arith.constant 0 : index
    %c0_109 = arith.constant 0 : index
    %259 = vector.load %arg9[%c0_108, %c0_109] : memref<2x512xf32, #tpu.memory_space<vmem>>, vector<2x512xf32>
    %260 = arith.truncf %259 : vector<2x512xf32> to vector<2x512xbf16>
    %c0_110 = arith.constant 0 : index
    %c0_111 = arith.constant 0 : index
    %261 = vector.load %arg4[%c0_110, %c0_111] : memref<512x256xbf16, #tpu.memory_space<vmem>>, vector<512x256xbf16>
    %cst_112 = arith.constant dense<0.000000e+00> : vector<2x256xf32>
    %262 = tpu.matmul %260, %261, %cst_112 {dimension_numbers = #tpu.dot_dimension_numbers<[1], [0], [0], [1], [0, 0, 1, 1], [], []>} : vector<2x512xbf16>, vector<512x256xbf16>, vector<2x256xf32> -> vector<2x256xf32>
    %cst_113 = arith.constant 0.000000e+00 : f32
    %263 = vector.broadcast %cst_113 : f32 to vector<2x256xf32>
    %264 = arith.cmpf oge, %262, %263 : vector<2x256xf32>
    %cst_114 = arith.constant 0.00999999977 : f32
    %265 = vector.broadcast %cst_114 : f32 to vector<2x256xf32>
    %266 = arith.mulf %265, %262 : vector<2x256xf32>
    %267 = arith.select %264, %262, %266 : vector<2x256xi1>, vector<2x256xf32>
    %cst_115 = arith.constant 0.000000e+00 : f32
    %268 = vector.broadcast %cst_115 : f32 to vector<2x256xf32>
    %269 = arith.subf %268, %267 : vector<2x256xf32>
    %cst_116 = arith.constant 8.000000e+01 : f32
    %270 = vector.broadcast %cst_116 : f32 to vector<2x256xf32>
    %271 = arith.minimumf %269, %270 : vector<2x256xf32>
    %272 = math.exp %271 : vector<2x256xf32>
    %cst_117 = arith.constant 1.000000e+00 : f32
    %273 = vector.broadcast %cst_117 : f32 to vector<2x256xf32>
    %274 = arith.addf %273, %272 : vector<2x256xf32>
    %275 = tpu.reciprocal %274 {approx = true} : vector<2x256xf32> -> vector<2x256xf32>
    %276 = vector.extract_strided_slice %275 {offsets = [0, 0], sizes = [1, 256], strides = [1, 1]} : vector<2x256xf32> to vector<1x256xf32>
    %277 = vector.broadcast %276 : vector<1x256xf32> to vector<4x256xf32>
    %278 = arith.mulf %137, %277 : vector<4x256xf32>
    %279 = vector.extract_strided_slice %275 {offsets = [0, 0], sizes = [1, 256], strides = [1, 1]} : vector<2x256xf32> to vector<1x256xf32>
    %280 = vector.broadcast %279 : vector<1x256xf32> to vector<4x256xf32>
    %281 = arith.mulf %172, %280 : vector<4x256xf32>
    %282 = vector.extract_strided_slice %275 {offsets = [1, 0], sizes = [1, 256], strides = [1, 1]} : vector<2x256xf32> to vector<1x256xf32>
    %283 = vector.broadcast %282 : vector<1x256xf32> to vector<4x256xf32>
    %284 = arith.mulf %213, %283 : vector<4x256xf32>
    %285 = vector.extract_strided_slice %275 {offsets = [1, 0], sizes = [1, 256], strides = [1, 1]} : vector<2x256xf32> to vector<1x256xf32>
    %286 = vector.broadcast %285 : vector<1x256xf32> to vector<4x256xf32>
    %287 = arith.mulf %248, %286 : vector<4x256xf32>
    %c2 = arith.constant 2 : index
    %288 = memref.load %arg2[%c2] : memref<3xf32, #tpu.memory_space<smem>>
    %cst_118 = arith.constant dense<0.000000e+00> : vector<4xf32>
    %289 = vector.multi_reduction <add>, %278, %cst_118 [1] : vector<4x256xf32> to vector<4xf32>
    %290 = vector.shape_cast %289 : vector<4xf32> to vector<4x1xf32>
    %cst_119 = arith.constant 2.560000e+02 : f32
    %291 = vector.broadcast %cst_119 : f32 to vector<4x1xf32>
    %292 = arith.divf %290, %291 : vector<4x1xf32>
    %cst_120 = arith.constant dense<0xFF800000> : vector<4xf32>
    %293 = vector.multi_reduction <maximumf>, %278, %cst_120 [1] : vector<4x256xf32> to vector<4xf32>
    %294 = vector.shape_cast %293 : vector<4xf32> to vector<4x1xf32>
    %295 = vector.broadcast %288 : f32 to vector<4x1xf32>
    %296 = arith.mulf %295, %292 : vector<4x1xf32>
    %cst_121 = arith.constant 0.000000e+00 : f32
    %297 = vector.broadcast %cst_121 : f32 to vector<4x1xf32>
    %298 = arith.cmpf oge, %296, %297 : vector<4x1xf32>
    %cst_122 = arith.constant 0.00999999977 : f32
    %299 = vector.broadcast %cst_122 : f32 to vector<4x1xf32>
    %300 = arith.mulf %299, %296 : vector<4x1xf32>
    %301 = arith.select %298, %296, %300 : vector<4x1xi1>, vector<4x1xf32>
    %302 = vector.broadcast %288 : f32 to vector<4x1xf32>
    %303 = arith.mulf %302, %294 : vector<4x1xf32>
    %cst_123 = arith.constant 0.000000e+00 : f32
    %304 = vector.broadcast %cst_123 : f32 to vector<4x1xf32>
    %305 = arith.cmpf oge, %303, %304 : vector<4x1xf32>
    %cst_124 = arith.constant 0.00999999977 : f32
    %306 = vector.broadcast %cst_124 : f32 to vector<4x1xf32>
    %307 = arith.mulf %306, %303 : vector<4x1xf32>
    %308 = arith.select %305, %303, %307 : vector<4x1xi1>, vector<4x1xf32>
    %309 = arith.addf %301, %308 : vector<4x1xf32>
    %cst_125 = arith.constant 0.000000e+00 : f32
    %310 = vector.broadcast %cst_125 : f32 to vector<4x1xf32>
    %311 = arith.subf %310, %309 : vector<4x1xf32>
    %cst_126 = arith.constant 8.000000e+01 : f32
    %312 = vector.broadcast %cst_126 : f32 to vector<4x1xf32>
    %313 = arith.minimumf %311, %312 : vector<4x1xf32>
    %314 = math.exp %313 : vector<4x1xf32>
    %cst_127 = arith.constant 1.000000e+00 : f32
    %315 = vector.broadcast %cst_127 : f32 to vector<4x1xf32>
    %316 = arith.addf %315, %314 : vector<4x1xf32>
    %317 = tpu.reciprocal %316 {approx = true} : vector<4x1xf32> -> vector<4x1xf32>
    %318 = vector.broadcast %317 : vector<4x1xf32> to vector<4x256xf32>
    %319 = arith.mulf %278, %318 : vector<4x256xf32>
    %cst_128 = arith.constant dense<0.000000e+00> : vector<256xf32>
    %320 = vector.multi_reduction <add>, %319, %cst_128 [0] : vector<4x256xf32> to vector<256xf32>
    %321 = vector.shape_cast %320 : vector<256xf32> to vector<1x256xf32>
    %cst_129 = arith.constant dense<0xFF800000> : vector<256xf32>
    %322 = vector.multi_reduction <maximumf>, %319, %cst_129 [0] : vector<4x256xf32> to vector<256xf32>
    %323 = vector.shape_cast %322 : vector<256xf32> to vector<1x256xf32>
    %cst_130 = arith.constant dense<0.000000e+00> : vector<4xf32>
    %324 = vector.multi_reduction <add>, %281, %cst_130 [1] : vector<4x256xf32> to vector<4xf32>
    %325 = vector.shape_cast %324 : vector<4xf32> to vector<4x1xf32>
    %cst_131 = arith.constant 2.560000e+02 : f32
    %326 = vector.broadcast %cst_131 : f32 to vector<4x1xf32>
    %327 = arith.divf %325, %326 : vector<4x1xf32>
    %cst_132 = arith.constant dense<0xFF800000> : vector<4xf32>
    %328 = vector.multi_reduction <maximumf>, %281, %cst_132 [1] : vector<4x256xf32> to vector<4xf32>
    %329 = vector.shape_cast %328 : vector<4xf32> to vector<4x1xf32>
    %330 = vector.broadcast %288 : f32 to vector<4x1xf32>
    %331 = arith.mulf %330, %327 : vector<4x1xf32>
    %cst_133 = arith.constant 0.000000e+00 : f32
    %332 = vector.broadcast %cst_133 : f32 to vector<4x1xf32>
    %333 = arith.cmpf oge, %331, %332 : vector<4x1xf32>
    %cst_134 = arith.constant 0.00999999977 : f32
    %334 = vector.broadcast %cst_134 : f32 to vector<4x1xf32>
    %335 = arith.mulf %334, %331 : vector<4x1xf32>
    %336 = arith.select %333, %331, %335 : vector<4x1xi1>, vector<4x1xf32>
    %337 = vector.broadcast %288 : f32 to vector<4x1xf32>
    %338 = arith.mulf %337, %329 : vector<4x1xf32>
    %cst_135 = arith.constant 0.000000e+00 : f32
    %339 = vector.broadcast %cst_135 : f32 to vector<4x1xf32>
    %340 = arith.cmpf oge, %338, %339 : vector<4x1xf32>
    %cst_136 = arith.constant 0.00999999977 : f32
    %341 = vector.broadcast %cst_136 : f32 to vector<4x1xf32>
    %342 = arith.mulf %341, %338 : vector<4x1xf32>
    %343 = arith.select %340, %338, %342 : vector<4x1xi1>, vector<4x1xf32>
    %344 = arith.addf %336, %343 : vector<4x1xf32>
    %cst_137 = arith.constant 0.000000e+00 : f32
    %345 = vector.broadcast %cst_137 : f32 to vector<4x1xf32>
    %346 = arith.subf %345, %344 : vector<4x1xf32>
    %cst_138 = arith.constant 8.000000e+01 : f32
    %347 = vector.broadcast %cst_138 : f32 to vector<4x1xf32>
    %348 = arith.minimumf %346, %347 : vector<4x1xf32>
    %349 = math.exp %348 : vector<4x1xf32>
    %cst_139 = arith.constant 1.000000e+00 : f32
    %350 = vector.broadcast %cst_139 : f32 to vector<4x1xf32>
    %351 = arith.addf %350, %349 : vector<4x1xf32>
    %352 = tpu.reciprocal %351 {approx = true} : vector<4x1xf32> -> vector<4x1xf32>
    %353 = vector.broadcast %352 : vector<4x1xf32> to vector<4x256xf32>
    %354 = arith.mulf %281, %353 : vector<4x256xf32>
    %cst_140 = arith.constant dense<0.000000e+00> : vector<256xf32>
    %355 = vector.multi_reduction <add>, %354, %cst_140 [0] : vector<4x256xf32> to vector<256xf32>
    %356 = vector.shape_cast %355 : vector<256xf32> to vector<1x256xf32>
    %cst_141 = arith.constant dense<0xFF800000> : vector<256xf32>
    %357 = vector.multi_reduction <maximumf>, %354, %cst_141 [0] : vector<4x256xf32> to vector<256xf32>
    %358 = vector.shape_cast %357 : vector<256xf32> to vector<1x256xf32>
    %359 = arith.addf %321, %356 : vector<1x256xf32>
    %360 = arith.maximumf %323, %358 : vector<1x256xf32>
    %cst_142 = arith.constant dense<0.000000e+00> : vector<4xf32>
    %361 = vector.multi_reduction <add>, %1, %cst_142 [1] : vector<4x256xf32> to vector<4xf32>
    %362 = vector.shape_cast %361 : vector<4xf32> to vector<4x1xf32>
    %cst_143 = arith.constant 2.560000e+02 : f32
    %363 = vector.broadcast %cst_143 : f32 to vector<4x1xf32>
    %364 = arith.divf %362, %363 : vector<4x1xf32>
    %cst_144 = arith.constant dense<0xFF800000> : vector<4xf32>
    %365 = vector.multi_reduction <maximumf>, %1, %cst_144 [1] : vector<4x256xf32> to vector<4xf32>
    %366 = vector.shape_cast %365 : vector<4xf32> to vector<4x1xf32>
    %367 = vector.broadcast %288 : f32 to vector<4x1xf32>
    %368 = arith.mulf %367, %364 : vector<4x1xf32>
    %cst_145 = arith.constant 0.000000e+00 : f32
    %369 = vector.broadcast %cst_145 : f32 to vector<4x1xf32>
    %370 = arith.cmpf oge, %368, %369 : vector<4x1xf32>
    %cst_146 = arith.constant 0.00999999977 : f32
    %371 = vector.broadcast %cst_146 : f32 to vector<4x1xf32>
    %372 = arith.mulf %371, %368 : vector<4x1xf32>
    %373 = arith.select %370, %368, %372 : vector<4x1xi1>, vector<4x1xf32>
    %374 = vector.broadcast %288 : f32 to vector<4x1xf32>
    %375 = arith.mulf %374, %366 : vector<4x1xf32>
    %cst_147 = arith.constant 0.000000e+00 : f32
    %376 = vector.broadcast %cst_147 : f32 to vector<4x1xf32>
    %377 = arith.cmpf oge, %375, %376 : vector<4x1xf32>
    %cst_148 = arith.constant 0.00999999977 : f32
    %378 = vector.broadcast %cst_148 : f32 to vector<4x1xf32>
    %379 = arith.mulf %378, %375 : vector<4x1xf32>
    %380 = arith.select %377, %375, %379 : vector<4x1xi1>, vector<4x1xf32>
    %381 = arith.addf %373, %380 : vector<4x1xf32>
    %cst_149 = arith.constant 0.000000e+00 : f32
    %382 = vector.broadcast %cst_149 : f32 to vector<4x1xf32>
    %383 = arith.subf %382, %381 : vector<4x1xf32>
    %cst_150 = arith.constant 8.000000e+01 : f32
    %384 = vector.broadcast %cst_150 : f32 to vector<4x1xf32>
    %385 = arith.minimumf %383, %384 : vector<4x1xf32>
    %386 = math.exp %385 : vector<4x1xf32>
    %cst_151 = arith.constant 1.000000e+00 : f32
    %387 = vector.broadcast %cst_151 : f32 to vector<4x1xf32>
    %388 = arith.addf %387, %386 : vector<4x1xf32>
    %389 = tpu.reciprocal %388 {approx = true} : vector<4x1xf32> -> vector<4x1xf32>
    %390 = vector.broadcast %389 : vector<4x1xf32> to vector<4x256xf32>
    %391 = arith.mulf %1, %390 : vector<4x256xf32>
    %cst_152 = arith.constant dense<0.000000e+00> : vector<256xf32>
    %392 = vector.multi_reduction <add>, %391, %cst_152 [0] : vector<4x256xf32> to vector<256xf32>
    %393 = vector.shape_cast %392 : vector<256xf32> to vector<1x256xf32>
    %cst_153 = arith.constant dense<0xFF800000> : vector<256xf32>
    %394 = vector.multi_reduction <maximumf>, %391, %cst_153 [0] : vector<4x256xf32> to vector<256xf32>
    %395 = vector.shape_cast %394 : vector<256xf32> to vector<1x256xf32>
    %396 = arith.addf %359, %393 : vector<1x256xf32>
    %397 = arith.maximumf %360, %395 : vector<1x256xf32>
    %cst_154 = arith.constant 0.0833333358 : f32
    %398 = vector.broadcast %cst_154 : f32 to vector<1x256xf32>
    %399 = arith.mulf %396, %398 : vector<1x256xf32>
    %c0_155 = arith.constant 0 : index
    %c0_156 = arith.constant 0 : index
    %400 = vector.load %arg9[%c0_155, %c0_156] : memref<2x512xf32, #tpu.memory_space<vmem>>, vector<1x256xf32>
    tpu.vector_store %arg9[%c0_155, %c0_156], %399 {strides = array<i32>} : memref<2x512xf32, #tpu.memory_space<vmem>>, vector<1x256xf32>,
    %c0_157 = arith.constant 0 : index
    %c256_158 = arith.constant 256 : index
    %401 = vector.load %arg9[%c0_157, %c256_158] : memref<2x512xf32, #tpu.memory_space<vmem>>, vector<1x256xf32>
    tpu.vector_store %arg9[%c0_157, %c256_158], %397 {strides = array<i32>} : memref<2x512xf32, #tpu.memory_space<vmem>>, vector<1x256xf32>,
    %cst_159 = arith.constant dense<0.000000e+00> : vector<4xf32>
    %402 = vector.multi_reduction <add>, %284, %cst_159 [1] : vector<4x256xf32> to vector<4xf32>
    %403 = vector.shape_cast %402 : vector<4xf32> to vector<4x1xf32>
    %cst_160 = arith.constant 2.560000e+02 : f32
    %404 = vector.broadcast %cst_160 : f32 to vector<4x1xf32>
    %405 = arith.divf %403, %404 : vector<4x1xf32>
    %cst_161 = arith.constant dense<0xFF800000> : vector<4xf32>
    %406 = vector.multi_reduction <maximumf>, %284, %cst_161 [1] : vector<4x256xf32> to vector<4xf32>
    %407 = vector.shape_cast %406 : vector<4xf32> to vector<4x1xf32>
    %408 = vector.broadcast %288 : f32 to vector<4x1xf32>
    %409 = arith.mulf %408, %405 : vector<4x1xf32>
    %cst_162 = arith.constant 0.000000e+00 : f32
    %410 = vector.broadcast %cst_162 : f32 to vector<4x1xf32>
    %411 = arith.cmpf oge, %409, %410 : vector<4x1xf32>
    %cst_163 = arith.constant 0.00999999977 : f32
    %412 = vector.broadcast %cst_163 : f32 to vector<4x1xf32>
    %413 = arith.mulf %412, %409 : vector<4x1xf32>
    %414 = arith.select %411, %409, %413 : vector<4x1xi1>, vector<4x1xf32>
    %415 = vector.broadcast %288 : f32 to vector<4x1xf32>
    %416 = arith.mulf %415, %407 : vector<4x1xf32>
    %cst_164 = arith.constant 0.000000e+00 : f32
    %417 = vector.broadcast %cst_164 : f32 to vector<4x1xf32>
    %418 = arith.cmpf oge, %416, %417 : vector<4x1xf32>
    %cst_165 = arith.constant 0.00999999977 : f32
    %419 = vector.broadcast %cst_165 : f32 to vector<4x1xf32>
    %420 = arith.mulf %419, %416 : vector<4x1xf32>
    %421 = arith.select %418, %416, %420 : vector<4x1xi1>, vector<4x1xf32>
    %422 = arith.addf %414, %421 : vector<4x1xf32>
    %cst_166 = arith.constant 0.000000e+00 : f32
    %423 = vector.broadcast %cst_166 : f32 to vector<4x1xf32>
    %424 = arith.subf %423, %422 : vector<4x1xf32>
    %cst_167 = arith.constant 8.000000e+01 : f32
    %425 = vector.broadcast %cst_167 : f32 to vector<4x1xf32>
    %426 = arith.minimumf %424, %425 : vector<4x1xf32>
    %427 = math.exp %426 : vector<4x1xf32>
    %cst_168 = arith.constant 1.000000e+00 : f32
    %428 = vector.broadcast %cst_168 : f32 to vector<4x1xf32>
    %429 = arith.addf %428, %427 : vector<4x1xf32>
    %430 = tpu.reciprocal %429 {approx = true} : vector<4x1xf32> -> vector<4x1xf32>
    %431 = vector.broadcast %430 : vector<4x1xf32> to vector<4x256xf32>
    %432 = arith.mulf %284, %431 : vector<4x256xf32>
    %cst_169 = arith.constant dense<0.000000e+00> : vector<256xf32>
    %433 = vector.multi_reduction <add>, %432, %cst_169 [0] : vector<4x256xf32> to vector<256xf32>
    %434 = vector.shape_cast %433 : vector<256xf32> to vector<1x256xf32>
    %cst_170 = arith.constant dense<0xFF800000> : vector<256xf32>
    %435 = vector.multi_reduction <maximumf>, %432, %cst_170 [0] : vector<4x256xf32> to vector<256xf32>
    %436 = vector.shape_cast %435 : vector<256xf32> to vector<1x256xf32>
    %cst_171 = arith.constant dense<0.000000e+00> : vector<4xf32>
    %437 = vector.multi_reduction <add>, %287, %cst_171 [1] : vector<4x256xf32> to vector<4xf32>
    %438 = vector.shape_cast %437 : vector<4xf32> to vector<4x1xf32>
    %cst_172 = arith.constant 2.560000e+02 : f32
    %439 = vector.broadcast %cst_172 : f32 to vector<4x1xf32>
    %440 = arith.divf %438, %439 : vector<4x1xf32>
    %cst_173 = arith.constant dense<0xFF800000> : vector<4xf32>
    %441 = vector.multi_reduction <maximumf>, %287, %cst_173 [1] : vector<4x256xf32> to vector<4xf32>
    %442 = vector.shape_cast %441 : vector<4xf32> to vector<4x1xf32>
    %443 = vector.broadcast %288 : f32 to vector<4x1xf32>
    %444 = arith.mulf %443, %440 : vector<4x1xf32>
    %cst_174 = arith.constant 0.000000e+00 : f32
    %445 = vector.broadcast %cst_174 : f32 to vector<4x1xf32>
    %446 = arith.cmpf oge, %444, %445 : vector<4x1xf32>
    %cst_175 = arith.constant 0.00999999977 : f32
    %447 = vector.broadcast %cst_175 : f32 to vector<4x1xf32>
    %448 = arith.mulf %447, %444 : vector<4x1xf32>
    %449 = arith.select %446, %444, %448 : vector<4x1xi1>, vector<4x1xf32>
    %450 = vector.broadcast %288 : f32 to vector<4x1xf32>
    %451 = arith.mulf %450, %442 : vector<4x1xf32>
    %cst_176 = arith.constant 0.000000e+00 : f32
    %452 = vector.broadcast %cst_176 : f32 to vector<4x1xf32>
    %453 = arith.cmpf oge, %451, %452 : vector<4x1xf32>
    %cst_177 = arith.constant 0.00999999977 : f32
    %454 = vector.broadcast %cst_177 : f32 to vector<4x1xf32>
    %455 = arith.mulf %454, %451 : vector<4x1xf32>
    %456 = arith.select %453, %451, %455 : vector<4x1xi1>, vector<4x1xf32>
    %457 = arith.addf %449, %456 : vector<4x1xf32>
    %cst_178 = arith.constant 0.000000e+00 : f32
    %458 = vector.broadcast %cst_178 : f32 to vector<4x1xf32>
    %459 = arith.subf %458, %457 : vector<4x1xf32>
    %cst_179 = arith.constant 8.000000e+01 : f32
    %460 = vector.broadcast %cst_179 : f32 to vector<4x1xf32>
    %461 = arith.minimumf %459, %460 : vector<4x1xf32>
    %462 = math.exp %461 : vector<4x1xf32>
    %cst_180 = arith.constant 1.000000e+00 : f32
    %463 = vector.broadcast %cst_180 : f32 to vector<4x1xf32>
    %464 = arith.addf %463, %462 : vector<4x1xf32>
    %465 = tpu.reciprocal %464 {approx = true} : vector<4x1xf32> -> vector<4x1xf32>
    %466 = vector.broadcast %465 : vector<4x1xf32> to vector<4x256xf32>
    %467 = arith.mulf %287, %466 : vector<4x256xf32>
    %cst_181 = arith.constant dense<0.000000e+00> : vector<256xf32>
    %468 = vector.multi_reduction <add>, %467, %cst_181 [0] : vector<4x256xf32> to vector<256xf32>
    %469 = vector.shape_cast %468 : vector<256xf32> to vector<1x256xf32>
    %cst_182 = arith.constant dense<0xFF800000> : vector<256xf32>
    %470 = vector.multi_reduction <maximumf>, %467, %cst_182 [0] : vector<4x256xf32> to vector<256xf32>
    %471 = vector.shape_cast %470 : vector<256xf32> to vector<1x256xf32>
    %472 = arith.addf %434, %469 : vector<1x256xf32>
    %473 = arith.maximumf %436, %471 : vector<1x256xf32>
    %cst_183 = arith.constant dense<0.000000e+00> : vector<4xf32>
    %474 = vector.multi_reduction <add>, %3, %cst_183 [1] : vector<4x256xf32> to vector<4xf32>
    %475 = vector.shape_cast %474 : vector<4xf32> to vector<4x1xf32>
    %cst_184 = arith.constant 2.560000e+02 : f32
    %476 = vector.broadcast %cst_184 : f32 to vector<4x1xf32>
    %477 = arith.divf %475, %476 : vector<4x1xf32>
    %cst_185 = arith.constant dense<0xFF800000> : vector<4xf32>
    %478 = vector.multi_reduction <maximumf>, %3, %cst_185 [1] : vector<4x256xf32> to vector<4xf32>
    %479 = vector.shape_cast %478 : vector<4xf32> to vector<4x1xf32>
    %480 = vector.broadcast %288 : f32 to vector<4x1xf32>
    %481 = arith.mulf %480, %477 : vector<4x1xf32>
    %cst_186 = arith.constant 0.000000e+00 : f32
    %482 = vector.broadcast %cst_186 : f32 to vector<4x1xf32>
    %483 = arith.cmpf oge, %481, %482 : vector<4x1xf32>
    %cst_187 = arith.constant 0.00999999977 : f32
    %484 = vector.broadcast %cst_187 : f32 to vector<4x1xf32>
    %485 = arith.mulf %484, %481 : vector<4x1xf32>
    %486 = arith.select %483, %481, %485 : vector<4x1xi1>, vector<4x1xf32>
    %487 = vector.broadcast %288 : f32 to vector<4x1xf32>
    %488 = arith.mulf %487, %479 : vector<4x1xf32>
    %cst_188 = arith.constant 0.000000e+00 : f32
    %489 = vector.broadcast %cst_188 : f32 to vector<4x1xf32>
    %490 = arith.cmpf oge, %488, %489 : vector<4x1xf32>
    %cst_189 = arith.constant 0.00999999977 : f32
    %491 = vector.broadcast %cst_189 : f32 to vector<4x1xf32>
    %492 = arith.mulf %491, %488 : vector<4x1xf32>
    %493 = arith.select %490, %488, %492 : vector<4x1xi1>, vector<4x1xf32>
    %494 = arith.addf %486, %493 : vector<4x1xf32>
    %cst_190 = arith.constant 0.000000e+00 : f32
    %495 = vector.broadcast %cst_190 : f32 to vector<4x1xf32>
    %496 = arith.subf %495, %494 : vector<4x1xf32>
    %cst_191 = arith.constant 8.000000e+01 : f32
    %497 = vector.broadcast %cst_191 : f32 to vector<4x1xf32>
    %498 = arith.minimumf %496, %497 : vector<4x1xf32>
    %499 = math.exp %498 : vector<4x1xf32>
    %cst_192 = arith.constant 1.000000e+00 : f32
    %500 = vector.broadcast %cst_192 : f32 to vector<4x1xf32>
    %501 = arith.addf %500, %499 : vector<4x1xf32>
    %502 = tpu.reciprocal %501 {approx = true} : vector<4x1xf32> -> vector<4x1xf32>
    %503 = vector.broadcast %502 : vector<4x1xf32> to vector<4x256xf32>
    %504 = arith.mulf %3, %503 : vector<4x256xf32>
    %cst_193 = arith.constant dense<0.000000e+00> : vector<256xf32>
    %505 = vector.multi_reduction <add>, %504, %cst_193 [0] : vector<4x256xf32> to vector<256xf32>
    %506 = vector.shape_cast %505 : vector<256xf32> to vector<1x256xf32>
    %cst_194 = arith.constant dense<0xFF800000> : vector<256xf32>
    %507 = vector.multi_reduction <maximumf>, %504, %cst_194 [0] : vector<4x256xf32> to vector<256xf32>
    %508 = vector.shape_cast %507 : vector<256xf32> to vector<1x256xf32>
    %509 = arith.addf %472, %506 : vector<1x256xf32>
    %510 = arith.maximumf %473, %508 : vector<1x256xf32>
    %cst_195 = arith.constant 0.0833333358 : f32
    %511 = vector.broadcast %cst_195 : f32 to vector<1x256xf32>
    %512 = arith.mulf %509, %511 : vector<1x256xf32>
    %c1_196 = arith.constant 1 : index
    %c0_197 = arith.constant 0 : index
    %513 = vector.load %arg9[%c1_196, %c0_197] : memref<2x512xf32, #tpu.memory_space<vmem>>, vector<1x256xf32>
    tpu.vector_store %arg9[%c1_196, %c0_197], %512 {strides = array<i32>} : memref<2x512xf32, #tpu.memory_space<vmem>>, vector<1x256xf32>,
    %c1_198 = arith.constant 1 : index
    %c256_199 = arith.constant 256 : index
    %514 = vector.load %arg9[%c1_198, %c256_199] : memref<2x512xf32, #tpu.memory_space<vmem>>, vector<1x256xf32>
    tpu.vector_store %arg9[%c1_198, %c256_199], %510 {strides = array<i32>} : memref<2x512xf32, #tpu.memory_space<vmem>>, vector<1x256xf32>,
    %c0_200 = arith.constant 0 : index
    %c0_201 = arith.constant 0 : index
    %515 = vector.load %arg9[%c0_200, %c0_201] : memref<2x512xf32, #tpu.memory_space<vmem>>, vector<2x512xf32>
    %516 = arith.truncf %515 : vector<2x512xf32> to vector<2x512xbf16>
    %c0_202 = arith.constant 0 : index
    %c0_203 = arith.constant 0 : index
    %517 = vector.load %arg5[%c0_202, %c0_203] : memref<512x256xbf16, #tpu.memory_space<vmem>>, vector<512x256xbf16>
    %cst_204 = arith.constant dense<0.000000e+00> : vector<2x256xf32>
    %518 = tpu.matmul %516, %517, %cst_204 {dimension_numbers = #tpu.dot_dimension_numbers<[1], [0], [0], [1], [0, 0, 1, 1], [], []>} : vector<2x512xbf16>, vector<512x256xbf16>, vector<2x256xf32> -> vector<2x256xf32>
    %cst_205 = arith.constant 0.000000e+00 : f32
    %519 = vector.broadcast %cst_205 : f32 to vector<2x256xf32>
    %520 = arith.cmpf oge, %518, %519 : vector<2x256xf32>
    %cst_206 = arith.constant 0.00999999977 : f32
    %521 = vector.broadcast %cst_206 : f32 to vector<2x256xf32>
    %522 = arith.mulf %521, %518 : vector<2x256xf32>
    %523 = arith.select %520, %518, %522 : vector<2x256xi1>, vector<2x256xf32>
    %cst_207 = arith.constant 0.000000e+00 : f32
    %524 = vector.broadcast %cst_207 : f32 to vector<2x256xf32>
    %525 = arith.subf %524, %523 : vector<2x256xf32>
    %cst_208 = arith.constant 8.000000e+01 : f32
    %526 = vector.broadcast %cst_208 : f32 to vector<2x256xf32>
    %527 = arith.minimumf %525, %526 : vector<2x256xf32>
    %528 = math.exp %527 : vector<2x256xf32>
    %cst_209 = arith.constant 1.000000e+00 : f32
    %529 = vector.broadcast %cst_209 : f32 to vector<2x256xf32>
    %530 = arith.addf %529, %528 : vector<2x256xf32>
    %531 = tpu.reciprocal %530 {approx = true} : vector<2x256xf32> -> vector<2x256xf32>
    %532 = vector.extract_strided_slice %531 {offsets = [0, 0], sizes = [1, 256], strides = [1, 1]} : vector<2x256xf32> to vector<1x256xf32>
    %533 = vector.broadcast %532 : vector<1x256xf32> to vector<4x256xf32>
    %534 = arith.mulf %319, %533 : vector<4x256xf32>
    %535 = vector.extract_strided_slice %531 {offsets = [0, 0], sizes = [1, 256], strides = [1, 1]} : vector<2x256xf32> to vector<1x256xf32>
    %536 = vector.broadcast %535 : vector<1x256xf32> to vector<4x256xf32>
    %537 = arith.mulf %354, %536 : vector<4x256xf32>
    %538 = vector.extract_strided_slice %531 {offsets = [0, 0], sizes = [1, 256], strides = [1, 1]} : vector<2x256xf32> to vector<1x256xf32>
    %539 = vector.broadcast %538 : vector<1x256xf32> to vector<4x256xf32>
    %540 = arith.mulf %391, %539 : vector<4x256xf32>
    %541 = vector.extract_strided_slice %531 {offsets = [1, 0], sizes = [1, 256], strides = [1, 1]} : vector<2x256xf32> to vector<1x256xf32>
    %542 = vector.broadcast %541 : vector<1x256xf32> to vector<4x256xf32>
    %543 = arith.mulf %432, %542 : vector<4x256xf32>
    %544 = vector.extract_strided_slice %531 {offsets = [1, 0], sizes = [1, 256], strides = [1, 1]} : vector<2x256xf32> to vector<1x256xf32>
    %545 = vector.broadcast %544 : vector<1x256xf32> to vector<4x256xf32>
    %546 = arith.mulf %467, %545 : vector<4x256xf32>
    %547 = vector.extract_strided_slice %531 {offsets = [1, 0], sizes = [1, 256], strides = [1, 1]} : vector<2x256xf32> to vector<1x256xf32>
    %548 = vector.broadcast %547 : vector<1x256xf32> to vector<4x256xf32>
    %549 = arith.mulf %504, %548 : vector<4x256xf32>
    %c0_210 = arith.constant 0 : index
    %c0_211 = arith.constant 0 : index
    %c0_212 = arith.constant 0 : index
    %550 = vector.load %arg6[%c0_210, %c0_211, %c0_212] : memref<7x4x4xf32, #tpu.memory_space<vmem>>, vector<1x4x4xf32>
    %551 = vector.shape_cast %550 : vector<1x4x4xf32> to vector<4x4xf32>
    %c1_213 = arith.constant 1 : index
    %c0_214 = arith.constant 0 : index
    %c0_215 = arith.constant 0 : index
    %552 = vector.load %arg6[%c1_213, %c0_214, %c0_215] : memref<7x4x4xf32, #tpu.memory_space<vmem>>, vector<1x4x4xf32>
    %553 = vector.shape_cast %552 : vector<1x4x4xf32> to vector<4x4xf32>
    %c2_216 = arith.constant 2 : index
    %c0_217 = arith.constant 0 : index
    %c0_218 = arith.constant 0 : index
    %554 = vector.load %arg6[%c2_216, %c0_217, %c0_218] : memref<7x4x4xf32, #tpu.memory_space<vmem>>, vector<1x4x4xf32>
    %555 = vector.shape_cast %554 : vector<1x4x4xf32> to vector<4x4xf32>
    %c3 = arith.constant 3 : index
    %c0_219 = arith.constant 0 : index
    %c0_220 = arith.constant 0 : index
    %556 = vector.load %arg6[%c3, %c0_219, %c0_220] : memref<7x4x4xf32, #tpu.memory_space<vmem>>, vector<1x4x4xf32>
    %557 = vector.shape_cast %556 : vector<1x4x4xf32> to vector<4x4xf32>
    %c4 = arith.constant 4 : index
    %c0_221 = arith.constant 0 : index
    %c0_222 = arith.constant 0 : index
    %558 = vector.load %arg6[%c4, %c0_221, %c0_222] : memref<7x4x4xf32, #tpu.memory_space<vmem>>, vector<1x4x4xf32>
    %559 = vector.shape_cast %558 : vector<1x4x4xf32> to vector<4x4xf32>
    %c5 = arith.constant 5 : index
    %c0_223 = arith.constant 0 : index
    %c0_224 = arith.constant 0 : index
    %560 = vector.load %arg6[%c5, %c0_223, %c0_224] : memref<7x4x4xf32, #tpu.memory_space<vmem>>, vector<1x4x4xf32>
    %561 = vector.shape_cast %560 : vector<1x4x4xf32> to vector<4x4xf32>
    %c6 = arith.constant 6 : index
    %c0_225 = arith.constant 0 : index
    %c0_226 = arith.constant 0 : index
    %562 = vector.load %arg6[%c6, %c0_225, %c0_226] : memref<7x4x4xf32, #tpu.memory_space<vmem>>, vector<1x4x4xf32>
    %563 = vector.shape_cast %562 : vector<1x4x4xf32> to vector<4x4xf32>
    %c0_227 = arith.constant 0 : index
    %c0_228 = arith.constant 0 : index
    %564 = vector.load %arg7[%c0_227, %c0_228] : memref<4x1xf32, #tpu.memory_space<vmem>>, vector<4x1xf32>
    %cst_229 = arith.constant dense<0.000000e+00> : vector<4x256xf32>
    %565 = tpu.matmul %551, %102, %cst_229 {dimension_numbers = #tpu.dot_dimension_numbers<[1], [0], [0], [1], [0, 0, 1, 1], [], []>} : vector<4x4xf32>, vector<4x256xf32>, vector<4x256xf32> -> vector<4x256xf32>
    %566 = vector.broadcast %564 : vector<4x1xf32> to vector<4x256xf32>
    %567 = arith.addf %566, %565 : vector<4x256xf32>
    %cst_230 = arith.constant dense<0.000000e+00> : vector<4x256xf32>
    %568 = tpu.matmul %553, %278, %cst_230 {dimension_numbers = #tpu.dot_dimension_numbers<[1], [0], [0], [1], [0, 0, 1, 1], [], []>} : vector<4x4xf32>, vector<4x256xf32>, vector<4x256xf32> -> vector<4x256xf32>
    %569 = arith.addf %567, %568 : vector<4x256xf32>
    %cst_231 = arith.constant dense<0.000000e+00> : vector<4x256xf32>
    %570 = tpu.matmul %555, %281, %cst_231 {dimension_numbers = #tpu.dot_dimension_numbers<[1], [0], [0], [1], [0, 0, 1, 1], [], []>} : vector<4x4xf32>, vector<4x256xf32>, vector<4x256xf32> -> vector<4x256xf32>
    %571 = arith.addf %569, %570 : vector<4x256xf32>
    %cst_232 = arith.constant dense<0.000000e+00> : vector<4x256xf32>
    %572 = tpu.matmul %557, %534, %cst_232 {dimension_numbers = #tpu.dot_dimension_numbers<[1], [0], [0], [1], [0, 0, 1, 1], [], []>} : vector<4x4xf32>, vector<4x256xf32>, vector<4x256xf32> -> vector<4x256xf32>
    %573 = arith.addf %571, %572 : vector<4x256xf32>
    %cst_233 = arith.constant dense<0.000000e+00> : vector<4x256xf32>
    %574 = tpu.matmul %559, %537, %cst_233 {dimension_numbers = #tpu.dot_dimension_numbers<[1], [0], [0], [1], [0, 0, 1, 1], [], []>} : vector<4x4xf32>, vector<4x256xf32>, vector<4x256xf32> -> vector<4x256xf32>
    %575 = arith.addf %573, %574 : vector<4x256xf32>
    %cst_234 = arith.constant dense<0.000000e+00> : vector<4x256xf32>
    %576 = tpu.matmul %561, %540, %cst_234 {dimension_numbers = #tpu.dot_dimension_numbers<[1], [0], [0], [1], [0, 0, 1, 1], [], []>} : vector<4x4xf32>, vector<4x256xf32>, vector<4x256xf32> -> vector<4x256xf32>
    %577 = arith.addf %575, %576 : vector<4x256xf32>
    %cst_235 = arith.constant dense<0.000000e+00> : vector<4x256xf32>
    %578 = tpu.matmul %563, %1, %cst_235 {dimension_numbers = #tpu.dot_dimension_numbers<[1], [0], [0], [1], [0, 0, 1, 1], [], []>} : vector<4x4xf32>, vector<4x256xf32>, vector<4x256xf32> -> vector<4x256xf32>
    %579 = arith.addf %577, %578 : vector<4x256xf32>
    %cst_236 = arith.constant 0.000000e+00 : f32
    %580 = vector.broadcast %cst_236 : f32 to vector<4x256xf32>
    %581 = arith.maximumf %579, %580 : vector<4x256xf32>
    %c0_237 = arith.constant 0 : index
    %c0_238 = arith.constant 0 : index
    %c0_239 = arith.constant 0 : index
    %c0_240 = arith.constant 0 : index
    %582 = vector.load %arg8[%c0_237, %c0_238, %c0_239, %c0_240] : memref<1x2x4x256xf32, #tpu.memory_space<vmem>>, vector<1x1x4x256xf32>
    %583 = vector.shape_cast %582 : vector<1x1x4x256xf32> to vector<4x256xf32>
    %584 = vector.shape_cast %581 : vector<4x256xf32> to vector<1x1x4x256xf32>
    tpu.vector_store %arg8[%c0_237, %c0_238, %c0_239, %c0_240], %584 {strides = array<i32>} : memref<1x2x4x256xf32, #tpu.memory_space<vmem>>, vector<1x1x4x256xf32>,
    %cst_241 = arith.constant dense<0.000000e+00> : vector<4x256xf32>
    %585 = tpu.matmul %551, %105, %cst_241 {dimension_numbers = #tpu.dot_dimension_numbers<[1], [0], [0], [1], [0, 0, 1, 1], [], []>} : vector<4x4xf32>, vector<4x256xf32>, vector<4x256xf32> -> vector<4x256xf32>
    %586 = vector.broadcast %564 : vector<4x1xf32> to vector<4x256xf32>
    %587 = arith.addf %586, %585 : vector<4x256xf32>
    %cst_242 = arith.constant dense<0.000000e+00> : vector<4x256xf32>
    %588 = tpu.matmul %553, %284, %cst_242 {dimension_numbers = #tpu.dot_dimension_numbers<[1], [0], [0], [1], [0, 0, 1, 1], [], []>} : vector<4x4xf32>, vector<4x256xf32>, vector<4x256xf32> -> vector<4x256xf32>
    %589 = arith.addf %587, %588 : vector<4x256xf32>
    %cst_243 = arith.constant dense<0.000000e+00> : vector<4x256xf32>
    %590 = tpu.matmul %555, %287, %cst_243 {dimension_numbers = #tpu.dot_dimension_numbers<[1], [0], [0], [1], [0, 0, 1, 1], [], []>} : vector<4x4xf32>, vector<4x256xf32>, vector<4x256xf32> -> vector<4x256xf32>
    %591 = arith.addf %589, %590 : vector<4x256xf32>
    %cst_244 = arith.constant dense<0.000000e+00> : vector<4x256xf32>
    %592 = tpu.matmul %557, %543, %cst_244 {dimension_numbers = #tpu.dot_dimension_numbers<[1], [0], [0], [1], [0, 0, 1, 1], [], []>} : vector<4x4xf32>, vector<4x256xf32>, vector<4x256xf32> -> vector<4x256xf32>
    %593 = arith.addf %591, %592 : vector<4x256xf32>
    %cst_245 = arith.constant dense<0.000000e+00> : vector<4x256xf32>
    %594 = tpu.matmul %559, %546, %cst_245 {dimension_numbers = #tpu.dot_dimension_numbers<[1], [0], [0], [1], [0, 0, 1, 1], [], []>} : vector<4x4xf32>, vector<4x256xf32>, vector<4x256xf32> -> vector<4x256xf32>
    %595 = arith.addf %593, %594 : vector<4x256xf32>
    %cst_246 = arith.constant dense<0.000000e+00> : vector<4x256xf32>
    %596 = tpu.matmul %561, %549, %cst_246 {dimension_numbers = #tpu.dot_dimension_numbers<[1], [0], [0], [1], [0, 0, 1, 1], [], []>} : vector<4x4xf32>, vector<4x256xf32>, vector<4x256xf32> -> vector<4x256xf32>
    %597 = arith.addf %595, %596 : vector<4x256xf32>
    %cst_247 = arith.constant dense<0.000000e+00> : vector<4x256xf32>
    %598 = tpu.matmul %563, %3, %cst_247 {dimension_numbers = #tpu.dot_dimension_numbers<[1], [0], [0], [1], [0, 0, 1, 1], [], []>} : vector<4x4xf32>, vector<4x256xf32>, vector<4x256xf32> -> vector<4x256xf32>
    %599 = arith.addf %597, %598 : vector<4x256xf32>
    %cst_248 = arith.constant 0.000000e+00 : f32
    %600 = vector.broadcast %cst_248 : f32 to vector<4x256xf32>
    %601 = arith.maximumf %599, %600 : vector<4x256xf32>
    %c0_249 = arith.constant 0 : index
    %c1_250 = arith.constant 1 : index
    %c0_251 = arith.constant 0 : index
    %c0_252 = arith.constant 0 : index
    %602 = vector.load %arg8[%c0_249, %c1_250, %c0_251, %c0_252] : memref<1x2x4x256xf32, #tpu.memory_space<vmem>>, vector<1x1x4x256xf32>
    %603 = vector.shape_cast %602 : vector<1x1x4x256xf32> to vector<4x256xf32>
    %604 = vector.shape_cast %601 : vector<4x256xf32> to vector<1x1x4x256xf32>
    tpu.vector_store %arg8[%c0_249, %c1_250, %c0_251, %c0_252], %604 {strides = array<i32>} : memref<1x2x4x256xf32, #tpu.memory_space<vmem>>, vector<1x1x4x256xf32>,
    return
  }
  func.func @transform_0(%arg0: i32) -> (i32, i32, i32, i32) {
    %c0_i32 = arith.constant 0 : i32
    %c0_i32_0 = arith.constant 0 : i32
    %c0_i32_1 = arith.constant 0 : i32
    %c0_i32_2 = arith.constant 0 : i32
    return %arg0, %c0_i32, %c0_i32_0, %c0_i32_1 : i32, i32, i32, i32
  }
  func.func @transform_1(%arg0: i32) -> i32 {
    %c0_i32 = arith.constant 0 : i32
    %c0_i32_0 = arith.constant 0 : i32
    return %c0_i32 : i32
  }
  func.func @transform_2(%arg0: i32) -> (i32, i32) {
    %c0_i32 = arith.constant 0 : i32
    %c0_i32_0 = arith.constant 0 : i32
    %c0_i32_1 = arith.constant 0 : i32
    return %c0_i32, %c0_i32_0 : i32, i32
  }
  func.func @transform_3(%arg0: i32) -> (i32, i32) {
    %c0_i32 = arith.constant 0 : i32
    %c0_i32_0 = arith.constant 0 : i32
    %c0_i32_1 = arith.constant 0 : i32
    return %c0_i32, %c0_i32_0 : i32, i32
  }
  func.func @transform_4(%arg0: i32) -> (i32, i32) {
    %c0_i32 = arith.constant 0 : i32
    %c0_i32_0 = arith.constant 0 : i32
    %c0_i32_1 = arith.constant 0 : i32
    return %c0_i32, %c0_i32_0 : i32, i32
  }
  func.func @transform_5(%arg0: i32) -> (i32, i32, i32) {
    %c0_i32 = arith.constant 0 : i32
    %c0_i32_0 = arith.constant 0 : i32
    %c0_i32_1 = arith.constant 0 : i32
    %c0_i32_2 = arith.constant 0 : i32
    return %c0_i32, %c0_i32_0, %c0_i32_1 : i32, i32, i32
  }
  func.func @transform_6(%arg0: i32) -> (i32, i32) {
    %c0_i32 = arith.constant 0 : i32
    %c0_i32_0 = arith.constant 0 : i32
    %c0_i32_1 = arith.constant 0 : i32
    return %c0_i32, %c0_i32_0 : i32, i32
  }
  func.func @transform_7(%arg0: i32) -> (i32, i32, i32, i32) {
    %c0_i32 = arith.constant 0 : i32
    %c0_i32_0 = arith.constant 0 : i32
    %c0_i32_1 = arith.constant 0 : i32
    %c0_i32_2 = arith.constant 0 : i32
    return %arg0, %c0_i32, %c0_i32_0, %c0_i32_1 : i32, i32, i32, i32
  }
}

</mosaic_0001>

<bundles_post_ra>
// kernel: tpu_custom_call.1
= control target key start
LH: loop header
LB: loop body
LE: loop exit
PB: predicated region body
PF: predicated region fallthrough
CT: control target
= control target key end

     0   :  { %12 = vsyncpa [#allocation6], 0  ;;  %s5313_s0 = inlined_call_operand.vmem [shape: f32[1,2,4,256], index: 0, kind: input, shape index: {}]   ;;  %s5314_s1 = inlined_call_operand.vmem [shape: f32[3], index: 1, kind: input, shape index: {}]   ;;  %s5315_s2 = inlined_call_operand.hbm [shape: bf16[512,256], index: 2, kind: input, shape index: {}]   ;;  %s5316_s3 = inlined_call_operand.hbm [shape: bf16[512,256], index: 3, kind: input, shape index: {}]   ;;  %s5317_s4 = inlined_call_operand.hbm [shape: bf16[512,256], index: 4, kind: input, shape index: {}]   ;;  %s5318_s5 = inlined_call_operand.vmem [shape: f32[7,4,4], index: 5, kind: input, shape index: {}]   ;;  %s5319_s6 = inlined_call_operand.vmem [shape: f32[4,1], index: 6, kind: input, shape index: {}]   ;;  %s5320_s7 = inlined_call_operand.hbm [shape: f32[1,2,4,256], index: 7, kind: output, shape index: {}]  }
   0x1   :  { %13 = vsyncpa [#allocation4], 0 }
   0x2   :  { %14 = vsyncpa [#allocation9], 0 }
   0x3   :  { %15 = vsyncpa [#allocation5], 0  ;;  %s24_s26 = sshll.u32 %s5314_s1, 4  ;;  %s4654_s27 = smov [#allocation8]   ;;  %s25_s26 = int_to_ptr.vmem [resolvable:$true] %s24_s26 }
   0x4   :  { %s45_s28 = sshll.u32 %s4654_s27, 4  ;;  %s46_s28 = int_to_ptr.vmem [resolvable:$true] %s45_s28 }
   0x5   :  { %s4562_s29 = scalar_lea.vmem %s46_s28, 8192  ;;  %p4567_p1 = scmp.lt.s32.totalorder %s46_s28, %s46_s28 }
   0x6   :  { %p4563_p0 = scmp.ne.s32.totalorder %s46_s28, %s4562_s29  ;;  %p4568_p2 = scmp.lt.s32.totalorder %s4562_s29, %s4562_s29 }
   0x8   :  { %p4569_p3 = por %p4568_p2, %p4567_p1 }
   0xa   :  { %p4570_p4 = pnand %p4569_p3, %p4563_p0 }
   0xc   :  { %4573 = shalt.err (!%p4570_p4)
}
   0xd   :  { %s4655_s30 = smov 128   ;;  %s4656_s8 = smov 8  }
   0xe   :  { %51 = dma.hbm_to_vmem [thread:$0]  %s5316_s3, 8192, %s46_s28, [#allocation9], %s4655_s30, %s4655_s30, %s4656_s8  }
   0xf   :  { %s4574_s1 = scalar_lea.vmem %s25_s26, 16  ;;  %p4579_p6 = scmp.lt.s32.totalorder %s25_s26, %s25_s26 }
  0x10   :  { %p4575_p5 = scmp.ne.s32.totalorder %s25_s26, %s4574_s1  ;;  %p4580_p7 = scmp.lt.s32.totalorder %s4574_s1, %s4574_s1 }
  0x12   :  { %p4581_p8 = por %p4580_p7, %p4579_p6 }
  0x14   :  { %p4582_p9 = pnand %p4581_p8, %p4575_p5 }
  0x16   :  { %4585 = shalt.err (!%p4582_p9)
}
  0x17   :  { %s4657_s11 = smov [#allocation3]   ;;  %s4658_s12 = smov [#allocation7]  }
  0x18   :  { %27 = dma.vmem_to_smem %s25_s26, 16, %s4657_s11, [#allocation6]  }
  0x19   :  { %s33_s13 = sshll.u32 %s4658_s12, 4  ;;  %s4659_s14 = smov [#allocation10]   ;;  %s34_s13 = int_to_ptr.vmem [resolvable:$true] %s33_s13 }
  0x1a   :  { %s57_s15 = sshll.u32 %s4659_s14, 4  ;;  %s4594_s16 = scalar_lea.vmem %s34_s13, 8192  ;;  %s58_s15 = int_to_ptr.vmem [resolvable:$true] %s57_s15 }
  0x1b   :  { %p4595_p10 = scmp.ne.s32.totalorder %s34_s13, %s4594_s16  ;;  %p4599_p11 = scmp.lt.s32.totalorder %s34_s13, %s34_s13 }
  0x1c   :  { %p4600_p12 = scmp.lt.s32.totalorder %s4594_s16, %s4594_s16 }
  0x1e   :  { %p4601_p13 = por %p4600_p12, %p4599_p11 }
  0x20   :  { %p4602_p0 = pnand %p4601_p13, %p4595_p10 }
  0x22   :  { %4605 = shalt.err (!%p4602_p0)
}
  0x23   :  { %39 = dma.hbm_to_vmem [thread:$0]  %s5315_s2, 8192, %s34_s13, [#allocation4], %s4655_s30, %s4655_s30, %s4656_s8  }
  0x24   :  { %s4614_s18 = scalar_lea.vmem %s58_s15, 8192  ;;  %p4619_p2 = scmp.lt.s32.totalorder %s58_s15, %s58_s15 }
  0x25   :  { %p4615_p1 = scmp.ne.s32.totalorder %s58_s15, %s4614_s18  ;;  %p4620_p3 = scmp.lt.s32.totalorder %s4614_s18, %s4614_s18 }
  0x27   :  { %p4621_p4 = por %p4620_p3, %p4619_p2 }
  0x29   :  { %p4622_p5 = pnand %p4621_p4, %p4615_p1 }
  0x2b   :  { %4625 = shalt.err (!%p4622_p5)
}
  0x2c   :  { %63 = dma.hbm_to_vmem [thread:$0]  %s5317_s4, 8192, %s58_s15, [#allocation9], %s4655_s30, %s4655_s30, %s4656_s8  }
  0x2d   :  { %4646 = dma.done.wait [#allocation6], 16  }
  0x2e   :  { %4647 = vsyncadd [#allocation6], 4294967280 }
  0x2f   :  { %4648 = dma.done.wait [#allocation4], 8192  }
  0x30   :  { %4649 = vsyncadd [#allocation4], 4294959104 }
  0x31   :  { %4650 = dma.done.wait [#allocation9], 16384  }
  0x32   :  { %4651 = vsyncadd [#allocation9], 4294950912 }
  0x33   :  { %80 = sfence }
  0x34   :  { %v4730_v0 = vld [vmem:[%s5313_s0] sm:$0xff]  ;;  %vm88_vm0 = vcmask 1043456   ;;  %v4735_v1 = vld [vmem:[%s5313_s0 + $0x8] sm:$0xff]  ;;  %s84_s4 = sld [smem:[#allocation3]] }
  0x35   :  { %v4739_v2 = vcombine.high %v4730_v0, %v4730_v0  ;;  %v96_v3 = vsel %vm88_vm0, %v4730_v0, -inf  ;;  %v89_v4 = vsel %vm88_vm0, %v4730_v0, 0.0  ;;  %v4747_v5 = vcombine.high %v4735_v1, %v4735_v1  ;;  %v4187_v16 = vld [vmem:[#allocation7 + $0x74] ss:$8 sps:$4 sm:$0xff]   ;;  %v4189_v17 = vld [vmem:[#allocation7 + $0x70] ss:$8 sps:$4 sm:$0xff]  }
  0x36   :  { %v212_v6 = vsel %vm88_vm0, %v4735_v1, -inf  ;;  %v206_v7 = vsel %vm88_vm0, %v4735_v1, 0.0  ;;  %726 = vmatprep.subr.bf16.mxu0 %v4187_v16  ;;  %v4190_v18 = vld [vmem:[#allocation7 + $0x174] ss:$8 sps:$4 sm:$0xff]   ;;  %v4192_v19 = vld [vmem:[#allocation7 + $0x170] ss:$8 sps:$4 sm:$0xff]  }
  0x37   :  { %v97_v8 = vsel %vm88_vm0, %v4739_v2, -inf  ;;  %v90_v9 = vsel %vm88_vm0, %v4739_v2, 0.0  ;;  %v213_v10 = vsel %vm88_vm0, %v4747_v5, -inf  ;;  %v207_v11 = vsel %vm88_vm0, %v4747_v5, 0.0  ;;  %727 = vmatpush1.bf16.msra.mxu0 %v4189_v17  ;;  %767 = vmatprep.subr.bf16.mxu1 %v4190_v18  ;;  %v4193_v20 = vld [vmem:[#allocation7 + $0x64] ss:$8 sps:$4 sm:$0xff]  }
  0x38   :  { %v98_v12 = vmax.f32 %v96_v3, %v97_v8  ;;  %v91_v13 = vadd.f32 %v90_v9, %v89_v4  ;;  %v214_v14 = vmax.f32 %v212_v6, %v213_v10  ;;  %v208_v15 = vadd.f32 %v207_v11, %v206_v7  ;;  %768 = vmatpush1.bf16.msra.mxu1 %v4192_v19  ;;  %v4195_v21 = vld [vmem:[#allocation7 + $0x60] ss:$8 sps:$4 sm:$0xff]   ;;  %v4196_v22 = vld [vmem:[#allocation7 + $0x164] ss:$8 sps:$4 sm:$0xff]   ;;  %v4199_v24 = vld [vmem:[#allocation7 + $0x54] ss:$8 sps:$4 sm:$0xff]  }
  0x39   :  { %728 = vmatprep.subr.bf16.mxu0 %v4193_v20  ;;  %v4198_v23 = vld [vmem:[#allocation7 + $0x160] ss:$8 sps:$4 sm:$0xff]   ;;  %769 = vmatprep.subr.bf16.mxu1 %v4196_v22  ;;  %v4201_v25 = vld [vmem:[#allocation7 + $0x50] ss:$8 sps:$4 sm:$0xff]   ;;  %v4202_v26 = vld [vmem:[#allocation7 + $0x154] ss:$8 sps:$4 sm:$0xff]  }
  0x3a   :  { %99 = vmax.xlane.f32.xlu1 %v98_v12  ;;  %92 = vadd.xlane.f32.xlu0 %v91_v13  ;;  %v4204_v27 = vld [vmem:[#allocation7 + $0x150] ss:$8 sps:$4 sm:$0xff]   ;;  %v4205_v28 = vld [vmem:[#allocation7 + $0x44] ss:$8 sps:$4 sm:$0xff]   ;;  %v4207_v29 = vld [vmem:[#allocation7 + $0x40] ss:$8 sps:$4 sm:$0xff]   ;;  %v101_v20 = vstv %s84_s4 }
  0x3b   :  { %729 = vmatpush1.bf16.msra.mxu0 %v4195_v21  ;;  %v4208_v30 = vld [vmem:[#allocation7 + $0x144] ss:$8 sps:$4 sm:$0xff]   ;;  %v4210_v31 = vld [vmem:[#allocation7 + $0x140] ss:$8 sps:$4 sm:$0xff]   ;;  %v4211_v32 = vld [vmem:[#allocation7 + $0x34] ss:$8 sps:$4 sm:$0xff]  }
  0x3c   :  { %770 = vmatpush1.bf16.msra.mxu1 %v4198_v23  ;;  %730 = vmatprep.subr.bf16.mxu0 %v4199_v24  ;;  %v4213_v33 = vld [vmem:[#allocation7 + $0x30] ss:$8 sps:$4 sm:$0xff]   ;;  %v4214_v34 = vld [vmem:[#allocation7 + $0x134] ss:$8 sps:$4 sm:$0xff]   ;;  %v4217_v36 = vld [vmem:[#allocation7 + $0x24] ss:$8 sps:$4 sm:$0xff]  }
  0x3d   :  { %771 = vmatprep.subr.bf16.mxu1 %v4202_v26  ;;  %v4216_v35 = vld [vmem:[#allocation7 + $0x130] ss:$8 sps:$4 sm:$0xff]   ;;  %v4219_v37 = vld [vmem:[#allocation7 + $0x20] ss:$8 sps:$4 sm:$0xff]   ;;  %v4220_v38 = vld [vmem:[#allocation7 + $0x124] ss:$8 sps:$4 sm:$0xff]  }
  0x3e   :  { %215 = vmax.xlane.f32.xlu1 %v214_v14  ;;  %209 = vadd.xlane.f32.xlu0 %v208_v15  ;;  %v4222_v39 = vld [vmem:[#allocation7 + $0x120] ss:$8 sps:$4 sm:$0xff]   ;;  %v4223_v40 = vld [vmem:[#allocation7 + $0x14] ss:$8 sps:$4 sm:$0xff]   ;;  %v4225_v41 = vld [vmem:[#allocation7 + $0x10] ss:$8 sps:$4 sm:$0xff]  }
  0x3f   :  { %731 = vmatpush1.bf16.msra.mxu0 %v4201_v25  ;;  %v4226_v42 = vld [vmem:[#allocation7 + $0x114] ss:$8 sps:$4 sm:$0xff]   ;;  %v4228_v43 = vld [vmem:[#allocation7 + $0x110] ss:$8 sps:$4 sm:$0xff]   ;;  %v4229_v44 = vld [vmem:[#allocation7 + $0x4] ss:$8 sps:$4 sm:$0xff]  }
  0x40   :  { %772 = vmatpush1.bf16.msra.mxu1 %v4204_v27  ;;  %732 = vmatprep.subr.bf16.mxu0 %v4205_v28  ;;  %v4231_v45 = vld [vmem:[#allocation7] ss:$8 sps:$4 sm:$0xff]   ;;  %v4232_v46 = vld [vmem:[#allocation7 + $0x104] ss:$8 sps:$4 sm:$0xff]   ;;  %v4235_v48 = vld [vmem:[#allocation7 + $0xf4] ss:$8 sps:$4 sm:$0xff]  }
  0x41   :  { %773 = vmatprep.subr.bf16.mxu1 %v4208_v30  ;;  %v4234_v47 = vld [vmem:[#allocation7 + $0x100] ss:$8 sps:$4 sm:$0xff]   ;;  %v4237_v49 = vld [vmem:[#allocation7 + $0xf0] ss:$8 sps:$4 sm:$0xff]   ;;  %v4238_v50 = vld [vmem:[#allocation7 + $0x1f4] ss:$8 sps:$4 sm:$0xff]  }
  0x42   :  { %v4240_v51 = vld [vmem:[#allocation7 + $0x1f0] ss:$8 sps:$4 sm:$0xff]   ;;  %v4241_v52 = vld [vmem:[#allocation7 + $0xe4] ss:$8 sps:$4 sm:$0xff]   ;;  %v4243_v53 = vld [vmem:[#allocation7 + $0xe0] ss:$8 sps:$4 sm:$0xff]  }
  0x43   :  { %733 = vmatpush1.bf16.msra.mxu0 %v4207_v29  ;;  %v4244_v54 = vld [vmem:[#allocation7 + $0x1e4] ss:$8 sps:$4 sm:$0xff]   ;;  %v4246_v55 = vld [vmem:[#allocation7 + $0x1e0] ss:$8 sps:$4 sm:$0xff]   ;;  %v4247_v56 = vld [vmem:[#allocation7 + $0xd4] ss:$8 sps:$4 sm:$0xff]  }
  0x44   :  { %774 = vmatpush1.bf16.msra.mxu1 %v4210_v31  ;;  %734 = vmatprep.subr.bf16.mxu0 %v4211_v32  ;;  %v4249_v57 = vld [vmem:[#allocation7 + $0xd0] ss:$8 sps:$4 sm:$0xff]   ;;  %v4250_v58 = vld [vmem:[#allocation7 + $0x1d4] ss:$8 sps:$4 sm:$0xff]   ;;  %v4253_v60 = vld [vmem:[#allocation7 + $0xc4] ss:$8 sps:$4 sm:$0xff]  }
  0x45   :  { %775 = vmatprep.subr.bf16.mxu1 %v4214_v34  ;;  %v4252_v59 = vld [vmem:[#allocation7 + $0x1d0] ss:$8 sps:$4 sm:$0xff]   ;;  %v4256_v61 = vld [vmem:[#allocation7 + $0x1c4] ss:$8 sps:$4 sm:$0xff]   ;;  %v4255_v62 = vld [vmem:[#allocation7 + $0xc0] ss:$8 sps:$4 sm:$0xff]  }
  0x46   :  { %v4259_v63 = vld [vmem:[#allocation7 + $0xb4] ss:$8 sps:$4 sm:$0xff]   ;;  %v4258_v3 = vld [vmem:[#allocation7 + $0x1c0] ss:$8 sps:$4 sm:$0xff]   ;;  %v4261_v6 = vld [vmem:[#allocation7 + $0xb0] ss:$8 sps:$4 sm:$0xff]  }
  0x47   :  { %735 = vmatpush1.bf16.msra.mxu0 %v4213_v33  ;;  %v4262_v4 = vld [vmem:[#allocation7 + $0x1b4] ss:$8 sps:$4 sm:$0xff]   ;;  %v4265_v7 = vld [vmem:[#allocation7 + $0xa4] ss:$8 sps:$4 sm:$0xff]   ;;  %v4264_v8 = vld [vmem:[#allocation7 + $0x1b0] ss:$8 sps:$4 sm:$0xff]  }
  0x48   :  { %776 = vmatpush1.bf16.msra.mxu1 %v4216_v35  ;;  %736 = vmatprep.subr.bf16.mxu0 %v4217_v36  ;;  %v4268_v9 = vld [vmem:[#allocation7 + $0x1a4] ss:$8 sps:$4 sm:$0xff]   ;;  %v4267_v10 = vld [vmem:[#allocation7 + $0xa0] ss:$8 sps:$4 sm:$0xff]   ;;  %v4271_v11 = vld [vmem:[#allocation7 + $0x94] ss:$8 sps:$4 sm:$0xff]  }
  0x49   :  { %777 = vmatprep.subr.bf16.mxu1 %v4220_v38  ;;  %v4270_v12 = vld [vmem:[#allocation7 + $0x1a0] ss:$8 sps:$4 sm:$0xff]   ;;  %s3994_s24 = sld [smem:[#allocation3 + $0x1]]  ;;  %v4274_v13 = vld [vmem:[#allocation7 + $0x194] ss:$8 sps:$4 sm:$0xff]  }
  0x4a   :  { %s4059_s25 = sld [smem:[#allocation3 + $0x2]]  ;;  %v4273_v14 = vld [vmem:[#allocation7 + $0x90] ss:$8 sps:$4 sm:$0xff]   ;;  %v4277_v15 = vld [vmem:[#allocation7 + $0x84] ss:$8 sps:$4 sm:$0xff]  }
  0x4b   :  { %737 = vmatpush1.bf16.msra.mxu0 %v4219_v37  ;;  %v4276_v16 = vld [vmem:[#allocation7 + $0x190] ss:$8 sps:$4 sm:$0xff]   ;;  %v4280_v17 = vld [vmem:[#allocation7 + $0x184] ss:$8 sps:$4 sm:$0xff]   ;;  %v4279_v18 = vld [vmem:[#allocation7 + $0x80] ss:$8 sps:$4 sm:$0xff]  }
  0x4c   :  { %778 = vmatpush1.bf16.msra.mxu1 %v4222_v39  ;;  %738 = vmatprep.subr.bf16.mxu0 %v4223_v40  ;;  %v4282_v19 = vld [vmem:[#allocation7 + $0x180] ss:$8 sps:$4 sm:$0xff]  }
  0x4d   :  { %779 = vmatprep.subr.bf16.mxu1 %v4226_v42 }
  0x4f   :  { %739 = vmatpush1.bf16.msra.mxu0 %v4225_v41  ;;  %v4761_v21 = vstv %s3994_s24 }
  0x50   :  { %780 = vmatpush1.bf16.msra.mxu1 %v4228_v43  ;;  %740 = vmatprep.subr.bf16.mxu0 %v4229_v44  ;;  %v4763_v22 = vstv %s4059_s25 }
  0x51   :  { %781 = vmatprep.subr.bf16.mxu1 %v4232_v46 }
  0x53   :  { %741 = vmatpush1.bf16.msra.mxu0 %v4231_v45 }
  0x54   :  { %782 = vmatpush1.bf16.msra.mxu1 %v4234_v47  ;;  %742 = vmatprep.subr.bf16.mxu0 %v4235_v48 }
  0x55   :  { %783 = vmatprep.subr.bf16.mxu1 %v4238_v50 }
  0x57   :  { %743 = vmatpush2.bf16.msra.mxu0 %v4237_v49 }
  0x58   :  { %784 = vmatpush2.bf16.msra.mxu1 %v4240_v51  ;;  %744 = vmatprep.subr.bf16.mxu0 %v4241_v52 }
  0x59   :  { %785 = vmatprep.subr.bf16.mxu1 %v4244_v54 }
  0x5b   :  { %745 = vmatpush2.bf16.msra.mxu0 %v4243_v53 }
  0x5c   :  { %786 = vmatpush2.bf16.msra.mxu1 %v4246_v55  ;;  %746 = vmatprep.subr.bf16.mxu0 %v4247_v56 }
  0x5d   :  { %787 = vmatprep.subr.bf16.mxu1 %v4250_v58 }
  0x5f   :  { %747 = vmatpush2.bf16.msra.mxu0 %v4249_v57 }
  0x60   :  { %748 = vmatprep.subr.bf16.mxu0 %v4253_v60  ;;  %788 = vmatpush2.bf16.msra.mxu1 %v4252_v59 }
  0x61   :  { %789 = vmatprep.subr.bf16.mxu1 %v4256_v61 }
  0x63   :  { %749 = vmatpush2.bf16.msra.mxu0 %v4255_v62 }
  0x64   :  { %750 = vmatprep.subr.bf16.mxu0 %v4259_v63  ;;  %790 = vmatpush2.bf16.msra.mxu1 %v4258_v3 }
  0x65   :  { %791 = vmatprep.subr.bf16.mxu1 %v4262_v4  ;;  %v4660_v4 = vmov 839922192  }
  0x67   :  { %751 = vmatpush2.bf16.msra.mxu0 %v4261_v6  ;;  %v119_v6 = vunpack.c.l.s4 %v4660_v4 }
  0x68   :  { %752 = vmatprep.subr.bf16.mxu0 %v4265_v7  ;;  %792 = vmatpush2.bf16.msra.mxu1 %v4264_v8  ;;  %v121_v7 = vlaneseq }
  0x69   :  { %793 = vmatprep.subr.bf16.mxu1 %v4268_v9  ;;  %v120_v8 = vunpack.c.0.s8 %v119_v6 }
  0x6a   :  { %v4779_v9 = vshrl.u32 %v121_v7, 7  ;;  %vm4801_vm9 = vcmp.lt.s32.totalorder %v121_v7, 256 }
  0x6b   :  { %753 = vmatpush2.bf16.msra.mxu0 %v4267_v10 }
  0x6c   :  { %754 = vmatprep.subr.bf16.mxu0 %v4271_v11  ;;  %794 = vmatpush2.bf16.msra.mxu1 %v4270_v12  ;;  %v4782_v10 = vsub.s32 %v120_v8, %v4779_v9 }
  0x6d   :  { %795 = vmatprep.subr.bf16.mxu1 %v4274_v13 }
  0x6f   :  { %755 = vmatpush2.bf16.msra.mxu0 %v4273_v14 }
  0x70   :  { %756 = vmatprep.subr.bf16.mxu0 %v4277_v15  ;;  %796 = vmatpush2.bf16.msra.mxu1 %v4276_v16 }
  0x71   :  { %797 = vmatprep.subr.bf16.mxu1 %v4280_v17 }
  0x73   :  { %757 = vmatpush2.bf16.msra.mxu0 %v4279_v18 }
  0x74   :  { %798 = vmatpush2.bf16.msra.mxu1 %v4282_v19 }
  0xc3   :  { %v100_v23 = vpop.xlane.xlu1 %99  ;;  %v93_v24 = vpop.xlane.xlu0 %92 }
  0xc4   :  { %v106_v25 = vmul.f32 %v101_v20, %v100_v23  ;;  %v928_v26 = vmul.f32 %v4761_v21, %v100_v23  ;;  %v1883_v27 = vmul.f32 %v4763_v22, %v100_v23  ;;  %v95_v28 = vmul.f32 0.00390625, %v93_v24 }
  0xc6   :  { %vm107_vm1 = vcmp.ge.f32.partialorder %v106_v25, 0.0  ;;  %v108_v29 = vmul.f32 0.01, %v106_v25  ;;  %v930_v30 = vmul.f32 0.01, %v928_v26  ;;  %v102_v32 = vmul.f32 %v101_v20, %v95_v28 }
  0xc7   :  { %v1885_v31 = vmul.f32 0.01, %v1883_v27  ;;  %v924_v33 = vmul.f32 %v4761_v21, %v95_v28  ;;  %vm929_vm2 = vcmp.ge.f32.partialorder %v928_v26, 0.0  ;;  %vm1884_vm3 = vcmp.ge.f32.partialorder %v1883_v27, 0.0  ;;  %v4769_v35 = vpop.xlane.xlu1 %215  ;;  %v210_v37 = vpop.xlane.xlu0 %209 }
  0xc8   :  { %v1879_v34 = vmul.f32 %v4763_v22, %v95_v28  ;;  %vm103_vm4 = vcmp.ge.f32.partialorder %v102_v32, 0.0  ;;  %v104_v36 = vmul.f32 0.01, %v102_v32  ;;  %v109_v38 = vsel %vm107_vm1, %v106_v25, %v108_v29 }
  0xc9   :  { %vm925_vm5 = vcmp.ge.f32.partialorder %v924_v33, 0.0  ;;  %v926_v39 = vmul.f32 0.01, %v924_v33  ;;  %v931_v41 = vsel %vm929_vm2, %v928_v26, %v930_v30  ;;  %v1886_v42 = vsel %vm1884_vm3, %v1883_v27, %v1885_v31 }
  0xca   :  { %vm1880_vm6 = vcmp.ge.f32.partialorder %v1879_v34, 0.0  ;;  %v1881_v40 = vmul.f32 0.01, %v1879_v34  ;;  %v105_v43 = vsel %vm103_vm4, %v102_v32, %v104_v36  ;;  %v221_v44 = vmul.f32 %v4769_v35, %v101_v20 }
  0xcb   :  { %v110_v45 = vadd.f32 %v109_v38, %v105_v43  ;;  %v927_v46 = vsel %vm925_vm5, %v924_v33, %v926_v39  ;;  %v4772_v48 = vmul.f32 0.00390625, %v210_v37  ;;  %v4661_v28 = vmov 1966171168  }
  0xcc   :  { %v1882_v47 = vsel %vm1880_vm6, %v1879_v34, %v1881_v40  ;;  %v4774_v49 = vadd.f32 %v931_v41, %v927_v46  ;;  %v223_v52 = vmul.f32 0.01, %v221_v44  ;;  %vm222_vm7 = vcmp.ge.f32.partialorder %v221_v44, 0.0 }
  0xcd   :  { %v4776_v50 = vadd.f32 %v1886_v42, %v1882_v47  ;;  %v111_v51 = vsub.f32 0.0, %v110_v45  ;;  %v217_v53 = vmul.f32 %v4772_v48, %v101_v20  ;;  %v164_v29 = vunpack.c.l.s4 %v4661_v28 }
  0xce   :  { %v224_v57 = vsel %vm222_vm7, %v221_v44, %v223_v52 }
  0xcf   :  { %v112_v54 = vmin.f32 %v111_v51, 80.0  ;;  %vm218_vm8 = vcmp.ge.f32.partialorder %v217_v53, 0.0  ;;  %v219_v55 = vmul.f32 0.01, %v217_v53  ;;  %v165_v39 = vunpack.c.0.s8 %v164_v29 }
  0xd1   :  { %v113_v56 = vmul.f32 1.442695, %v112_v54  ;;  %v220_v58 = vsel %vm218_vm8, %v217_v53, %v219_v55  ;;  %v4797_v51 = vsub.s32 %v165_v39, %v4779_v9 }
  0xd2   :  { %v225_v59 = vadd.f32 %v224_v57, %v220_v58 }
  0xd3   :  { %4478 = vpow2.f32 %v113_v56 }
  0xd4   :  { %v226_v60 = vsub.f32 0.0, %v225_v59 }
  0xd6   :  { %v227_v61 = vmin.f32 %v226_v60, 80.0 }
  0xd8   :  { %v228_v62 = vmul.f32 1.442695, %v227_v61  ;;  %v5200_v61 = vld [vmem:[%s5318_s5] sm:$0xf] }
  0xda   :  { %4480 = vpow2.f32 %v228_v62 }
  0xe0   :  { %v4479_v63 = vpop.eup %4478 }
  0xe1   :  { %v115_v3 = vadd.f32 1.0, %v4479_v63 }
  0xe3   :  { %4482 = vrcp.f32 %v115_v3 }
  0xe7   :  { %v4481_v11 = vpop.eup %4480 }
  0xe8   :  { %v230_v14 = vadd.f32 1.0, %v4481_v11 }
  0xea   :  { %4484 = vrcp.f32 %v230_v14 }
  0xf0   :  { %v4483_v12 = vpop.eup %4482 }
  0xf1   :  { %v124_v13 = vrot.slane %v4483_v12, %v4782_v10 }
  0xf3   :  { %v4786_v15 = vmul.f32 %v124_v13, %v4730_v0 }
  0xf5   :  { %v128_v16 = vcombine.high %v4786_v15, %v4786_v15  ;;  %v130_v17 = vsel %vm88_vm0, %v4786_v15, 0.0  ;;  %v144_v18 = vsel %vm88_vm0, %v4786_v15, -inf }
  0xf6   :  { %v131_v19 = vrot.slane %v130_v17, 4  ;;  %v145_v20 = vrot.slane %v144_v18, 4 }
  0xf7   :  { %v137_v23 = vsel %vm88_vm0, %v128_v16, 0.0  ;;  %v151_v24 = vsel %vm88_vm0, %v128_v16, -inf  ;;  %v4485_v47 = vpop.eup %4484 }
  0xf8   :  { %v132_v25 = vadd.f32 %v131_v19, %v130_v17  ;;  %v138_v26 = vrot.slane %v137_v23, 4  ;;  %v146_v0 = vmax.f32 %v144_v18, %v145_v20  ;;  %v152_v27 = vrot.slane %v151_v24, 4 }
  0xf9   :  { %v239_v58 = vrot.slane %v4485_v47, %v4782_v10 }
  0xfa   :  { %v133_v30 = vrot.slane %v132_v25, 2  ;;  %v139_v31 = vadd.f32 %v138_v26, %v137_v23  ;;  %v147_v32 = vrot.slane %v146_v0, 2  ;;  %v153_v33 = vmax.f32 %v151_v24, %v152_v27 }
  0xfb   :  { %v4806_v62 = vmul.f32 %v4735_v1, %v239_v58 }
  0xfc   :  { %v134_v34 = vadd.f32 %v133_v30, %v132_v25  ;;  %v140_v36 = vrot.slane %v139_v31, 2  ;;  %v148_v37 = vmax.f32 %v146_v0, %v147_v32  ;;  %v154_v38 = vrot.slane %v153_v33, 2 }
  0xfd   :  { %v243_v4 = vcombine.high %v4806_v62, %v4806_v62  ;;  %v245_v6 = vsel %vm88_vm0, %v4806_v62, 0.0  ;;  %v259_v1 = vsel %vm88_vm0, %v4806_v62, -inf }
  0xfe   :  { %v135_v40 = vrot.slane %v134_v34, 1  ;;  %v141_v41 = vadd.f32 %v140_v36, %v139_v31  ;;  %v149_v42 = vrot.slane %v148_v37, 1  ;;  %v155_v43 = vmax.f32 %v153_v33, %v154_v38 }
  0xff   :  { %v246_v7 = vrot.slane %v245_v6, 4  ;;  %v252_v11 = vsel %vm88_vm0, %v243_v4, 0.0  ;;  %v260_v14 = vrot.slane %v259_v1, 4  ;;  %v266_v16 = vsel %vm88_vm0, %v243_v4, -inf }
 0x100   :  { %v136_v44 = vadd.f32 %v135_v40, %v134_v34  ;;  %v142_v45 = vrot.slane %v141_v41, 1  ;;  %v156_v46 = vrot.slane %v155_v43, 1  ;;  %v150_v53 = vmax.f32 %v148_v37, %v149_v42 }
 0x101   :  { %v247_v12 = vadd.f32 %v246_v7, %v245_v6  ;;  %v253_v13 = vrot.slane %v252_v11, 4  ;;  %v261_v19 = vmax.f32 %v259_v1, %v260_v14  ;;  %v267_v20 = vrot.slane %v266_v16, 4 }
 0x102   :  { %v143_v52 = vadd.f32 %v142_v45, %v141_v41  ;;  %v157_v54 = vmax.f32 %v155_v43, %v156_v46  ;;  %v158_v55 = vmul.f32 0.25, %v136_v44  ;;  %v4662_v45 = vmov 1983009808  }
 0x103   :  { %v248_v17 = vrot.slane %v247_v12, 2  ;;  %v254_v18 = vadd.f32 %v253_v13, %v252_v11  ;;  %v262_v25 = vrot.slane %v261_v19, 2  ;;  %v268_v26 = vmax.f32 %v266_v16, %v267_v20 }
 0x104   :  { %v159_v56 = vmul.f32 0.25, %v143_v52  ;;  %v185_v57 = vcombine.low %v150_v53, %v157_v54  ;;  %v319_v46 = vunpack.c.l.s4 %v4662_v45 }
 0x105   :  { %v249_v23 = vadd.f32 %v248_v17, %v247_v12  ;;  %v255_v24 = vrot.slane %v254_v18, 2  ;;  %v263_v28 = vmax.f32 %v261_v19, %v262_v25  ;;  %v269_v29 = vrot.slane %v268_v26, 2 }
 0x106   :  { %v162_v59 = vcombine.low %v158_v55, %v159_v56  ;;  %v192_v60 = vrot.slane %v185_v57, %v4797_v51  ;;  %v320_v53 = vunpack.c.0.s8 %v319_v46 }
 0x107   :  { %v250_v0 = vrot.slane %v249_v23, 1  ;;  %v256_v27 = vadd.f32 %v255_v24, %v254_v18  ;;  %v264_v32 = vrot.slane %v263_v28, 1  ;;  %v270_v33 = vmax.f32 %v268_v26, %v269_v29 }
 0x108   :  { %v169_v63 = vrot.slane %v162_v59, %v4797_v51  ;;  %v199_v3 = vrot.slane %v192_v60, %v4797_v51  ;;  %v4832_v54 = vsub.s32 %v320_v53, %v4779_v9 }
 0x109   :  { %v251_v30 = vadd.f32 %v250_v0, %v249_v23  ;;  %v257_v31 = vrot.slane %v256_v27, 1  ;;  %v271_v36 = vrot.slane %v270_v33, 1  ;;  %v265_v39 = vmax.f32 %v263_v28, %v264_v32 }
 0x10a   :  { %v176_v8 = vrot.slane %v169_v63, %v4797_v51  ;;  %202 = vst.msk [vmem:[#allocation2 + $0x4] ss:$2 sm:$0x3] %vm4801_vm9, %v199_v3 }
 0x10b   :  { %v258_v34 = vadd.f32 %v257_v31, %v256_v27  ;;  %v273_v37 = vmul.f32 0.25, %v251_v30  ;;  %v272_v40 = vmax.f32 %v270_v33, %v271_v36  ;;  %v4840_v36 = vsub.s32 0, %v4779_v9 }
 0x10c   :  { %182 = vst.msk [vmem:[#allocation2] ss:$2 sm:$0x3] %vm4801_vm9, %v176_v8 }
 0x10d   :  { %v274_v38 = vmul.f32 0.25, %v258_v34  ;;  %v297_v42 = vcombine.low %v265_v39, %v272_v40  ;;  %v4837_v34 = vsub.s32 1, %v4779_v9 }
 0x10f   :  { %v277_v41 = vcombine.low %v273_v37, %v274_v38  ;;  %v304_v44 = vrot.slane %v297_v42, %v4797_v51 }
 0x111   :  { %v284_v43 = vrot.slane %v277_v41, %v4797_v51  ;;  %v311_v52 = vrot.slane %v304_v44, %v4797_v51 }
 0x113   :  { %v291_v47 = vrot.slane %v284_v43, %v4797_v51  ;;  %314 = vst.msk [vmem:[#allocation2 + $0x5] ss:$2 sm:$0x3] %vm4801_vm9, %v311_v52 }
 0x115   :  { %294 = vst.msk [vmem:[#allocation2 + $0x1] ss:$2 sm:$0x3] %vm4801_vm9, %v291_v47 }
 0x11c   :  { %v315_v55 = vld [vmem:[#allocation2] sm:$0xff] }
 0x11d   :  { %v324_v56 = vrot.slane %v315_v55, %v4832_v54  ;;  %v317_v57 = vcombine.high %v315_v55, %v315_v55 }
 0x11f   :  { %v332_v58 = vcombine.high %v324_v56, %v324_v56  ;;  %v331_v59 = vrot.slane %v317_v57, %v4832_v54  ;;  %v338_v3 = vpack.c.bf16 %v324_v56, %v324_v56 }
 0x121   :  { %v339_v60 = vpack.c.bf16 %v332_v58, %v332_v58  ;;  %v333_v63 = vcombine.high %v331_v59, %v331_v59  ;;  %v340_v6 = vpack.c.bf16 %v331_v59, %v331_v59 }
 0x123   :  { %758 = vmatprep.mubr.bf16.mxu0 %v339_v60  ;;  %v341_v4 = vpack.c.bf16 %v333_v63, %v333_v63 }
 0x124   :  { %759 = vmatmul.mubr.bf16.vlgmr.msra.gmra.mxu0 %v338_v3 }
 0x125   :  { %799 = vmatprep.mubr.bf16.mxu1 %v341_v4  ;;  %v4286_v4 = vld [vmem:[#allocation8 + $0x74] ss:$8 sps:$4 sm:$0xff]  }
 0x126   :  { %800 = vmatmul.mubr.bf16.vlgmr.msra.gmra.mxu1 %v340_v6  ;;  %v4284_v6 = vld [vmem:[#allocation8 + $0x70] ss:$8 sps:$4 sm:$0xff]   ;;  %1605 = vmatprep.subr.bf16.mxu0 %v4286_v4 }
 0x127   :  { %1606 = vmatpush1.bf16.msra.mxu0 %v4284_v6  ;;  %v4347_v6 = vld [vmem:[#allocation8 + $0x1d0] ss:$8 sps:$4 sm:$0xff]  }
 0x1e4   :  { %v760_v8 = vpop.f32.mrf.mxu0 }
 0x1e6   :  { %v762_v7 = vpop.f32.mrf.mxu0  ;;  %v801_v11 = vpop.f32.mrf.mxu1 }
 0x1e7   :  { %v802_v1 = vadd.f32 %v801_v11, %v760_v8  ;;  %v4289_v8 = vld [vmem:[#allocation8 + $0x174] ss:$8 sps:$4 sm:$0xff]   ;;  %v4292_v11 = vld [vmem:[#allocation8 + $0x64] ss:$8 sps:$4 sm:$0xff]  }
 0x1e8   :  { %v764_v12 = vpop.f32.mrf.mxu0  ;;  %v803_v13 = vpop.f32.mrf.mxu1  ;;  %1646 = vmatprep.subr.bf16.mxu1 %v4289_v8  ;;  %1607 = vmatprep.subr.bf16.mxu0 %v4292_v11  ;;  %v4350_v8 = vld [vmem:[#allocation8 + $0xc0] ss:$8 sps:$4 sm:$0xff]  }
 0x1e9   :  { %vm808_vm10 = vcmp.ge.f32.partialorder %v802_v1, 0.0  ;;  %v810_v14 = vmul.f32 0.01, %v802_v1  ;;  %v804_v16 = vadd.f32 %v803_v13, %v762_v7  ;;  %v4287_v7 = vld [vmem:[#allocation8 + $0x170] ss:$8 sps:$4 sm:$0xff]  }
 0x1ea   :  { %v765_v17 = vpop.f32.mrf.mxu0  ;;  %v805_v18 = vpop.f32.mrf.mxu1  ;;  %1647 = vmatpush1.bf16.msra.mxu1 %v4287_v7  ;;  %v4295_v12 = vld [vmem:[#allocation8 + $0x164] ss:$8 sps:$4 sm:$0xff]   ;;  %v4293_v13 = vld [vmem:[#allocation8 + $0x160] ss:$8 sps:$4 sm:$0xff]  }
 0x1eb   :  { %v812_v19 = vsel %vm808_vm10, %v802_v1, %v810_v14  ;;  %vm809_vm11 = vcmp.ge.f32.partialorder %v804_v16, 0.0  ;;  %v811_v20 = vmul.f32 0.01, %v804_v16  ;;  %v4290_v1 = vld [vmem:[#allocation8 + $0x60] ss:$8 sps:$4 sm:$0xff]   ;;  %1648 = vmatprep.subr.bf16.mxu1 %v4295_v12 }
 0x1ec   :  { %v814_v23 = vsub.f32 0.0, %v812_v19  ;;  %v806_v24 = vpop.f32.mrf.mxu1  ;;  %1608 = vmatpush1.bf16.msra.mxu0 %v4290_v1  ;;  %v4298_v14 = vld [vmem:[#allocation8 + $0x54] ss:$8 sps:$4 sm:$0xff]   ;;  %v4299_v18 = vld [vmem:[#allocation8 + $0x150] ss:$8 sps:$4 sm:$0xff]  }
 0x1ed   :  { %v813_v25 = vsel %vm809_vm11, %v804_v16, %v811_v20  ;;  %v4296_v16 = vld [vmem:[#allocation8 + $0x50] ss:$8 sps:$4 sm:$0xff]   ;;  %1609 = vmatprep.subr.bf16.mxu0 %v4298_v14  ;;  %v4301_v17 = vld [vmem:[#allocation8 + $0x154] ss:$8 sps:$4 sm:$0xff]   ;;  %v4304_v19 = vld [vmem:[#allocation8 + $0x44] ss:$8 sps:$4 sm:$0xff]  }
 0x1ee   :  { %v816_v26 = vmin.f32 %v814_v23, 80.0  ;;  %v815_v0 = vsub.f32 0.0, %v813_v25  ;;  %1649 = vmatpush1.bf16.msra.mxu1 %v4293_v13  ;;  %v4302_v20 = vld [vmem:[#allocation8 + $0x40] ss:$8 sps:$4 sm:$0xff]   ;;  %v4307_v23 = vld [vmem:[#allocation8 + $0x144] ss:$8 sps:$4 sm:$0xff]  }
 0x1ef   :  { %1650 = vmatprep.subr.bf16.mxu1 %v4301_v17  ;;  %v4305_v24 = vld [vmem:[#allocation8 + $0x140] ss:$8 sps:$4 sm:$0xff]   ;;  %v4310_v25 = vld [vmem:[#allocation8 + $0x34] ss:$8 sps:$4 sm:$0xff]   ;;  %v4355_v7 = vld [vmem:[#allocation8 + $0x1c4] ss:$8 sps:$4 sm:$0xff]  }
 0x1f0   :  { %v818_v27 = vmul.f32 1.442695, %v816_v26  ;;  %v817_v28 = vmin.f32 %v815_v0, 80.0  ;;  %1610 = vmatpush1.bf16.msra.mxu0 %v4296_v16  ;;  %v4308_v26 = vld [vmem:[#allocation8 + $0x30] ss:$8 sps:$4 sm:$0xff]  }
 0x1f1   :  { %1611 = vmatprep.subr.bf16.mxu0 %v4304_v19  ;;  %v4313_v0 = vld [vmem:[#allocation8 + $0x134] ss:$8 sps:$4 sm:$0xff]   ;;  %v4353_v13 = vld [vmem:[#allocation8 + $0x1c0] ss:$8 sps:$4 sm:$0xff]   ;;  %v4356_v14 = vld [vmem:[#allocation8 + $0xb0] ss:$8 sps:$4 sm:$0xff]  }
 0x1f2   :  { %4486 = vpow2.f32 %v818_v27  ;;  %v820_v29 = vmul.f32 1.442695, %v817_v28  ;;  %1651 = vmatpush1.bf16.msra.mxu1 %v4299_v18  ;;  %v4311_v27 = vld [vmem:[#allocation8 + $0x130] ss:$8 sps:$4 sm:$0xff]   ;;  %v4316_v28 = vld [vmem:[#allocation8 + $0x24] ss:$8 sps:$4 sm:$0xff]  }
 0x1f3   :  { %1652 = vmatprep.subr.bf16.mxu1 %v4307_v23  ;;  %v4358_v1 = vld [vmem:[#allocation8 + $0xb4] ss:$8 sps:$4 sm:$0xff]   ;;  %v4364_v18 = vld [vmem:[#allocation8 + $0xa4] ss:$8 sps:$4 sm:$0xff]   ;;  %v4362_v23 = vld [vmem:[#allocation8 + $0xa0] ss:$8 sps:$4 sm:$0xff]  }
 0x1f4   :  { %4488 = vpow2.f32 %v820_v29  ;;  %1612 = vmatpush1.bf16.msra.mxu0 %v4302_v20  ;;  %v4314_v29 = vld [vmem:[#allocation8 + $0x20] ss:$8 sps:$4 sm:$0xff]   ;;  %v4361_v16 = vld [vmem:[#allocation8 + $0x1b4] ss:$8 sps:$4 sm:$0xff]   ;;  %v4359_v20 = vld [vmem:[#allocation8 + $0x1b0] ss:$8 sps:$4 sm:$0xff]  }
 0x1f5   :  { %1613 = vmatprep.subr.bf16.mxu0 %v4310_v25  ;;  %v4370_v25 = vld [vmem:[#allocation8 + $0x94] ss:$8 sps:$4 sm:$0xff]  }
 0x1f6   :  { %1653 = vmatpush1.bf16.msra.mxu1 %v4305_v24  ;;  %v4367_v24 = vld [vmem:[#allocation8 + $0x1a4] ss:$8 sps:$4 sm:$0xff]  }
 0x1f7   :  { %1654 = vmatprep.subr.bf16.mxu1 %v4313_v0  ;;  %v4365_v0 = vld [vmem:[#allocation8 + $0x1a0] ss:$8 sps:$4 sm:$0xff]  }
 0x1f8   :  { %1614 = vmatpush1.bf16.msra.mxu0 %v4308_v26 }
 0x1f9   :  { %1615 = vmatprep.subr.bf16.mxu0 %v4316_v28  ;;  %v4373_v28 = vld [vmem:[#allocation8 + $0x194] ss:$8 sps:$4 sm:$0xff]  }
 0x1fa   :  { %1655 = vmatpush1.bf16.msra.mxu1 %v4311_v27  ;;  %v4368_v27 = vld [vmem:[#allocation8 + $0x90] ss:$8 sps:$4 sm:$0xff]  }
 0x1fc   :  { %1616 = vmatpush1.bf16.msra.mxu0 %v4314_v29  ;;  %v933_v29 = vsub.f32 0.0, %v4774_v49 }
 0x1ff   :  { %v4487_v30 = vpop.eup %4486 }
 0x200   :  { %v822_v31 = vadd.f32 1.0, %v4487_v30  ;;  %v4319_v30 = vld [vmem:[#allocation8 + $0x124] ss:$8 sps:$4 sm:$0xff]  }
 0x201   :  { %v4489_v32 = vpop.eup %4488  ;;  %1656 = vmatprep.subr.bf16.mxu1 %v4319_v30  ;;  %v4376_v30 = vld [vmem:[#allocation8 + $0x84] ss:$8 sps:$4 sm:$0xff]  }
 0x202   :  { %4490 = vrcp.f32 %v822_v31  ;;  %v823_v33 = vadd.f32 1.0, %v4489_v32  ;;  %v4317_v31 = vld [vmem:[#allocation8 + $0x120] ss:$8 sps:$4 sm:$0xff]   ;;  %v4322_v32 = vld [vmem:[#allocation8 + $0x14] ss:$8 sps:$4 sm:$0xff]  }
 0x203   :  { %1617 = vmatprep.subr.bf16.mxu0 %v4322_v32  ;;  %1657 = vmatpush1.bf16.msra.mxu1 %v4317_v31  ;;  %v4371_v32 = vld [vmem:[#allocation8 + $0x190] ss:$8 sps:$4 sm:$0xff]  }
 0x204   :  { %4492 = vrcp.f32 %v823_v33  ;;  %v4320_v33 = vld [vmem:[#allocation8 + $0x10] ss:$8 sps:$4 sm:$0xff]  }
 0x205   :  { %1618 = vmatpush1.bf16.msra.mxu0 %v4320_v33  ;;  %v4374_v33 = vld [vmem:[#allocation8 + $0x80] ss:$8 sps:$4 sm:$0xff]  }
 0x20f   :  { %v4491_v37 = vpop.eup %4490 }
 0x210   :  { %v842_v39 = vrot.slane %v4491_v37, %v4837_v34  ;;  %v829_v41 = vrot.slane %v4491_v37, %v4840_v36  ;;  %v4325_v37 = vld [vmem:[#allocation8 + $0x114] ss:$8 sps:$4 sm:$0xff]  }
 0x211   :  { %v4493_v38 = vpop.eup %4492  ;;  %1658 = vmatprep.subr.bf16.mxu1 %v4325_v37  ;;  %v4379_v37 = vld [vmem:[#allocation8 + $0x184] ss:$8 sps:$4 sm:$0xff]  }
 0x212   :  { %v846_v40 = vrot.slane %v4493_v38, %v4837_v34  ;;  %v833_v42 = vrot.slane %v4493_v38, %v4840_v36  ;;  %v4323_v38 = vld [vmem:[#allocation8 + $0x110] ss:$8 sps:$4 sm:$0xff]  }
 0x213   :  { %1659 = vmatpush1.bf16.msra.mxu1 %v4323_v38  ;;  %v934_v38 = vmin.f32 %v933_v29, 80.0 }
 0x214   :  { %v849_v43 = vcombine.low %v842_v39, %v846_v40  ;;  %v836_v44 = vcombine.low %v829_v41, %v833_v42  ;;  %v4328_v39 = vld [vmem:[#allocation8 + $0x4] ss:$8 sps:$4 sm:$0xff]   ;;  %v4326_v40 = vld [vmem:[#allocation8] ss:$8 sps:$4 sm:$0xff]  }
 0x215   :  { %1619 = vmatprep.subr.bf16.mxu0 %v4328_v39  ;;  %v4331_v41 = vld [vmem:[#allocation8 + $0x104] ss:$8 sps:$4 sm:$0xff]   ;;  %v4329_v42 = vld [vmem:[#allocation8 + $0x100] ss:$8 sps:$4 sm:$0xff]   ;;  %v4382_v39 = vld [vmem:[#allocation10 + $0x74] ss:$8 sps:$4 sm:$0xff]  }
 0x216   :  { %v4847_v45 = vmul.f32 %v849_v43, %v4806_v62  ;;  %v4850_v46 = vmul.f32 %v836_v44, %v4786_v15  ;;  %1620 = vmatpush1.bf16.msra.mxu0 %v4326_v40  ;;  %v4334_v43 = vld [vmem:[#allocation8 + $0xf4] ss:$8 sps:$4 sm:$0xff]   ;;  %1660 = vmatprep.subr.bf16.mxu1 %v4331_v41  ;;  %v4332_v44 = vld [vmem:[#allocation8 + $0xf0] ss:$8 sps:$4 sm:$0xff]   ;;  %v4377_v41 = vld [vmem:[#allocation8 + $0x180] ss:$8 sps:$4 sm:$0xff]  }
 0x217   :  { %1621 = vmatprep.subr.bf16.mxu0 %v4334_v43  ;;  %1661 = vmatpush1.bf16.msra.mxu1 %v4329_v42  ;;  %v935_v42 = vmul.f32 1.442695, %v934_v38 }
 0x218   :  { %v4854_v9 = vcombine.high %v4847_v45, %v4847_v45  ;;  %v4858_v47 = vcombine.high %v4850_v46, %v4850_v46  ;;  %v1027_v52 = vsel %vm88_vm0, %v4847_v45, 0.0  ;;  %v856_v62 = vsel %vm88_vm0, %v4850_v46, 0.0 }
 0x219   :  { %v1033_v59 = vsel %vm88_vm0, %v4847_v45, -inf  ;;  %v862_v60 = vsel %vm88_vm0, %v4850_v46, -inf }
 0x21a   :  { %v1028_v53 = vsel %vm88_vm0, %v4854_v9, 0.0  ;;  %v857_v15 = vsel %vm88_vm0, %v4858_v47, 0.0  ;;  %v1034_v57 = vsel %vm88_vm0, %v4854_v9, -inf  ;;  %v863_v58 = vsel %vm88_vm0, %v4858_v47, -inf  ;;  %1622 = vmatpush2.bf16.msra.mxu0 %v4332_v44 }
 0x21b   :  { %v1029_v55 = vadd.f32 %v1028_v53, %v1027_v52  ;;  %v858_v56 = vadd.f32 %v857_v15, %v856_v62  ;;  %v1035_v63 = vmax.f32 %v1033_v59, %v1034_v57  ;;  %v864_v3 = vmax.f32 %v862_v60, %v863_v58  ;;  %v4337_v52 = vld [vmem:[#allocation8 + $0x1f4] ss:$8 sps:$4 sm:$0xff]   ;;  %v4335_v53 = vld [vmem:[#allocation8 + $0x1f0] ss:$8 sps:$4 sm:$0xff]   ;;  %v4340_v62 = vld [vmem:[#allocation8 + $0xe4] ss:$8 sps:$4 sm:$0xff]  }
 0x21c   :  { %1662 = vmatprep.subr.bf16.mxu1 %v4337_v52  ;;  %v4338_v15 = vld [vmem:[#allocation8 + $0xe0] ss:$8 sps:$4 sm:$0xff]   ;;  %1623 = vmatprep.subr.bf16.mxu0 %v4340_v62  ;;  %v4346_v58 = vld [vmem:[#allocation8 + $0xd4] ss:$8 sps:$4 sm:$0xff]   ;;  %v4344_v59 = vld [vmem:[#allocation8 + $0xd0] ss:$8 sps:$4 sm:$0xff]  }
 0x21d   :  { %1030 = vadd.xlane.f32.xlu1 %v1029_v55  ;;  %859 = vadd.xlane.f32.xlu0 %v858_v56  ;;  %v4343_v55 = vld [vmem:[#allocation8 + $0x1e4] ss:$8 sps:$4 sm:$0xff]   ;;  %v1094_v56 = vmul.f32 %v4761_v21, %v4772_v48  ;;  %v4341_v57 = vld [vmem:[#allocation8 + $0x1e0] ss:$8 sps:$4 sm:$0xff]   ;;  %v4349_v60 = vld [vmem:[#allocation8 + $0x1d4] ss:$8 sps:$4 sm:$0xff]  }
 0x21e   :  { %1663 = vmatpush2.bf16.msra.mxu1 %v4335_v53  ;;  %1624 = vmatpush2.bf16.msra.mxu0 %v4338_v15 }
 0x21f   :  { %1664 = vmatprep.subr.bf16.mxu1 %v4343_v55  ;;  %1625 = vmatprep.subr.bf16.mxu0 %v4346_v58  ;;  %v1096_v4 = vmul.f32 0.01, %v1094_v56  ;;  %vm1095_vm12 = vcmp.ge.f32.partialorder %v1094_v56, 0.0 }
 0x221   :  { %1036 = vmax.xlane.f32.xlu1 %v1035_v63  ;;  %865 = vmax.xlane.f32.xlu0 %v864_v3  ;;  %v1098_v63 = vmul.f32 %v4761_v21, %v4769_v35  ;;  %v4352_v3 = vld [vmem:[#allocation8 + $0xc4] ss:$8 sps:$4 sm:$0xff]   ;;  %v1097_v12 = vsel %vm1095_vm12, %v1094_v56, %v1096_v4 }
 0x222   :  { %1665 = vmatpush2.bf16.msra.mxu1 %v4341_v57  ;;  %1626 = vmatpush2.bf16.msra.mxu0 %v4344_v59 }
 0x223   :  { %1666 = vmatprep.subr.bf16.mxu1 %v4349_v60  ;;  %v1100_v11 = vmul.f32 0.01, %v1098_v63  ;;  %1627 = vmatprep.subr.bf16.mxu0 %v4352_v3  ;;  %vm1099_vm13 = vcmp.ge.f32.partialorder %v1098_v63, 0.0 }
 0x225   :  { %v1101_v17 = vsel %vm1099_vm13, %v1098_v63, %v1100_v11 }
 0x226   :  { %1667 = vmatpush2.bf16.msra.mxu1 %v4347_v6  ;;  %1628 = vmatpush2.bf16.msra.mxu0 %v4350_v8  ;;  %v1102_v19 = vadd.f32 %v1101_v17, %v1097_v12 }
 0x227   :  { %1668 = vmatprep.subr.bf16.mxu1 %v4355_v7  ;;  %1629 = vmatprep.subr.bf16.mxu0 %v4358_v1 }
 0x228   :  { %v1103_v26 = vsub.f32 0.0, %v1102_v19 }
 0x22a   :  { %1669 = vmatpush2.bf16.msra.mxu1 %v4353_v13  ;;  %1630 = vmatpush2.bf16.msra.mxu0 %v4356_v14  ;;  %v1104_v31 = vmin.f32 %v1103_v26, 80.0 }
 0x22b   :  { %1670 = vmatprep.subr.bf16.mxu1 %v4361_v16  ;;  %1631 = vmatprep.subr.bf16.mxu0 %v4364_v18 }
 0x22c   :  { %v1105_v40 = vmul.f32 1.442695, %v1104_v31 }
 0x22e   :  { %1671 = vmatpush2.bf16.msra.mxu1 %v4359_v20  ;;  %1632 = vmatpush2.bf16.msra.mxu0 %v4362_v23  ;;  %4494 = vpow2.f32 %v1105_v40 }
 0x22f   :  { %1672 = vmatprep.subr.bf16.mxu1 %v4367_v24  ;;  %1633 = vmatprep.subr.bf16.mxu0 %v4370_v25  ;;  %4496 = vpow2.f32 %v935_v42 }
 0x232   :  { %1673 = vmatpush2.bf16.msra.mxu1 %v4365_v0  ;;  %1634 = vmatpush2.bf16.msra.mxu0 %v4368_v27  ;;  %v4890_v0 = vld [vmem:[%s5313_s0 + $0x8] sm:$0xff] }
 0x233   :  { %1674 = vmatprep.subr.bf16.mxu1 %v4373_v28  ;;  %1635 = vmatprep.subr.bf16.mxu0 %v4376_v30  ;;  %v4898_v28 = vld [vmem:[%s5313_s0] sm:$0xff] }
 0x236   :  { %1675 = vmatpush2.bf16.msra.mxu1 %v4371_v32  ;;  %1636 = vmatpush2.bf16.msra.mxu0 %v4374_v33 }
 0x237   :  { %1676 = vmatprep.subr.bf16.mxu1 %v4379_v37  ;;  %2634 = vmatprep.subr.bf16.mxu0 %v4382_v39  ;;  %v4431_v39 = vld [vmem:[#allocation10 + $0x174] ss:$8 sps:$4 sm:$0xff]  }
 0x23a   :  { %1677 = vmatpush2.bf16.msra.mxu1 %v4377_v41 }
 0x23b   :  { %v4495_v49 = vpop.eup %4494  ;;  %2675 = vmatprep.subr.bf16.mxu1 %v4431_v39 }
 0x23c   :  { %v4497_v43 = vpop.eup %4496  ;;  %v1107_v44 = vadd.f32 1.0, %v4495_v49 }
 0x23d   :  { %v937_v52 = vadd.f32 1.0, %v4497_v43 }
 0x23e   :  { %4498 = vrcp.f32 %v1107_v44 }
 0x23f   :  { %4500 = vrcp.f32 %v937_v52 }
 0x24b   :  { %v4499_v18 = vpop.eup %4498 }
 0x24c   :  { %v4501_v23 = vpop.eup %4500 }
 0x24d   :  { %v946_v26 = vrot.slane %v4501_v23, %v4782_v10 }
 0x24f   :  { %v4901_v29 = vmul.f32 %v4898_v28, %v946_v26 }
 0x251   :  { %v950_v31 = vcombine.high %v4901_v29, %v4901_v29  ;;  %v952_v32 = vsel %vm88_vm0, %v4901_v29, 0.0  ;;  %v966_v41 = vsel %vm88_vm0, %v4901_v29, -inf }
 0x252   :  { %v953_v40 = vrot.slane %v952_v32, 4 }
 0x253   :  { %v959_v49 = vsel %vm88_vm0, %v950_v31, 0.0  ;;  %v973_v43 = vsel %vm88_vm0, %v950_v31, -inf }
 0x2a6   :  { %v1031_v53 = vpop.xlane.xlu1 %1030  ;;  %v860_v62 = vpop.xlane.xlu0 %859 }
 0x2a7   :  { %v1032_v15 = vmul.f32 0.00390625, %v1031_v53  ;;  %v861_v55 = vmul.f32 0.00390625, %v860_v62 }
 0x2a9   :  { %v1038_v56 = vmul.f32 %v1032_v15, %v4761_v21  ;;  %v868_v57 = vmul.f32 %v4761_v21, %v861_v55 }
 0x2aa   :  { %v1037_v58 = vpop.xlane.xlu1 %1036  ;;  %v866_v59 = vpop.xlane.xlu0 %865 }
 0x2ab   :  { %v1040_v60 = vmul.f32 0.01, %v1038_v56  ;;  %v870_v63 = vmul.f32 0.01, %v868_v57  ;;  %v1042_v3 = vmul.f32 %v1037_v58, %v4761_v21  ;;  %v872_v4 = vmul.f32 %v4761_v21, %v866_v59 }
 0x2ac   :  { %vm1039_vm14 = vcmp.ge.f32.partialorder %v1038_v56, 0.0  ;;  %vm869_vm15 = vcmp.ge.f32.partialorder %v868_v57, 0.0  ;;  %v1116_v21 = vrot.slane %v4499_v18, %v4782_v10  ;;  %v954_v58 = vadd.f32 %v953_v40, %v952_v32 }
 0x2ad   :  { %vm1043_vm1 = vcmp.ge.f32.partialorder %v1042_v3, 0.0  ;;  %v1044_v6 = vmul.f32 0.01, %v1042_v3  ;;  %vm873_vm2 = vcmp.ge.f32.partialorder %v872_v4, 0.0  ;;  %v874_v8 = vmul.f32 0.01, %v872_v4 }
 0x2ae   :  { %v1041_v7 = vsel %vm1039_vm14, %v1038_v56, %v1040_v60  ;;  %v871_v1 = vsel %vm869_vm15, %v868_v57, %v870_v63  ;;  %v4893_v27 = vmul.f32 %v4890_v0, %v1116_v21  ;;  %v967_v56 = vrot.slane %v966_v41, 4 }
 0x2af   :  { %v1045_v11 = vsel %vm1043_vm1, %v1042_v3, %v1044_v6  ;;  %v875_v12 = vsel %vm873_vm2, %v872_v4, %v874_v8  ;;  %v960_v59 = vrot.slane %v959_v49, 4  ;;  %v974_v60 = vrot.slane %v973_v43, 4 }
 0x2b0   :  { %v1046_v13 = vadd.f32 %v1045_v11, %v1041_v7  ;;  %v876_v14 = vadd.f32 %v875_v12, %v871_v1  ;;  %v1120_v30 = vcombine.high %v4893_v27, %v4893_v27  ;;  %v1122_v33 = vsel %vm88_vm0, %v4893_v27, 0.0 }
 0x2b1   :  { %v1136_v38 = vsel %vm88_vm0, %v4893_v27, -inf  ;;  %v1123_v44 = vrot.slane %v1122_v33, 4  ;;  %v968_v8 = vmax.f32 %v966_v41, %v967_v56  ;;  %v955_v7 = vrot.slane %v954_v58, 2 }
 0x2b2   :  { %v1047_v16 = vsub.f32 0.0, %v1046_v13  ;;  %v877_v17 = vsub.f32 0.0, %v876_v14  ;;  %v1129_v37 = vsel %vm88_vm0, %v1120_v30, 0.0  ;;  %v1137_v62 = vrot.slane %v1136_v38, 4 }
 0x2b3   :  { %v1130_v52 = vrot.slane %v1129_v37, 4  ;;  %v1143_v15 = vsel %vm88_vm0, %v1120_v30, -inf  ;;  %v1124_v63 = vadd.f32 %v1123_v44, %v1122_v33  ;;  %v961_v11 = vadd.f32 %v960_v59, %v959_v49 }
 0x2b4   :  { %v1048_v19 = vmin.f32 %v1047_v16, 80.0  ;;  %v878_v20 = vmin.f32 %v877_v17, 80.0  ;;  %v1144_v4 = vrot.slane %v1143_v15, 4  ;;  %v1138_v6 = vmax.f32 %v1136_v38, %v1137_v62 }
 0x2b5   :  { %v1131_v3 = vadd.f32 %v1130_v52, %v1129_v37  ;;  %v975_v1 = vmax.f32 %v973_v43, %v974_v60  ;;  %v1125_v12 = vrot.slane %v1124_v63, 2  ;;  %v969_v17 = vrot.slane %v968_v8, 2 }
 0x2b6   :  { %v1049_v24 = vmul.f32 1.442695, %v1048_v19  ;;  %v879_v25 = vmul.f32 1.442695, %v878_v20  ;;  %v1145_v14 = vmax.f32 %v1143_v15, %v1144_v4  ;;  %v1139_v16 = vrot.slane %v1138_v6, 2 }
 0x2b7   :  { %v1132_v13 = vrot.slane %v1131_v3, 2  ;;  %v956_v18 = vadd.f32 %v955_v7, %v954_v58  ;;  %v962_v19 = vrot.slane %v961_v11, 2  ;;  %v976_v20 = vrot.slane %v975_v1, 2 }
 0x2b8   :  { %4502 = vpow2.f32 %v1049_v24  ;;  %v1126_v23 = vadd.f32 %v1125_v12, %v1124_v63  ;;  %v1146_v24 = vrot.slane %v1145_v14, 2  ;;  %v4919_v26 = vmax.f32 %v968_v8, %v969_v17 }
 0x2b9   :  { %4504 = vpow2.f32 %v879_v25  ;;  %v1133_v21 = vadd.f32 %v1132_v13, %v1131_v3  ;;  %v1140_v25 = vmax.f32 %v1138_v6, %v1139_v16  ;;  %v957_v30 = vrot.slane %v956_v18, 1 }
 0x2ba   :  { %v4921_v31 = vadd.f32 %v962_v19, %v961_v11  ;;  %v4923_v32 = vmax.f32 %v975_v1, %v976_v20  ;;  %v1127_v37 = vrot.slane %v1126_v23, 1  ;;  %v4925_v39 = vmax.f32 %v1145_v14, %v1146_v24 }
 0x2bb   :  { %v1134_v38 = vrot.slane %v1133_v21, 1  ;;  %v1141_v41 = vrot.slane %v1140_v25, 1  ;;  %v4935_v62 = vadd.f32 %v957_v30, %v956_v18 }
 0x2bc   :  { %v1148_v15 = vrot.slane %v4925_v39, 1 }
 0x2bd   :  { %v1135_v56 = vadd.f32 %v1134_v38, %v1133_v21  ;;  %v4941_v58 = vmax.f32 %v1140_v25, %v1141_v41 }
 0x2c5   :  { %v4503_v42 = vpop.eup %4502 }
 0x2c6   :  { %v4505_v53 = vpop.eup %4504  ;;  %v1051_v55 = vadd.f32 1.0, %v4503_v42 }
 0x2c7   :  { %v881_v57 = vadd.f32 1.0, %v4505_v53 }
 0x2c8   :  { %4506 = vrcp.f32 %v1051_v55  ;;  %v1128_v55 = vadd.f32 %v1127_v37, %v1126_v23 }
 0x2c9   :  { %4508 = vrcp.f32 %v881_v57 }
 0x2d5   :  { %v4507_v33 = vpop.eup %4506 }
 0x2d6   :  { %v4509_v40 = vpop.eup %4508  ;;  %v1060_v42 = vrot.slane %v4507_v33, %v4782_v10 }
 0x2d7   :  { %v890_v43 = vrot.slane %v4509_v40, %v4782_v10 }
 0x2d8   :  { %v4933_v53 = vmul.f32 %v1060_v42, %v4847_v45 }
 0x2d9   :  { %v4939_v57 = vmul.f32 %v890_v43, %v4850_v46 }
 0x2da   :  { %v1064_v59 = vcombine.high %v4933_v53, %v4933_v53  ;;  %v1066_v60 = vsel %vm88_vm0, %v4933_v53, 0.0  ;;  %v1080_v63 = vsel %vm88_vm0, %v4933_v53, -inf }
 0x2db   :  { %v1067_v3 = vrot.slane %v1066_v60, 4  ;;  %v1081_v4 = vrot.slane %v1080_v63, 4  ;;  %v894_v6 = vcombine.high %v4939_v57, %v4939_v57  ;;  %v896_v8 = vsel %vm88_vm0, %v4939_v57, 0.0 }
 0x2dc   :  { %v1073_v7 = vsel %vm88_vm0, %v1064_v59, 0.0  ;;  %v1087_v11 = vsel %vm88_vm0, %v1064_v59, -inf  ;;  %v897_v1 = vrot.slane %v896_v8, 4  ;;  %v910_v12 = vsel %vm88_vm0, %v4939_v57, -inf }
 0x2dd   :  { %v1068_v13 = vadd.f32 %v1067_v3, %v1066_v60  ;;  %v1074_v14 = vrot.slane %v1073_v7, 4  ;;  %v1082_v16 = vmax.f32 %v1080_v63, %v1081_v4  ;;  %v1088_v17 = vrot.slane %v1087_v11, 4 }
 0x2de   :  { %v898_v18 = vadd.f32 %v897_v1, %v896_v8  ;;  %v903_v19 = vsel %vm88_vm0, %v894_v6, 0.0  ;;  %v911_v20 = vrot.slane %v910_v12, 4  ;;  %v917_v23 = vsel %vm88_vm0, %v894_v6, -inf }
 0x2df   :  { %v1069_v21 = vrot.slane %v1068_v13, 2  ;;  %v1075_v24 = vadd.f32 %v1074_v14, %v1073_v7  ;;  %v1083_v25 = vrot.slane %v1082_v16, 2  ;;  %v1089_v30 = vmax.f32 %v1087_v11, %v1088_v17 }
 0x2e0   :  { %v899_v33 = vrot.slane %v898_v18, 2  ;;  %v904_v37 = vrot.slane %v903_v19, 4  ;;  %v912_v38 = vmax.f32 %v910_v12, %v911_v20  ;;  %v918_v40 = vrot.slane %v917_v23, 4 }
 0x2e1   :  { %v1070_v41 = vadd.f32 %v1069_v21, %v1068_v13  ;;  %v1076_v42 = vrot.slane %v1075_v24, 2  ;;  %v1084_v43 = vmax.f32 %v1082_v16, %v1083_v25  ;;  %v1090_v59 = vrot.slane %v1089_v30, 2 }
 0x2e2   :  { %v900_v60 = vadd.f32 %v899_v33, %v898_v18  ;;  %v905_v63 = vadd.f32 %v904_v37, %v903_v19  ;;  %v913_v3 = vrot.slane %v912_v38, 2  ;;  %v919_v4 = vmax.f32 %v917_v23, %v918_v40 }
 0x2e3   :  { %v1071_v8 = vrot.slane %v1070_v41, 1  ;;  %v1077_v1 = vadd.f32 %v1076_v42, %v1075_v24  ;;  %v1085_v52 = vrot.slane %v1084_v43, 1  ;;  %v1091_v6 = vmax.f32 %v1089_v30, %v1090_v59 }
 0x2e4   :  { %v901_v49 = vrot.slane %v900_v60, 1  ;;  %v906_v7 = vrot.slane %v905_v63, 2  ;;  %v914_v14 = vmax.f32 %v912_v38, %v913_v3  ;;  %v920_v11 = vrot.slane %v919_v4, 2 }
 0x2e5   :  { %v1072_v17 = vadd.f32 %v1071_v8, %v1070_v41  ;;  %v1078_v44 = vrot.slane %v1077_v1, 1  ;;  %v1086_v12 = vmax.f32 %v1084_v43, %v1085_v52  ;;  %v1092_v20 = vrot.slane %v1091_v6, 1 }
 0x2e6   :  { %v902_v13 = vadd.f32 %v901_v49, %v900_v60  ;;  %v907_v21 = vadd.f32 %v906_v7, %v905_v63  ;;  %v915_v16 = vrot.slane %v914_v14, 1  ;;  %v921_v25 = vmax.f32 %v919_v4, %v920_v11 }
 0x2e7   :  { %v1149_v18 = vmax.f32 %v4925_v39, %v1148_v15  ;;  %v1079_v19 = vadd.f32 %v1078_v44, %v1077_v1  ;;  %v1093_v23 = vmax.f32 %v1091_v6, %v1092_v20  ;;  %v1150_v33 = vadd.f32 %v1128_v55, %v1072_v17 }
 0x2e8   :  { %v5323_v24 = vrot.slane %v4921_v31, 1  ;;  %v908_v37 = vrot.slane %v907_v21, 1  ;;  %v916_v38 = vmax.f32 %v914_v14, %v915_v16  ;;  %v922_v40 = vrot.slane %v921_v25, 1 }
 0x2e9   :  { %v1151_v41 = vadd.f32 %v1135_v56, %v1079_v19  ;;  %v1152_v52 = vmax.f32 %v1086_v12, %v4941_v58  ;;  %v1153_v42 = vmax.f32 %v1093_v23, %v1149_v18  ;;  %v5324_v49 = vrot.slane %v4919_v26, 1  ;;  %v4380_v23 = vld [vmem:[#allocation10 + $0x70] ss:$8 sps:$4 sm:$0xff]  }
 0x2ea   :  { %v965_v30 = vadd.f32 %v5323_v24, %v4921_v31  ;;  %v5325_v39 = vrot.slane %v4923_v32, 1  ;;  %v909_v15 = vadd.f32 %v908_v37, %v907_v21  ;;  %v923_v55 = vmax.f32 %v921_v25, %v922_v40 }
 0x2eb   :  { %v972_v43 = vmax.f32 %v4919_v26, %v5324_v49  ;;  %v980_v59 = vadd.f32 %v4935_v62, %v902_v13  ;;  %v1154_v31 = vmul.f32 0.125, %v1150_v33  ;;  %v1155_v60 = vmul.f32 0.125, %v1151_v41  ;;  %v4434_v41 = vld [vmem:[#allocation10 + $0x164] ss:$8 sps:$4 sm:$0xff]   ;;  %v4432_v49 = vld [vmem:[#allocation10 + $0x160] ss:$8 sps:$4 sm:$0xff]  }
 0x2ec   :  { %v979_v44 = vmax.f32 %v4923_v32, %v5325_v39  ;;  %v1177_v63 = vcombine.low %v1152_v52, %v1153_v42  ;;  %v981_v3 = vadd.f32 %v965_v30, %v909_v15  ;;  %v4386_v30 = vld [vmem:[#allocation10 + $0x64] ss:$8 sps:$4 sm:$0xff]   ;;  %v4384_v52 = vld [vmem:[#allocation10 + $0x60] ss:$8 sps:$4 sm:$0xff]   ;;  %v4389_v42 = vld [vmem:[#allocation10 + $0x54] ss:$8 sps:$4 sm:$0xff]  }
 0x2ed   :  { %v982_v56 = vmax.f32 %v916_v38, %v972_v43  ;;  %v1158_v58 = vcombine.low %v1154_v31, %v1155_v60  ;;  %v984_v1 = vmul.f32 0.125, %v980_v59  ;;  %v4429_v38 = vld [vmem:[#allocation10 + $0x170] ss:$8 sps:$4 sm:$0xff]   ;;  %v4392_v39 = vld [vmem:[#allocation10 + $0x44] ss:$8 sps:$4 sm:$0xff]  }
 0x2ee   :  { %v983_v4 = vmax.f32 %v923_v55, %v979_v44  ;;  %v1184_v8 = vrot.slane %v1177_v63, %v4797_v51  ;;  %v985_v6 = vmul.f32 0.125, %v981_v3  ;;  %v4387_v43 = vld [vmem:[#allocation10 + $0x50] ss:$8 sps:$4 sm:$0xff]   ;;  %v4390_v44 = vld [vmem:[#allocation10 + $0x40] ss:$8 sps:$4 sm:$0xff]  }
 0x2ef   :  { %v1165_v7 = vrot.slane %v1158_v58, %v4797_v51  ;;  %v4395_v15 = vld [vmem:[#allocation10 + $0x34] ss:$8 sps:$4 sm:$0xff]   ;;  %v4393_v55 = vld [vmem:[#allocation10 + $0x30] ss:$8 sps:$4 sm:$0xff]   ;;  %v4398_v59 = vld [vmem:[#allocation10 + $0x24] ss:$8 sps:$4 sm:$0xff]  }
 0x2f0   :  { %v1007_v26 = vcombine.low %v982_v56, %v983_v4  ;;  %v1191_v32 = vrot.slane %v1184_v8, %v4797_v51  ;;  %v988_v14 = vcombine.low %v984_v1, %v985_v6  ;;  %v4396_v31 = vld [vmem:[#allocation10 + $0x20] ss:$8 sps:$4 sm:$0xff]   ;;  %v4401_v60 = vld [vmem:[#allocation10 + $0x14] ss:$8 sps:$4 sm:$0xff]   ;;  %v4399_v63 = vld [vmem:[#allocation10 + $0x10] ss:$8 sps:$4 sm:$0xff]  }
 0x2f1   :  { %v1172_v62 = vrot.slane %v1165_v7, %v4797_v51  ;;  %v4404_v3 = vld [vmem:[#allocation10 + $0x4] ss:$8 sps:$4 sm:$0xff]   ;;  %v4402_v56 = vld [vmem:[#allocation10] ss:$8 sps:$4 sm:$0xff]   ;;  %v4407_v4 = vld [vmem:[#allocation10 + $0xf4] ss:$8 sps:$4 sm:$0xff]  }
 0x2f2   :  { %v1014_v11 = vrot.slane %v1007_v26, %v4797_v51  ;;  %1193 = vst.msk [vmem:[#allocation2 + $0x5] ss:$2 sm:$0x3] %vm4801_vm9, %v1191_v32  ;;  %v995_v17 = vrot.slane %v988_v14, %v4797_v51  ;;  %v4405_v58 = vld [vmem:[#allocation10 + $0xf0] ss:$8 sps:$4 sm:$0xff]  }
 0x2f3   :  { %1174 = vst.msk [vmem:[#allocation2 + $0x1] ss:$2 sm:$0x3] %vm4801_vm9, %v1172_v62  ;;  %v4410_v8 = vld [vmem:[#allocation10 + $0xe4] ss:$8 sps:$4 sm:$0xff]  }
 0x2f4   :  { %v1021_v12 = vrot.slane %v1014_v11, %v4797_v51  ;;  %v1002_v20 = vrot.slane %v995_v17, %v4797_v51  ;;  %v4408_v1 = vld [vmem:[#allocation10 + $0xe0] ss:$8 sps:$4 sm:$0xff]   ;;  %v4413_v6 = vld [vmem:[#allocation10 + $0xd4] ss:$8 sps:$4 sm:$0xff]   ;;  %v4411_v26 = vld [vmem:[#allocation10 + $0xd0] ss:$8 sps:$4 sm:$0xff]  }
 0x2f5   :  { %v4416_v7 = vld [vmem:[#allocation10 + $0xc4] ss:$8 sps:$4 sm:$0xff]   ;;  %v4414_v32 = vld [vmem:[#allocation10 + $0xc0] ss:$8 sps:$4 sm:$0xff]   ;;  %v4419_v14 = vld [vmem:[#allocation10 + $0xb4] ss:$8 sps:$4 sm:$0xff]  }
 0x2f6   :  { %1023 = vst.msk [vmem:[#allocation2 + $0x4] ss:$2 sm:$0x3] %vm4801_vm9, %v1021_v12  ;;  %1004 = vst.msk [vmem:[#allocation2] ss:$2 sm:$0x3] %vm4801_vm9, %v1002_v20 }
 0x2f7   :  { %v4417_v11 = vld [vmem:[#allocation10 + $0xb0] ss:$8 sps:$4 sm:$0xff]   ;;  %v4422_v62 = vld [vmem:[#allocation10 + $0xa4] ss:$8 sps:$4 sm:$0xff]   ;;  %v4420_v17 = vld [vmem:[#allocation10 + $0xa0] ss:$8 sps:$4 sm:$0xff]  }
 0x2f8   :  { %v4425_v12 = vld [vmem:[#allocation10 + $0x94] ss:$8 sps:$4 sm:$0xff]   ;;  %v4423_v20 = vld [vmem:[#allocation10 + $0x90] ss:$8 sps:$4 sm:$0xff]  }
 0x2fd   :  { %v1194_v13 = vld [vmem:[#allocation2] sm:$0xff] }
 0x2fe   :  { %v1203_v21 = vrot.slane %v1194_v13, %v4832_v54  ;;  %v1196_v16 = vcombine.high %v1194_v13, %v1194_v13  ;;  %v4428_v13 = vld [vmem:[#allocation10 + $0x84] ss:$8 sps:$4 sm:$0xff]  }
 0x300   :  { %v1211_v25 = vcombine.high %v1203_v21, %v1203_v21  ;;  %v1210_v18 = vrot.slane %v1196_v16, %v4832_v54  ;;  %v1217_v24 = vpack.c.bf16 %v1203_v21, %v1203_v21  ;;  %v4426_v21 = vld [vmem:[#allocation10 + $0x80] ss:$8 sps:$4 sm:$0xff]   ;;  %v4435_v16 = vld [vmem:[#allocation10 + $0x150] ss:$8 sps:$4 sm:$0xff]  }
 0x302   :  { %v1218_v19 = vpack.c.bf16 %v1211_v25, %v1211_v25  ;;  %v1212_v33 = vcombine.high %v1210_v18, %v1210_v18  ;;  %v1219_v40 = vpack.c.bf16 %v1210_v18, %v1210_v18  ;;  %v4437_v25 = vld [vmem:[#allocation10 + $0x154] ss:$8 sps:$4 sm:$0xff]   ;;  %v4440_v18 = vld [vmem:[#allocation10 + $0x144] ss:$8 sps:$4 sm:$0xff]  }
 0x304   :  { %1637 = vmatprep.mubr.bf16.mxu0 %v1218_v19  ;;  %v1220_v37 = vpack.c.bf16 %v1212_v33, %v1212_v33  ;;  %v4438_v19 = vld [vmem:[#allocation10 + $0x140] ss:$8 sps:$4 sm:$0xff]   ;;  %v4441_v33 = vld [vmem:[#allocation10 + $0x130] ss:$8 sps:$4 sm:$0xff]  }
 0x305   :  { %1638 = vmatmul.mubr.bf16.vlgmr.msra.gmra.mxu0 %v1217_v24  ;;  %v4446_v24 = vld [vmem:[#allocation10 + $0x124] ss:$8 sps:$4 sm:$0xff]  }
 0x306   :  { %2635 = vmatpush1.bf16.msra.mxu0 %v4380_v23  ;;  %1678 = vmatprep.mubr.bf16.mxu1 %v1220_v37  ;;  %v4443_v23 = vld [vmem:[#allocation10 + $0x134] ss:$8 sps:$4 sm:$0xff]  }
 0x307   :  { %1679 = vmatmul.mubr.bf16.vlgmr.msra.gmra.mxu1 %v1219_v40  ;;  %2636 = vmatprep.subr.bf16.mxu0 %v4386_v30  ;;  %v4444_v30 = vld [vmem:[#allocation10 + $0x120] ss:$8 sps:$4 sm:$0xff]   ;;  %v4449_v37 = vld [vmem:[#allocation10 + $0x114] ss:$8 sps:$4 sm:$0xff]   ;;  %v4452_v40 = vld [vmem:[#allocation10 + $0x104] ss:$8 sps:$4 sm:$0xff]  }
 0x308   :  { %2676 = vmatpush1.bf16.msra.mxu1 %v4429_v38  ;;  %v4447_v38 = vld [vmem:[#allocation10 + $0x110] ss:$8 sps:$4 sm:$0xff]  }
 0x309   :  { %2677 = vmatprep.subr.bf16.mxu1 %v4434_v41  ;;  %v4455_v41 = vld [vmem:[#allocation10 + $0x1f4] ss:$8 sps:$4 sm:$0xff]  }
 0x30a   :  { %2637 = vmatpush1.bf16.msra.mxu0 %v4384_v52  ;;  %v4453_v52 = vld [vmem:[#allocation10 + $0x1f0] ss:$8 sps:$4 sm:$0xff]  }
 0x30b   :  { %2638 = vmatprep.subr.bf16.mxu0 %v4389_v42  ;;  %v4458_v42 = vld [vmem:[#allocation10 + $0x1e4] ss:$8 sps:$4 sm:$0xff]  }
 0x30c   :  { %2678 = vmatpush1.bf16.msra.mxu1 %v4432_v49  ;;  %v4456_v49 = vld [vmem:[#allocation10 + $0x1e0] ss:$8 sps:$4 sm:$0xff]  }
 0x30d   :  { %2679 = vmatprep.subr.bf16.mxu1 %v4437_v25 }
 0x30e   :  { %2639 = vmatpush1.bf16.msra.mxu0 %v4387_v43  ;;  %v4461_v43 = vld [vmem:[#allocation10 + $0x1d4] ss:$8 sps:$4 sm:$0xff]  }
 0x30f   :  { %2640 = vmatprep.subr.bf16.mxu0 %v4392_v39  ;;  %v4459_v39 = vld [vmem:[#allocation10 + $0x1d0] ss:$8 sps:$4 sm:$0xff]  }
 0x310   :  { %2680 = vmatpush1.bf16.msra.mxu1 %v4435_v16 }
 0x311   :  { %2681 = vmatprep.subr.bf16.mxu1 %v4440_v18 }
 0x312   :  { %2641 = vmatpush1.bf16.msra.mxu0 %v4390_v44  ;;  %v4464_v44 = vld [vmem:[#allocation10 + $0x1c4] ss:$8 sps:$4 sm:$0xff]  }
 0x313   :  { %2642 = vmatprep.subr.bf16.mxu0 %v4395_v15  ;;  %v4462_v15 = vld [vmem:[#allocation10 + $0x1c0] ss:$8 sps:$4 sm:$0xff]  }
 0x314   :  { %2682 = vmatpush1.bf16.msra.mxu1 %v4438_v19 }
 0x315   :  { %2683 = vmatprep.subr.bf16.mxu1 %v4443_v23 }
 0x316   :  { %2643 = vmatpush1.bf16.msra.mxu0 %v4393_v55  ;;  %v4467_v55 = vld [vmem:[#allocation10 + $0x1b4] ss:$8 sps:$4 sm:$0xff]  }
 0x317   :  { %2644 = vmatprep.subr.bf16.mxu0 %v4398_v59  ;;  %v4465_v59 = vld [vmem:[#allocation10 + $0x1b0] ss:$8 sps:$4 sm:$0xff]  }
 0x318   :  { %2684 = vmatpush1.bf16.msra.mxu1 %v4441_v33 }
 0x319   :  { %2685 = vmatprep.subr.bf16.mxu1 %v4446_v24 }
 0x31a   :  { %2645 = vmatpush1.bf16.msra.mxu0 %v4396_v31  ;;  %v4470_v31 = vld [vmem:[#allocation10 + $0x1a4] ss:$8 sps:$4 sm:$0xff]  }
 0x31b   :  { %2646 = vmatprep.subr.bf16.mxu0 %v4401_v60  ;;  %v4468_v60 = vld [vmem:[#allocation10 + $0x1a0] ss:$8 sps:$4 sm:$0xff]  }
 0x31c   :  { %2686 = vmatpush1.bf16.msra.mxu1 %v4444_v30 }
 0x31d   :  { %2687 = vmatprep.subr.bf16.mxu1 %v4449_v37 }
 0x31e   :  { %2647 = vmatpush1.bf16.msra.mxu0 %v4399_v63  ;;  %v4473_v63 = vld [vmem:[#allocation10 + $0x194] ss:$8 sps:$4 sm:$0xff]  }
 0x31f   :  { %2648 = vmatprep.subr.bf16.mxu0 %v4404_v3  ;;  %v4471_v3 = vld [vmem:[#allocation10 + $0x190] ss:$8 sps:$4 sm:$0xff]  }
 0x320   :  { %2688 = vmatpush1.bf16.msra.mxu1 %v4447_v38 }
 0x321   :  { %2689 = vmatprep.subr.bf16.mxu1 %v4452_v40 }
 0x322   :  { %2649 = vmatpush1.bf16.msra.mxu0 %v4402_v56  ;;  %v4476_v56 = vld [vmem:[#allocation10 + $0x184] ss:$8 sps:$4 sm:$0xff]  }
 0x323   :  { %2650 = vmatprep.subr.bf16.mxu0 %v4407_v4  ;;  %v4474_v4 = vld [vmem:[#allocation10 + $0x180] ss:$8 sps:$4 sm:$0xff]  }
 0x326   :  { %2651 = vmatpush2.bf16.msra.mxu0 %v4405_v58 }
 0x327   :  { %2652 = vmatprep.subr.bf16.mxu0 %v4410_v8 }
 0x32a   :  { %2653 = vmatpush2.bf16.msra.mxu0 %v4408_v1 }
 0x32b   :  { %2654 = vmatprep.subr.bf16.mxu0 %v4413_v6 }
 0x32e   :  { %2655 = vmatpush2.bf16.msra.mxu0 %v4411_v26 }
 0x32f   :  { %2656 = vmatprep.subr.bf16.mxu0 %v4416_v7 }
 0x332   :  { %2657 = vmatpush2.bf16.msra.mxu0 %v4414_v32 }
 0x333   :  { %2658 = vmatprep.subr.bf16.mxu0 %v4419_v14 }
 0x336   :  { %2659 = vmatpush2.bf16.msra.mxu0 %v4417_v11 }
 0x337   :  { %2660 = vmatprep.subr.bf16.mxu0 %v4422_v62 }
 0x33a   :  { %2661 = vmatpush2.bf16.msra.mxu0 %v4420_v17 }
 0x33b   :  { %2662 = vmatprep.subr.bf16.mxu0 %v4425_v12 }
 0x33e   :  { %2663 = vmatpush2.bf16.msra.mxu0 %v4423_v20 }
 0x33f   :  { %2664 = vmatprep.subr.bf16.mxu0 %v4428_v13 }
 0x342   :  { %2665 = vmatpush2.bf16.msra.mxu0 %v4426_v21 }
 0x343   :  { %4130 = vmatprep.subr.msk.mxu0 %vm88_vm0, %v4858_v47  ;;  %v4450_v47 = vld [vmem:[#allocation10 + $0x100] ss:$8 sps:$4 sm:$0xff]  }
 0x344   :  { %2690 = vmatpush1.bf16.msra.mxu1 %v4450_v47 }
 0x345   :  { %2691 = vmatprep.subr.bf16.mxu1 %v4455_v41 }
 0x348   :  { %2692 = vmatpush2.bf16.msra.mxu1 %v4453_v52 }
 0x349   :  { %2693 = vmatprep.subr.bf16.mxu1 %v4458_v42 }
 0x34c   :  { %2694 = vmatpush2.bf16.msra.mxu1 %v4456_v49 }
 0x34d   :  { %2695 = vmatprep.subr.bf16.mxu1 %v4461_v43 }
 0x350   :  { %2696 = vmatpush2.bf16.msra.mxu1 %v4459_v39 }
 0x351   :  { %2697 = vmatprep.subr.bf16.mxu1 %v4464_v44 }
 0x354   :  { %2698 = vmatpush2.bf16.msra.mxu1 %v4462_v15 }
 0x355   :  { %2699 = vmatprep.subr.bf16.mxu1 %v4467_v55 }
 0x358   :  { %2700 = vmatpush2.bf16.msra.mxu1 %v4465_v59 }
 0x359   :  { %2701 = vmatprep.subr.bf16.mxu1 %v4470_v31 }
 0x35c   :  { %2702 = vmatpush2.bf16.msra.mxu1 %v4468_v60 }
 0x35d   :  { %2703 = vmatprep.subr.bf16.mxu1 %v4473_v63 }
 0x360   :  { %2704 = vmatpush2.bf16.msra.mxu1 %v4471_v3 }
 0x361   :  { %2705 = vmatprep.subr.bf16.mxu1 %v4476_v56 }
 0x364   :  { %2706 = vmatpush2.bf16.msra.mxu1 %v4474_v4 }
 0x3c5   :  { %v1639_v58 = vpop.f32.mrf.mxu0 }
 0x3c7   :  { %v1641_v8 = vpop.f32.mrf.mxu0  ;;  %v1680_v1 = vpop.f32.mrf.mxu1 }
 0x3c8   :  { %v1681_v6 = vadd.f32 %v1680_v1, %v1639_v58 }
 0x3c9   :  { %v1643_v26 = vpop.f32.mrf.mxu0  ;;  %v1682_v7 = vpop.f32.mrf.mxu1 }
 0x3ca   :  { %vm1687_vm3 = vcmp.ge.f32.partialorder %v1681_v6, 0.0  ;;  %v1689_v32 = vmul.f32 0.01, %v1681_v6  ;;  %v1683_v14 = vadd.f32 %v1682_v7, %v1641_v8 }
 0x3cb   :  { %v1644_v11 = vpop.f32.mrf.mxu0  ;;  %v1684_v62 = vpop.f32.mrf.mxu1 }
 0x3cc   :  { %v1691_v17 = vsel %vm1687_vm3, %v1681_v6, %v1689_v32  ;;  %vm1688_vm4 = vcmp.ge.f32.partialorder %v1683_v14, 0.0  ;;  %v1690_v12 = vmul.f32 0.01, %v1683_v14 }
 0x3cd   :  { %v1693_v20 = vsub.f32 0.0, %v1691_v17  ;;  %v1685_v13 = vpop.f32.mrf.mxu1 }
 0x3ce   :  { %v1692_v21 = vsel %vm1688_vm4, %v1683_v14, %v1690_v12 }
 0x3cf   :  { %v1695_v16 = vmin.f32 %v1693_v20, 80.0  ;;  %v1694_v25 = vsub.f32 0.0, %v1692_v21 }
 0x3d1   :  { %v1697_v18 = vmul.f32 1.442695, %v1695_v16  ;;  %v1696_v19 = vmin.f32 %v1694_v25, 80.0 }
 0x3d3   :  { %4510 = vpow2.f32 %v1697_v18  ;;  %v1699_v23 = vmul.f32 1.442695, %v1696_v19  ;;  %v2123_v18 = vmul.f32 %v4763_v22, %v4772_v48  ;;  %v1888_v19 = vsub.f32 0.0, %v4776_v50 }
 0x3d5   :  { %4512 = vpow2.f32 %v1699_v23  ;;  %v2127_v23 = vmul.f32 %v4763_v22, %v4769_v35  ;;  %vm2124_vm5 = vcmp.ge.f32.partialorder %v2123_v18, 0.0 }
 0x3d7   :  { %vm2128_vm6 = vcmp.ge.f32.partialorder %v2127_v23, 0.0 }
 0x3e0   :  { %v4511_v33 = vpop.eup %4510 }
 0x3e1   :  { %v1701_v24 = vadd.f32 1.0, %v4511_v33  ;;  %v2125_v33 = vmul.f32 0.01, %v2123_v18 }
 0x3e2   :  { %v4513_v30 = vpop.eup %4512 }
 0x3e3   :  { %4514 = vrcp.f32 %v1701_v24  ;;  %v1702_v37 = vadd.f32 1.0, %v4513_v30  ;;  %v1889_v24 = vmin.f32 %v1888_v19, 80.0  ;;  %v2129_v30 = vmul.f32 0.01, %v2127_v23 }
 0x3e5   :  { %4516 = vrcp.f32 %v1702_v37  ;;  %v2126_v37 = vsel %vm2124_vm5, %v2123_v18, %v2125_v33 }
 0x3f0   :  { %v4515_v38 = vpop.eup %4514 }
 0x3f1   :  { %v1708_v40 = vrot.slane %v4515_v38, %v4840_v36  ;;  %v1722_v52 = vrot.slane %v4515_v38, %v4837_v34  ;;  %v1890_v38 = vmul.f32 1.442695, %v1889_v24 }
 0x3f2   :  { %v4517_v47 = vpop.eup %4516 }
 0x3f3   :  { %v1712_v41 = vrot.slane %v4517_v47, %v4840_v36  ;;  %v1726_v42 = vrot.slane %v4517_v47, %v4837_v34  ;;  %v2130_v47 = vsel %vm2128_vm6, %v2127_v23, %v2129_v30  ;;  %4518 = vpow2.f32 %v1890_v38 }
 0x3f5   :  { %v1715_v49 = vcombine.low %v1708_v40, %v1712_v41  ;;  %v1729_v43 = vcombine.low %v1722_v52, %v1726_v42  ;;  %v2131_v40 = vadd.f32 %v2130_v47, %v2126_v37 }
 0x3f7   :  { %v4996_v39 = vmul.f32 %v1715_v49, %v4939_v57  ;;  %v4999_v44 = vmul.f32 %v1715_v49, %v4901_v29  ;;  %v5002_v15 = vmul.f32 %v1729_v43, %v4893_v27  ;;  %v5005_v55 = vmul.f32 %v1729_v43, %v4933_v53 }
 0x3f8   :  { %v2132_v41 = vsub.f32 0.0, %v2131_v40 }
 0x3f9   :  { %v1735_v59 = vcombine.high %v4996_v39, %v4996_v39  ;;  %v5011_v31 = vcombine.high %v4999_v44, %v4999_v44  ;;  %v5015_v57 = vcombine.high %v5002_v15, %v5002_v15  ;;  %v5019_v29 = vcombine.high %v5005_v55, %v5005_v55 }
 0x3fa   :  { %v1808_v27 = vsel %vm88_vm0, %v4999_v44, 0.0  ;;  %v1737_v60 = vsel %vm88_vm0, %v4996_v39, 0.0  ;;  %v2052_v8 = vsel %vm88_vm0, %v5002_v15, 0.0  ;;  %v1982_v1 = vsel %vm88_vm0, %v5005_v55, 0.0 }
 0x3fb   :  { %4133 = vmatprep.subr.msk.mxu1 %vm88_vm0, %v1735_v59  ;;  %v1809_v53 = vsel %vm88_vm0, %v5011_v31, 0.0  ;;  %v1738_v63 = vsel %vm88_vm0, %v1735_v59, 0.0  ;;  %v2053_v4 = vsel %vm88_vm0, %v5015_v57, 0.0  ;;  %v1983_v58 = vsel %vm88_vm0, %v5019_v29, 0.0 }
 0x3fc   :  { %v1810_v3 = vadd.f32 %v1809_v53, %v1808_v27  ;;  %v1739_v56 = vadd.f32 %v1738_v63, %v1737_v60  ;;  %v2054_v6 = vadd.f32 %v2053_v4, %v2052_v8  ;;  %v1984_v26 = vadd.f32 %v1983_v58, %v1982_v1 }
 0x3fd   :  { %v1815_v7 = vsel %vm88_vm0, %v5011_v31, -inf  ;;  %v1744_v32 = vsel %vm88_vm0, %v1735_v59, -inf  ;;  %v1814_v14 = vsel %vm88_vm0, %v4999_v44, -inf  ;;  %v1743_v11 = vsel %vm88_vm0, %v4996_v39, -inf }
 0x3fe   :  { %1811 = vadd.xlane.f32.xlu1 %v1810_v3  ;;  %1740 = vadd.xlane.f32.xlu0 %v1739_v56  ;;  %v1816_v62 = vmax.f32 %v1814_v14, %v1815_v7  ;;  %v1745_v17 = vmax.f32 %v1743_v11, %v1744_v32  ;;  %v2059_v12 = vsel %vm88_vm0, %v5015_v57, -inf  ;;  %v1989_v20 = vsel %vm88_vm0, %v5019_v29, -inf }
 0x3ff   :  { %v2058_v13 = vsel %vm88_vm0, %v5002_v15, -inf  ;;  %v1988_v21 = vsel %vm88_vm0, %v5005_v55, -inf  ;;  %v2133_v52 = vmin.f32 %v2132_v41, 80.0 }
 0x400   :  { %v2060_v16 = vmax.f32 %v2058_v13, %v2059_v12  ;;  %v1990_v25 = vmax.f32 %v1988_v21, %v1989_v20  ;;  %v4519_v49 = vpop.eup %4518 }
 0x401   :  { %v2134_v42 = vmul.f32 1.442695, %v2133_v52  ;;  %v1892_v48 = vadd.f32 1.0, %v4519_v49 }
 0x402   :  { %2055 = vadd.xlane.f32.xlu1 %v2054_v6  ;;  %1985 = vadd.xlane.f32.xlu0 %v1984_v26 }
 0x403   :  { %4520 = vpow2.f32 %v2134_v42 }
 0x404   :  { %4522 = vrcp.f32 %v1892_v48 }
 0x406   :  { %1817 = vmax.xlane.f32.xlu1 %v1816_v62  ;;  %1746 = vmax.xlane.f32.xlu0 %v1745_v17 }
 0x40a   :  { %2061 = vmax.xlane.f32.xlu1 %v2060_v16  ;;  %1991 = vmax.xlane.f32.xlu0 %v1990_v25 }
 0x410   :  { %v4521_v4 = vpop.eup %4520 }
 0x411   :  { %v2136_v11 = vadd.f32 1.0, %v4521_v4  ;;  %v4523_v18 = vpop.eup %4522 }
 0x412   :  { %v1901_v40 = vrot.slane %v4523_v18, %v4782_v10 }
 0x413   :  { %4524 = vrcp.f32 %v2136_v11 }
 0x487   :  { %v1812_v50 = vpop.xlane.xlu1 %1811  ;;  %v1741_v43 = vpop.xlane.xlu0 %1740 }
 0x488   :  { %v1813_v35 = vmul.f32 0.00390625, %v1812_v50  ;;  %v1742_v59 = vmul.f32 0.00390625, %v1741_v43 }
 0x48a   :  { %v1819_v27 = vmul.f32 %v1813_v35, %v4763_v22  ;;  %v1749_v53 = vmul.f32 %v4763_v22, %v1742_v59 }
 0x48b   :  { %v2056_v60 = vpop.xlane.xlu1 %2055  ;;  %v1986_v63 = vpop.xlane.xlu0 %1985 }
 0x48c   :  { %v2057_v3 = vmul.f32 0.00390625, %v2056_v60  ;;  %v1987_v56 = vmul.f32 0.00390625, %v1986_v63  ;;  %v1821_v58 = vmul.f32 0.01, %v1819_v27  ;;  %v1751_v8 = vmul.f32 0.01, %v1749_v53 }
 0x48d   :  { %vm1820_vm7 = vcmp.ge.f32.partialorder %v1819_v27, 0.0  ;;  %vm1750_vm8 = vcmp.ge.f32.partialorder %v1749_v53, 0.0 }
 0x48e   :  { %v2063_v1 = vmul.f32 %v2057_v3, %v4763_v22  ;;  %v1993_v6 = vmul.f32 %v1987_v56, %v4763_v22  ;;  %v1822_v13 = vsel %vm1820_vm7, %v1819_v27, %v1821_v58  ;;  %v1752_v21 = vsel %vm1750_vm8, %v1749_v53, %v1751_v8 }
 0x48f   :  { %v1818_v26 = vpop.xlane.xlu1 %1817  ;;  %v1747_v7 = vpop.xlane.xlu0 %1746  ;;  %v5067_v3 = vmul.f32 %v4898_v28, %v1901_v40 }
 0x490   :  { %v1823_v32 = vmul.f32 %v1818_v26, %v4763_v22  ;;  %v1753_v14 = vmul.f32 %v4763_v22, %v1747_v7  ;;  %v2065_v12 = vmul.f32 0.01, %v2063_v1  ;;  %v1995_v20 = vmul.f32 0.01, %v1993_v6 }
 0x491   :  { %vm2064_vm12 = vcmp.ge.f32.partialorder %v2063_v1, 0.0  ;;  %vm1994_vm13 = vcmp.ge.f32.partialorder %v1993_v6, 0.0  ;;  %v1905_v8 = vcombine.high %v5067_v3, %v5067_v3  ;;  %v1907_v26 = vsel %vm88_vm0, %v5067_v3, 0.0 }
 0x492   :  { %vm1824_vm10 = vcmp.ge.f32.partialorder %v1823_v32, 0.0  ;;  %v1825_v62 = vmul.f32 0.01, %v1823_v32  ;;  %vm1754_vm11 = vcmp.ge.f32.partialorder %v1753_v14, 0.0  ;;  %v1755_v17 = vmul.f32 0.01, %v1753_v14 }
 0x493   :  { %v2062_v16 = vpop.xlane.xlu1 %2061  ;;  %v1992_v25 = vpop.xlane.xlu0 %1991  ;;  %v2066_v42 = vsel %vm2064_vm12, %v2063_v1, %v2065_v12  ;;  %v1996_v48 = vsel %vm1994_vm13, %v1993_v6, %v1995_v20  ;;  %v1914_v7 = vsel %vm88_vm0, %v1905_v8, 0.0  ;;  %v1921_v28 = vsel %vm88_vm0, %v5067_v3, -inf }
 0x494   :  { %v1826_v19 = vsel %vm1824_vm10, %v1823_v32, %v1825_v62  ;;  %v1756_v23 = vsel %vm1754_vm11, %v1753_v14, %v1755_v17  ;;  %v2067_v33 = vmul.f32 %v2062_v16, %v4763_v22  ;;  %v1997_v24 = vmul.f32 %v1992_v25, %v4763_v22  ;;  %v4525_v1 = vpop.eup %4524 }
 0x495   :  { %v1827_v30 = vadd.f32 %v1826_v19, %v1822_v13  ;;  %v1757_v37 = vadd.f32 %v1756_v23, %v1752_v21  ;;  %v1928_v32 = vsel %vm88_vm0, %v1905_v8, -inf  ;;  %v2145_v14 = vrot.slane %v4525_v1, %v4782_v10 }
 0x496   :  { %vm2068_vm14 = vcmp.ge.f32.partialorder %v2067_v33, 0.0  ;;  %v2069_v38 = vmul.f32 0.01, %v2067_v33  ;;  %vm1998_vm15 = vcmp.ge.f32.partialorder %v1997_v24, 0.0  ;;  %v1999_v47 = vmul.f32 0.01, %v1997_v24 }
 0x497   :  { %v1828_v41 = vsub.f32 0.0, %v1827_v30  ;;  %v1758_v52 = vsub.f32 0.0, %v1757_v37  ;;  %v1908_v11 = vrot.slane %v1907_v26, 4  ;;  %v1915_v62 = vrot.slane %v1914_v7, 4 }
 0x498   :  { %v2070_v49 = vsel %vm2068_vm14, %v2067_v33, %v2069_v38  ;;  %v2000_v50 = vsel %vm1998_vm15, %v1997_v24, %v1999_v47  ;;  %v1922_v17 = vrot.slane %v1921_v28, 4  ;;  %v1929_v12 = vrot.slane %v1928_v32, 4 }
 0x499   :  { %v1829_v43 = vmin.f32 %v1828_v41, 80.0  ;;  %v1759_v35 = vmin.f32 %v1758_v52, 80.0  ;;  %v2071_v22 = vadd.f32 %v2070_v49, %v2066_v42  ;;  %v2001_v59 = vadd.f32 %v2000_v50, %v1996_v48 }
 0x49a   :  { %v5079_v21 = vmul.f32 %v4890_v0, %v2145_v14  ;;  %v1909_v25 = vadd.f32 %v1908_v11, %v1907_v26  ;;  %v1916_v18 = vadd.f32 %v1915_v62, %v1914_v7  ;;  %v1923_v23 = vmax.f32 %v1921_v28, %v1922_v17 }
 0x49b   :  { %v1830_v27 = vmul.f32 1.442695, %v1829_v43  ;;  %v1760_v53 = vmul.f32 1.442695, %v1759_v35  ;;  %v2072_v60 = vsub.f32 0.0, %v2071_v22  ;;  %v2002_v63 = vsub.f32 0.0, %v2001_v59 }
 0x49c   :  { %v1930_v33 = vmax.f32 %v1928_v32, %v1929_v12  ;;  %v2149_v30 = vcombine.high %v5079_v21, %v5079_v21  ;;  %v1910_v38 = vrot.slane %v1909_v25, 2  ;;  %v1917_v47 = vrot.slane %v1916_v18, 2 }
 0x49d   :  { %4526 = vpow2.f32 %v1830_v27  ;;  %v2073_v56 = vmin.f32 %v2072_v60, 80.0  ;;  %v2003_v58 = vmin.f32 %v2002_v63, 80.0  ;;  %v1924_v40 = vrot.slane %v1923_v23, 2 }
 0x49e   :  { %4528 = vpow2.f32 %v1760_v53  ;;  %v1931_v41 = vrot.slane %v1930_v33, 2  ;;  %v2151_v0 = vsel %vm88_vm0, %v5079_v21, 0.0  ;;  %v2158_v52 = vsel %vm88_vm0, %v2149_v30, 0.0 }
 0x49f   :  { %v2074_v4 = vmul.f32 1.442695, %v2073_v56  ;;  %v2004_v6 = vmul.f32 1.442695, %v2003_v58  ;;  %v1911_v42 = vadd.f32 %v1910_v38, %v1909_v25  ;;  %v1918_v49 = vadd.f32 %v1917_v47, %v1916_v18 }
 0x4a0   :  { %v1925_v50 = vmax.f32 %v1923_v23, %v1924_v40  ;;  %v1932_v43 = vmax.f32 %v1930_v33, %v1931_v41  ;;  %v2152_v35 = vrot.slane %v2151_v0, 4  ;;  %v2159_v22 = vrot.slane %v2158_v52, 4 }
 0x4a1   :  { %4530 = vpow2.f32 %v2074_v4  ;;  %v2165_v59 = vsel %vm88_vm0, %v5079_v21, -inf  ;;  %v1912_v27 = vrot.slane %v1911_v42, 1  ;;  %v1919_v53 = vrot.slane %v1918_v49, 1 }
 0x4a2   :  { %4532 = vpow2.f32 %v2004_v6  ;;  %v1926_v63 = vrot.slane %v1925_v50, 1  ;;  %v1933_v56 = vrot.slane %v1932_v43, 1  ;;  %v5088_v58 = vadd.f32 %v2152_v35, %v2151_v0 }
 0x4a3   :  { %v5090_v8 = vadd.f32 %v2159_v22, %v2158_v52  ;;  %v2166_v1 = vrot.slane %v2165_v59, 4  ;;  %v5093_v6 = vsel %vm88_vm0, %v2149_v30, -inf  ;;  %v5096_v28 = vadd.f32 %v1912_v27, %v1911_v42 }
 0x4a4   :  { %v5098_v32 = vadd.f32 %v1919_v53, %v1918_v49  ;;  %v5101_v11 = vmax.f32 %v1925_v50, %v1926_v63  ;;  %v5103_v62 = vmax.f32 %v1932_v43, %v1933_v56 }
 0x4a5   :  { %v5111_v25 = vmax.f32 %v2165_v59, %v2166_v1 }
 0x4aa   :  { %v4527_v20 = vpop.eup %4526 }
 0x4ab   :  { %v4529_v13 = vpop.eup %4528  ;;  %v1832_v16 = vadd.f32 1.0, %v4527_v20 }
 0x4ac   :  { %v1762_v19 = vadd.f32 1.0, %v4529_v13 }
 0x4ad   :  { %4534 = vrcp.f32 %v1832_v16 }
 0x4ae   :  { %v4531_v24 = vpop.eup %4530  ;;  %4536 = vrcp.f32 %v1762_v19 }
 0x4af   :  { %v2076_v37 = vadd.f32 1.0, %v4531_v24  ;;  %v4533_v48 = vpop.eup %4532 }
 0x4b0   :  { %v2006_v60 = vadd.f32 1.0, %v4533_v48 }
 0x4b1   :  { %4538 = vrcp.f32 %v2076_v37 }
 0x4b2   :  { %4540 = vrcp.f32 %v2006_v60 }
 0x4ba   :  { %v4535_v4 = vpop.eup %4534 }
 0x4bb   :  { %v4537_v26 = vpop.eup %4536  ;;  %v1841_v7 = vrot.slane %v4535_v4, %v4782_v10 }
 0x4bc   :  { %v1771_v14 = vrot.slane %v4537_v26, %v4782_v10 }
 0x4bd   :  { %v5107_v12 = vmul.f32 %v1841_v7, %v4999_v44 }
 0x4be   :  { %v4539_v20 = vpop.eup %4538  ;;  %v5114_v18 = vmul.f32 %v1771_v14, %v4996_v39 }
 0x4bf   :  { %v1845_v19 = vcombine.high %v5107_v12, %v5107_v12  ;;  %v1847_v23 = vsel %vm88_vm0, %v5107_v12, 0.0  ;;  %v1861_v33 = vsel %vm88_vm0, %v5107_v12, -inf  ;;  %v2085_v24 = vrot.slane %v4539_v20, %v4782_v10  ;;  %v4541_v13 = vpop.eup %4540 }
 0x4c0   :  { %v1848_v30 = vrot.slane %v1847_v23, 4  ;;  %v1862_v37 = vrot.slane %v1861_v33, 4  ;;  %v1775_v38 = vcombine.high %v5114_v18, %v5114_v18  ;;  %v1777_v47 = vsel %vm88_vm0, %v5114_v18, 0.0 }
 0x4c1   :  { %v1854_v40 = vsel %vm88_vm0, %v1845_v19, 0.0  ;;  %v1868_v41 = vsel %vm88_vm0, %v1845_v19, -inf  ;;  %v1778_v0 = vrot.slane %v1777_v47, 4  ;;  %v1791_v52 = vsel %vm88_vm0, %v5114_v18, -inf }
 0x4c2   :  { %v1849_v42 = vadd.f32 %v1848_v30, %v1847_v23  ;;  %v1855_v49 = vrot.slane %v1854_v40, 4  ;;  %v1863_v48 = vmax.f32 %v1861_v33, %v1862_v37  ;;  %v1869_v50 = vrot.slane %v1868_v41, 4 }
 0x4c3   :  { %v1779_v43 = vadd.f32 %v1778_v0, %v1777_v47  ;;  %v1784_v35 = vsel %vm88_vm0, %v1775_v38, 0.0  ;;  %v1792_v22 = vrot.slane %v1791_v52, 4  ;;  %v1798_v59 = vsel %vm88_vm0, %v1775_v38, -inf }
 0x4c4   :  { %v1850_v27 = vrot.slane %v1849_v42, 2  ;;  %v1856_v53 = vadd.f32 %v1855_v49, %v1854_v40  ;;  %v1864_v60 = vrot.slane %v1863_v48, 2  ;;  %v1870_v63 = vmax.f32 %v1868_v41, %v1869_v50 }
 0x4c5   :  { %v1780_v56 = vrot.slane %v1779_v43, 2  ;;  %v1785_v4 = vrot.slane %v1784_v35, 4  ;;  %v1793_v1 = vmax.f32 %v1791_v52, %v1792_v22  ;;  %v1799_v26 = vrot.slane %v1798_v59, 4 }
 0x4c6   :  { %v1851_v7 = vadd.f32 %v1850_v27, %v1849_v42  ;;  %v1857_v14 = vrot.slane %v1856_v53, 2  ;;  %v1865_v20 = vmax.f32 %v1863_v48, %v1864_v60  ;;  %v1871_v19 = vrot.slane %v1870_v63, 2 }
 0x4c7   :  { %v1781_v23 = vadd.f32 %v1780_v56, %v1779_v43  ;;  %v1786_v33 = vadd.f32 %v1785_v4, %v1784_v35  ;;  %v1794_v30 = vrot.slane %v1793_v1, 2  ;;  %v1800_v37 = vmax.f32 %v1798_v59, %v1799_v26 }
 0x4c8   :  { %v1852_v47 = vrot.slane %v1851_v7, 1  ;;  %v1858_v0 = vadd.f32 %v1857_v14, %v1856_v53  ;;  %v1866_v16 = vrot.slane %v1865_v20, 1  ;;  %v1872_v38 = vmax.f32 %v1870_v63, %v1871_v19 }
 0x4c9   :  { %v1782_v40 = vrot.slane %v1781_v23, 1  ;;  %v1787_v49 = vrot.slane %v1786_v33, 2  ;;  %v1795_v41 = vmax.f32 %v1793_v1, %v1794_v30  ;;  %v1801_v50 = vrot.slane %v1800_v37, 2 }
 0x4ca   :  { %v1853_v17 = vadd.f32 %v1852_v47, %v1851_v7  ;;  %v1859_v52 = vrot.slane %v1858_v0, 1  ;;  %v1867_v22 = vmax.f32 %v1865_v20, %v1866_v16  ;;  %v1873_v42 = vrot.slane %v1872_v38, 1 }
 0x4cb   :  { %v1783_v27 = vadd.f32 %v1782_v40, %v1781_v23  ;;  %v1788_v48 = vadd.f32 %v1787_v49, %v1786_v33  ;;  %v1796_v60 = vrot.slane %v1795_v41, 1  ;;  %v1802_v43 = vmax.f32 %v1800_v37, %v1801_v50 }
 0x4cc   :  { %v1860_v35 = vadd.f32 %v1859_v52, %v1858_v0  ;;  %v1874_v56 = vmax.f32 %v1872_v38, %v1873_v42  ;;  %v5134_v59 = vmul.f32 %v2085_v24, %v5002_v15  ;;  %v2015_v53 = vrot.slane %v4541_v13, %v4782_v10 }
 0x4cd   :  { %v1789_v63 = vrot.slane %v1788_v48, 1  ;;  %v1797_v4 = vmax.f32 %v1795_v41, %v1796_v60  ;;  %v1803_v26 = vrot.slane %v1802_v43, 1  ;;  %v1875_v1 = vadd.f32 %v1853_v17, %v1783_v27 }
 0x4ce   :  { %v2089_v7 = vcombine.high %v5134_v59, %v5134_v59  ;;  %v2091_v16 = vsel %vm88_vm0, %v5134_v59, 0.0  ;;  %v2105_v14 = vsel %vm88_vm0, %v5134_v59, -inf  ;;  %v5144_v20 = vmul.f32 %v2015_v53, %v5005_v55 }
 0x4cf   :  { %v1790_v24 = vadd.f32 %v1789_v63, %v1788_v48  ;;  %v1804_v19 = vmax.f32 %v1802_v43, %v1803_v26  ;;  %v1877_v23 = vmax.f32 %v1797_v4, %v1867_v22  ;;  %v1935_v10 = vadd.f32 %v5096_v28, %v1875_v1 }
 0x4d0   :  { %v2092_v13 = vrot.slane %v2091_v16, 4  ;;  %v2098_v17 = vsel %vm88_vm0, %v2089_v7, 0.0  ;;  %v2106_v33 = vrot.slane %v2105_v14, 4  ;;  %v2112_v30 = vsel %vm88_vm0, %v2089_v7, -inf }
 0x4d1   :  { %v5326_v37 = vrot.slane %v5093_v6, 4  ;;  %v1876_v0 = vadd.f32 %v1860_v35, %v1790_v24  ;;  %v1878_v38 = vmax.f32 %v1804_v19, %v1874_v56  ;;  %v1937_v40 = vmax.f32 %v1877_v23, %v5101_v11 }
 0x4d2   :  { %v1939_v49 = vmul.f32 0.083333336, %v1935_v10  ;;  %v2093_v41 = vadd.f32 %v2092_v13, %v2091_v16  ;;  %v2099_v50 = vrot.slane %v2098_v17, 4  ;;  %v2113_v52 = vrot.slane %v2112_v30, 4 }
 0x4d3   :  { %v2174_v47 = vmax.f32 %v5093_v6, %v5326_v37  ;;  %v1936_v28 = vadd.f32 %v5098_v32, %v1876_v0  ;;  %v1938_v22 = vmax.f32 %v1878_v38, %v5103_v62  ;;  %v2019_v42 = vcombine.high %v5144_v20, %v5144_v20 }
 0x4d4   :  { %v2021_v27 = vsel %vm88_vm0, %v5144_v20, 0.0  ;;  %v2094_v48 = vrot.slane %v2093_v41, 2  ;;  %v2100_v6 = vadd.f32 %v2099_v50, %v2098_v17  ;;  %v2107_v60 = vmax.f32 %v2105_v14, %v2106_v33 }
 0x4d5   :  { %v2114_v43 = vmax.f32 %v2112_v30, %v2113_v52  ;;  %v1940_v35 = vmul.f32 0.083333336, %v1936_v28  ;;  %v1962_v11 = vcombine.low %v1937_v40, %v1938_v22  ;;  %v2022_v56 = vrot.slane %v2021_v27, 4 }
 0x4d6   :  { %v2028_v53 = vsel %vm88_vm0, %v2019_v42, 0.0  ;;  %v5327_v32 = vrot.slane %v5088_v58, 2  ;;  %v2168_v62 = vrot.slane %v5111_v25, 2  ;;  %v2095_v4 = vadd.f32 %v2094_v48, %v2093_v41 }
 0x4d7   :  { %v2101_v26 = vrot.slane %v2100_v6, 2  ;;  %v1943_v1 = vcombine.low %v1939_v49, %v1940_v35  ;;  %v1969_v7 = vrot.slane %v1962_v11, %v4797_v51  ;;  %v2023_v16 = vadd.f32 %v2022_v56, %v2021_v27 }
 0x4d8   :  { %v2155_v63 = vadd.f32 %v5327_v32, %v5088_v58  ;;  %v2029_v24 = vrot.slane %v2028_v53, 4  ;;  %v2096_v14 = vrot.slane %v2095_v4, 1  ;;  %v2108_v23 = vrot.slane %v2107_v60, 2 }
 0x4d9   :  { %v2102_v19 = vadd.f32 %v2101_v26, %v2100_v6  ;;  %v2115_v10 = vrot.slane %v2114_v43, 2  ;;  %v1950_v13 = vrot.slane %v1943_v1, %v4797_v51  ;;  %v1976_v17 = vrot.slane %v1969_v7, %v4797_v51 }
 0x4da   :  { %v2024_v33 = vrot.slane %v2023_v16, 2  ;;  %v2030_v30 = vadd.f32 %v2029_v24, %v2028_v53  ;;  %v2156_v58 = vrot.slane %v2155_v63, 1  ;;  %v5328_v37 = vrot.slane %v5090_v8, 2 }
 0x4db   :  { %v2175_v38 = vrot.slane %v2174_v47, 2  ;;  %v2103_v40 = vrot.slane %v2102_v19, 1  ;;  %v1957_v49 = vrot.slane %v1950_v13, %v4797_v51  ;;  %1978 = vst.msk [vmem:[#allocation2 + $0x4] ss:$2 sm:$0x3] %vm4801_vm9, %v1976_v17  ;;  %v2035_v52 = vsel %vm88_vm0, %v5144_v20, -inf }
 0x4dc   :  { %v2162_v0 = vadd.f32 %v5328_v37, %v5090_v8  ;;  %v2025_v41 = vadd.f32 %v2024_v33, %v2023_v16  ;;  %v2031_v50 = vrot.slane %v2030_v30, 2  ;;  %v2109_v28 = vmax.f32 %v2107_v60, %v2108_v23 }
 0x4dd   :  { %v2116_v22 = vmax.f32 %v2114_v43, %v2115_v10  ;;  %v2036_v27 = vrot.slane %v2035_v52, 4  ;;  %v2042_v48 = vsel %vm88_vm0, %v2019_v42, -inf  ;;  %1959 = vst.msk [vmem:[#allocation2] ss:$2 sm:$0x3] %vm4801_vm9, %v1957_v49  ;;  %v2097_v8 = vadd.f32 %v2096_v14, %v2095_v4 }
 0x4de   :  { %v2026_v6 = vrot.slane %v2025_v41, 1  ;;  %v2032_v35 = vadd.f32 %v2031_v50, %v2030_v30  ;;  %v2043_v11 = vrot.slane %v2042_v48, 4  ;;  %v2163_v56 = vrot.slane %v2162_v0, 1 }
 0x4df   :  { %v2169_v53 = vmax.f32 %v5111_v25, %v2168_v62  ;;  %v2037_v32 = vmax.f32 %v2035_v52, %v2036_v27  ;;  %v2104_v26 = vadd.f32 %v2103_v40, %v2102_v19  ;;  %v2157_v60 = vadd.f32 %v2156_v58, %v2155_v63 }
 0x4e0   :  { %v2027_v1 = vadd.f32 %v2026_v6, %v2025_v41  ;;  %v2033_v7 = vrot.slane %v2032_v35, 1  ;;  %v2044_v16 = vmax.f32 %v2042_v48, %v2043_v11  ;;  %v2176_v43 = vmax.f32 %v2174_v47, %v2175_v38 }
 0x4e1   :  { %v2110_v24 = vrot.slane %v2109_v28, 1  ;;  %v2038_v23 = vrot.slane %v2037_v32, 2  ;;  %v2117_v42 = vrot.slane %v2116_v22, 1  ;;  %v2164_v14 = vadd.f32 %v2163_v56, %v2162_v0 }
 0x4e2   :  { %v2034_v10 = vadd.f32 %v2033_v7, %v2032_v35  ;;  %v2045_v13 = vrot.slane %v2044_v16, 2  ;;  %v2119_v17 = vadd.f32 %v2097_v8, %v2027_v1  ;;  %v2170_v49 = vrot.slane %v2169_v53, 1 }
 0x4e3   :  { %v2039_v4 = vmax.f32 %v2037_v32, %v2038_v23  ;;  %v2111_v25 = vmax.f32 %v2109_v28, %v2110_v24  ;;  %v2177_v19 = vrot.slane %v2176_v43, 1  ;;  %v2118_v40 = vmax.f32 %v2116_v22, %v2117_v42 }
 0x4e4   :  { %v2046_v33 = vmax.f32 %v2044_v16, %v2045_v13  ;;  %v2120_v30 = vadd.f32 %v2104_v26, %v2034_v10  ;;  %v2179_v37 = vadd.f32 %v2157_v60, %v2119_v17  ;;  %v2171_v27 = vmax.f32 %v2169_v53, %v2170_v49 }
 0x4e5   :  { %v2040_v62 = vrot.slane %v2039_v4, 1  ;;  %v2178_v48 = vmax.f32 %v2176_v43, %v2177_v19 }
 0x4e6   :  { %v2047_v41 = vrot.slane %v2046_v33, 1  ;;  %v2180_v50 = vadd.f32 %v2164_v14, %v2120_v30  ;;  %v2183_v58 = vmul.f32 0.083333336, %v2179_v37 }
 0x4e7   :  { %v2041_v63 = vmax.f32 %v2039_v4, %v2040_v62 }
 0x4e8   :  { %v2048_v47 = vmax.f32 %v2046_v33, %v2047_v41  ;;  %v2184_v38 = vmul.f32 0.083333336, %v2180_v50 }
 0x4e9   :  { %v2121_v52 = vmax.f32 %v2041_v63, %v2111_v25 }
 0x4ea   :  { %v2122_v8 = vmax.f32 %v2048_v47, %v2118_v40  ;;  %v2187_v6 = vcombine.low %v2183_v58, %v2184_v38 }
 0x4eb   :  { %v2181_v0 = vmax.f32 %v2121_v52, %v2171_v27 }
 0x4ec   :  { %v2182_v35 = vmax.f32 %v2122_v8, %v2178_v48  ;;  %v2194_v11 = vrot.slane %v2187_v6, %v4797_v51 }
 0x4ee   :  { %v2201_v28 = vrot.slane %v2194_v11, %v4797_v51  ;;  %v2206_v56 = vcombine.low %v2181_v0, %v2182_v35 }
 0x4f0   :  { %v2213_v22 = vrot.slane %v2206_v56, %v4797_v51  ;;  %2203 = vst.msk [vmem:[#allocation2 + $0x1] ss:$2 sm:$0x3] %vm4801_vm9, %v2201_v28 }
 0x4f2   :  { %v2220_v32 = vrot.slane %v2213_v22, %v4797_v51  ;;  %v4663_v51 = vmov 0.0  }
 0x4f4   :  { %2222 = vst.msk [vmem:[#allocation2 + $0x5] ss:$2 sm:$0x3] %vm4801_vm9, %v2220_v32  ;;  %vm2778_vm9 = vcmask 31744  }
 0x4fb   :  { %v2223_v53 = vld [vmem:[#allocation2] sm:$0xff] }
 0x4fc   :  { %v2232_v26 = vrot.slane %v2223_v53, %v4832_v54  ;;  %v2225_v1 = vcombine.high %v2223_v53, %v2223_v53 }
 0x4fe   :  { %v2240_v7 = vcombine.high %v2232_v26, %v2232_v26  ;;  %v2239_v16 = vrot.slane %v2225_v1, %v4832_v54  ;;  %v2246_v24 = vpack.c.bf16 %v2232_v26, %v2232_v26  ;;  %v5210_v54 = vld [vmem:[%s5318_s5 + $0x4] sm:$0xf] }
 0x500   :  { %v2247_v60 = vpack.c.bf16 %v2240_v7, %v2240_v7  ;;  %v2241_v43 = vcombine.high %v2239_v16, %v2239_v16  ;;  %v2248_v42 = vpack.c.bf16 %v2239_v16, %v2239_v16  ;;  %v4126_v16 = vld [vmem:[%s5318_s5 + $0xc] sm:$0xf] }
 0x502   :  { %2666 = vmatprep.mubr.bf16.mxu0 %v2247_v60  ;;  %v2249_v23 = vpack.c.bf16 %v2241_v43, %v2241_v43  ;;  %v4129_v43 = vld [vmem:[%s5318_s5 + $0x18] sm:$0xf] }
 0x503   :  { %2667 = vmatmul.mubr.bf16.vlgmr.msra.gmra.mxu0 %v2246_v24 }
 0x504   :  { %4131 = vmatpush1.msk.msra.mxu0 %vm88_vm0, %v4850_v46  ;;  %2707 = vmatprep.mubr.bf16.mxu1 %v2249_v23  ;;  %v5215_v46 = vld [vmem:[%s5318_s5 + $0x8] sm:$0xf] }
 0x505   :  { %4136 = vmatprep.subr.msk.mxu0 %vm88_vm0, %v5011_v31  ;;  %2708 = vmatmul.mubr.bf16.vlgmr.msra.gmra.mxu1 %v2248_v42 }
 0x506   :  { %4134 = vmatpush1.msk.msra.mxu1 %vm88_vm0, %v4996_v39  ;;  %2850 = vmatprep.mubr.f32.mxu0 %v4663_v51  ;;  %v2777_v39 = vld [vmem:[%s5319_s6] sm:$0xf] }
 0x507   :  { %2935 = vmatprep.mubr.f32.mxu1 %v4663_v51 }
 0x50b   :  { %4132 = vmatmul.mubr.msk.f32.vlgmr.msra.gmra.mxu0 %vm2778_vm9, %v5200_v61 }
 0x50c   :  { %4137 = vmatpush1.msk.msra.mxu0 %vm88_vm0, %v4999_v44  ;;  %3015 = vmatprep.mubr.f32.mxu0 %v4663_v51  ;;  %v4664_v44 = vmov 0  }
 0x50d   :  { %4135 = vmatmul.mubr.msk.f32.vlgmr.msra.gmra.mxu1 %vm2778_vm9, %v5210_v54  ;;  %4184 = vset.pattern.permute.xlu0 %v4664_v44 }
 0x50e   :  { %3097 = vmatprep.mubr.f32.mxu1 %v4663_v51  ;;  %2859 = vperm.xlu0 %4184, %v2777_v39  }
 0x50f   :  { %4138 = vmatmul.mubr.msk.f32.vlgmr.msra.gmra.mxu0 %vm2778_vm9, %v5215_v46 }
 0x510   :  { %3179 = vmatprep.mubr.f32.mxu0 %v4663_v51 }
 0x5c3   :  { %v2668_v31 = vpop.f32.mrf.mxu0 }
 0x5c5   :  { %v2670_v10 = vpop.f32.mrf.mxu0  ;;  %v2709_v13 = vpop.f32.mrf.mxu1 }
 0x5c6   :  { %v2710_v17 = vadd.f32 %v2709_v13, %v2668_v31 }
 0x5c7   :  { %v2672_v4 = vpop.f32.mrf.mxu0  ;;  %v2711_v14 = vpop.f32.mrf.mxu1 }
 0x5c8   :  { %vm2716_vm1 = vcmp.ge.f32.partialorder %v2710_v17, 0.0  ;;  %v2718_v33 = vmul.f32 0.01, %v2710_v17  ;;  %v2712_v30 = vadd.f32 %v2711_v14, %v2670_v10 }
 0x5c9   :  { %v2673_v37 = vpop.f32.mrf.mxu0  ;;  %v2713_v49 = vpop.f32.mrf.mxu1 }
 0x5ca   :  { %v2720_v25 = vsel %vm2716_vm1, %v2710_v17, %v2718_v33  ;;  %vm2717_vm2 = vcmp.ge.f32.partialorder %v2712_v30, 0.0  ;;  %v2719_v62 = vmul.f32 0.01, %v2712_v30 }
 0x5cb   :  { %v2722_v19 = vsub.f32 0.0, %v2720_v25  ;;  %v2714_v40 = vpop.f32.mrf.mxu1 }
 0x5cc   :  { %v2721_v41 = vsel %vm2717_vm2, %v2712_v30, %v2719_v62 }
 0x5cd   :  { %v2724_v50 = vmin.f32 %v2722_v19, 80.0  ;;  %v2723_v63 = vsub.f32 0.0, %v2721_v41 }
 0x5cf   :  { %v2726_v47 = vmul.f32 1.442695, %v2724_v50  ;;  %v2725_v58 = vmin.f32 %v2723_v63, 80.0 }
 0x5d1   :  { %4542 = vpow2.f32 %v2726_v47  ;;  %v2728_v38 = vmul.f32 1.442695, %v2725_v58 }
 0x5d3   :  { %4544 = vpow2.f32 %v2728_v38 }
 0x5de   :  { %v4543_v52 = vpop.eup %4542 }
 0x5df   :  { %v2730_v27 = vadd.f32 1.0, %v4543_v52 }
 0x5e0   :  { %v4545_v48 = vpop.eup %4544 }
 0x5e1   :  { %4546 = vrcp.f32 %v2730_v27  ;;  %v2731_v8 = vadd.f32 1.0, %v4545_v48 }
 0x5e3   :  { %4548 = vrcp.f32 %v2731_v8 }
 0x5ee   :  { %v4547_v6 = vpop.eup %4546 }
 0x5ef   :  { %v2737_v35 = vrot.slane %v4547_v6, %v4840_v36  ;;  %v2752_v26 = vrot.slane %v4547_v6, %v4837_v34 }
 0x5f0   :  { %v4549_v0 = vpop.eup %4548 }
 0x5f1   :  { %v2741_v11 = vrot.slane %v4549_v0, %v4840_v36  ;;  %v2756_v56 = vrot.slane %v4549_v0, %v4837_v34  ;;  %v4127_v36 = vld [vmem:[%s5318_s5 + $0x10] sm:$0xf] }
 0x5f3   :  { %v2744_v28 = vcombine.low %v2737_v35, %v2741_v11  ;;  %v2759_v60 = vcombine.low %v2752_v26, %v2756_v56 }
 0x5f5   :  { %v2746_v22 = vmul.f32 %v2744_v28, %v5114_v18  ;;  %v2747_v32 = vmul.f32 %v2744_v28, %v5107_v12  ;;  %v2748_v53 = vmul.f32 %v2744_v28, %v5067_v3  ;;  %v2761_v3 = vmul.f32 %v2759_v60, %v5144_v20  ;;  %v4552_v12 = vld [vmem:[%s5313_s0] sm:$0xff]  ;;  %v4128_v18 = vld [vmem:[%s5318_s5 + $0x14] sm:$0xf] }
 0x5f6   :  { %v2762_v20 = vmul.f32 %v2759_v60, %v5134_v59  ;;  %v2763_v24 = vmul.f32 %v2759_v60, %v5079_v21  ;;  %v2937_v59 = vpop.f32.mrf.mxu1 }
 0x5f7   :  { %v3025_v1 = vcombine.high %v2746_v22, %v2746_v22  ;;  %v3107_v7 = vcombine.high %v2747_v32, %v2747_v32  ;;  %v3189_v34 = vcombine.high %v2748_v53, %v2748_v53 }
 0x5f9   :  { %4139 = vmatprep.subr.msk.mxu1 %vm88_vm0, %v3025_v1  ;;  %4142 = vmatprep.subr.msk.mxu0 %vm88_vm0, %v3107_v7 }
 0x5fa   :  { %4140 = vmatpush1.msk.msra.mxu1 %vm88_vm0, %v2746_v22  ;;  %4143 = vmatpush1.msk.msra.mxu0 %vm88_vm0, %v2747_v32 }
 0x5fb   :  { %4141 = vmatmul.mubr.msk.f32.vlgmr.msra.gmra.mxu1 %vm2778_vm9, %v4126_v16  ;;  %4144 = vmatmul.mubr.msk.f32.vlgmr.msra.gmra.mxu0 %vm2778_vm9, %v4127_v36 }
 0x5fc   :  { %4145 = vmatprep.subr.msk.mxu1 %vm88_vm0, %v3189_v34  ;;  %4148 = vmatprep.subr.msk.mxu0 %vm88_vm0, %v4739_v2  ;;  %v3589_v2 = vcombine.high %v2761_v3, %v2761_v3 }
 0x5fd   :  { %4146 = vmatpush1.msk.msra.mxu1 %vm88_vm0, %v2748_v53  ;;  %4149 = vmatpush1.msk.msra.mxu0 %vm88_vm0, %v4552_v12 }
 0x5fe   :  { %4151 = vmatprep.subr.msk.mxu1 %vm88_vm0, %v4854_v9  ;;  %4154 = vmatprep.subr.msk.mxu0 %vm88_vm0, %v5019_v29  ;;  %v3668_v9 = vcombine.high %v2762_v20, %v2762_v20 }
 0x5ff   :  { %3261 = vmatprep.mubr.f32.mxu1 %v4663_v51  ;;  %3341 = vmatprep.mubr.f32.mxu0 %v4663_v51 }
 0x600   :  { %4147 = vmatmul.mubr.msk.f32.vlgmr.msra.gmra.mxu1 %vm2778_vm9, %v4128_v18  ;;  %4150 = vmatmul.mubr.msk.f32.vlgmr.msra.gmra.mxu0 %vm2778_vm9, %v4129_v43 }
 0x601   :  { %4152 = vmatpush1.msk.msra.mxu1 %vm88_vm0, %v4847_v45  ;;  %4155 = vmatpush1.msk.msra.mxu0 %vm88_vm0, %v5005_v55  ;;  %v3747_v45 = vcombine.high %v2763_v24, %v2763_v24  ;;  %v2852_v55 = vpop.f32.mrf.mxu0 }
 0x602   :  { %4157 = vmatprep.subr.msk.mxu1 %vm88_vm0, %v5015_v57  ;;  %4160 = vmatprep.subr.msk.mxu0 %vm88_vm0, %v3589_v2  ;;  %v2860_v57 = vpop.permute.xlu0 %2859 }
 0x603   :  { %3425 = vmatprep.mubr.f32.mxu1 %v4663_v51  ;;  %3502 = vmatprep.mubr.f32.mxu0 %v4663_v51  ;;  %v2854_v29 = vpop.f32.mrf.mxu0  ;;  %v2862_v21 = vadd.f32 %v2860_v57, %v2852_v55 }
 0x604   :  { %4153 = vmatmul.mubr.msk.f32.vlgmr.msra.gmra.mxu1 %vm2778_vm9, %v5200_v61  ;;  %4156 = vmatmul.mubr.msk.f32.vlgmr.msra.gmra.mxu0 %vm2778_vm9, %v5210_v54  ;;  %v2863_v23 = vadd.f32 %v2860_v57, %v2854_v29  ;;  %v2939_v61 = vpop.f32.mrf.mxu1 }
 0x605   :  { %4158 = vmatpush1.msk.msra.mxu1 %vm88_vm0, %v5002_v15  ;;  %4161 = vmatpush1.msk.msra.mxu0 %vm88_vm0, %v2761_v3  ;;  %v4553_v15 = vld [vmem:[%s5313_s0 + $0x8] sm:$0xff]  ;;  %v2942_v42 = vadd.f32 %v2937_v59, %v2862_v21  ;;  %s4665_s0 = smov [#allocation11]  }
 0x606   :  { %4163 = vmatprep.subr.msk.mxu1 %vm88_vm0, %v3668_v9  ;;  %4166 = vmatprep.subr.msk.mxu0 %vm88_vm0, %v3747_v45  ;;  %s3915_s4 = sshll.u32 %s4665_s0, 4  ;;  %s3916_s4 = int_to_ptr.vmem [resolvable:$true] %s3915_s4 }
 0x607   :  { %3579 = vmatprep.mubr.f32.mxu1 %v4663_v51  ;;  %3658 = vmatprep.mubr.f32.mxu0 %v4663_v51  ;;  %s4626_s24 = scalar_lea.vmem %s3916_s4, 256  ;;  %p4631_p7 = scmp.lt.s32.totalorder %s3916_s4, %s3916_s4 }
 0x608   :  { %4159 = vmatmul.mubr.msk.f32.vlgmr.msra.gmra.mxu1 %vm2778_vm9, %v5215_v46  ;;  %4162 = vmatmul.mubr.msk.f32.vlgmr.msra.gmra.mxu0 %vm2778_vm9, %v4126_v16  ;;  %v2943_v46 = vadd.f32 %v2939_v61, %v2863_v23  ;;  %p4627_p6 = scmp.ne.s32.totalorder %s3916_s4, %s4626_s24  ;;  %p4632_p8 = scmp.lt.s32.totalorder %s4626_s24, %s4626_s24 }
 0x609   :  { %4164 = vmatpush1.msk.msra.mxu1 %vm88_vm0, %v2762_v20  ;;  %4167 = vmatpush1.msk.msra.mxu0 %vm88_vm0, %v2763_v24 }
 0x60a   :  { %3737 = vmatprep.mubr.f32.mxu1 %v4663_v51  ;;  %3816 = vmatprep.mubr.f32.mxu0 %v4663_v51  ;;  %p4633_p9 = por %p4632_p8, %p4631_p7 }
 0x60b   :  { %4169 = vmatprep.subr.msk.mxu1 %vm88_vm0, %v4747_v5  ;;  %v3017_v5 = vpop.f32.mrf.mxu0 }
 0x60c   :  { %4165 = vmatmul.mubr.msk.f32.vlgmr.msra.gmra.mxu1 %vm2778_vm9, %v4127_v36  ;;  %4168 = vmatmul.mubr.msk.f32.vlgmr.msra.gmra.mxu0 %vm2778_vm9, %v4128_v18  ;;  %v3022_v39 = vadd.f32 %v3017_v5, %v2942_v42  ;;  %p4634_p10 = pnand %p4633_p9, %p4627_p6 }
 0x60d   :  { %4170 = vmatpush1.msk.msra.mxu1 %vm88_vm0, %v4553_v15  ;;  %3893 = vmatprep.mubr.f32.mxu1 %v4663_v51  ;;  %v3019_v54 = vpop.f32.mrf.mxu0 }
 0x60e   :  { %v3023_v10 = vadd.f32 %v3019_v54, %v2943_v46 }
 0x610   :  { %4171 = vmatmul.mubr.msk.f32.vlgmr.msra.gmra.mxu1 %vm2778_vm9, %v4129_v43 }
 0x6bb   :  { %v3099_v44 = vpop.f32.mrf.mxu1  ;;  %v3181_v31 = vpop.f32.mrf.mxu0 }
 0x6bc   :  { %v3104_v13 = vadd.f32 %v3099_v44, %v3022_v39 }
 0x6bd   :  { %v3101_v17 = vpop.f32.mrf.mxu1  ;;  %v3183_v51 = vpop.f32.mrf.mxu0 }
 0x6be   :  { %v3105_v4 = vadd.f32 %v3101_v17, %v3023_v10  ;;  %v3186_v14 = vadd.f32 %v3181_v31, %v3104_v13 }
 0x6c0   :  { %v3187_v33 = vadd.f32 %v3183_v51, %v3105_v4  ;;  %v3263_v30 = vpop.f32.mrf.mxu1  ;;  %v3343_v37 = vpop.f32.mrf.mxu0 }
 0x6c1   :  { %v3268_v49 = vadd.f32 %v3263_v30, %v3186_v14 }
 0x6c2   :  { %v3265_v25 = vpop.f32.mrf.mxu1  ;;  %v3345_v62 = vpop.f32.mrf.mxu0 }
 0x6c3   :  { %v3269_v19 = vadd.f32 %v3265_v25, %v3187_v33  ;;  %v3348_v40 = vadd.f32 %v3343_v37, %v3268_v49 }
 0x6c4   :  { %v3427_v41 = vpop.f32.mrf.mxu1  ;;  %v3504_v50 = vpop.f32.mrf.mxu0 }
 0x6c5   :  { %v3349_v63 = vadd.f32 %v3345_v62, %v3269_v19  ;;  %v3432_v47 = vadd.f32 %v3427_v41, %v2860_v57  ;;  %v3350_v52 = vmax.f32 %v3348_v40, 0.0 }
 0x6c6   :  { %v3429_v58 = vpop.f32.mrf.mxu1  ;;  %v3506_v38 = vpop.f32.mrf.mxu0 }
 0x6c7   :  { %v3351_v27 = vmax.f32 %v3349_v63, 0.0  ;;  %v3433_v48 = vadd.f32 %v3429_v58, %v2860_v57  ;;  %v3509_v8 = vadd.f32 %v3504_v50, %v3432_v47 }
 0x6c8   :  { %v3581_v6 = vpop.f32.mrf.mxu1  ;;  %v3660_v0 = vpop.f32.mrf.mxu0 }
 0x6c9   :  { %v3510_v35 = vadd.f32 %v3506_v38, %v3433_v48  ;;  %v3586_v11 = vadd.f32 %v3581_v6, %v3509_v8  ;;  %v3354_v28 = vcombine.low %v3350_v52, %v3351_v27 }
 0x6ca   :  { %v3583_v56 = vpop.f32.mrf.mxu1  ;;  %v3662_v22 = vpop.f32.mrf.mxu0 }
 0x6cb   :  { %v3587_v32 = vadd.f32 %v3583_v56, %v3510_v35  ;;  %v3665_v53 = vadd.f32 %v3660_v0, %v3586_v11  ;;  %3356 = vst [vmem:[#allocation11] sm:$0xff] %v3354_v28 }
 0x6cc   :  { %v3739_v26 = vpop.f32.mrf.mxu1  ;;  %v3818_v1 = vpop.f32.mrf.mxu0 }
 0x6cd   :  { %v3666_v7 = vadd.f32 %v3662_v22, %v3587_v32  ;;  %v3744_v16 = vadd.f32 %v3739_v26, %v3665_v53 }
 0x6ce   :  { %v3741_v36 = vpop.f32.mrf.mxu1  ;;  %v3820_v3 = vpop.f32.mrf.mxu0 }
 0x6cf   :  { %v3745_v60 = vadd.f32 %v3741_v36, %v3666_v7  ;;  %v3823_v34 = vadd.f32 %v3818_v1, %v3744_v16 }
 0x6d0   :  { %v3895_v12 = vpop.f32.mrf.mxu1 }
 0x6d1   :  { %v3824_v18 = vadd.f32 %v3820_v3, %v3745_v60  ;;  %v3900_v43 = vadd.f32 %v3895_v12, %v3823_v34 }
 0x6d2   :  { %v3897_v2 = vpop.f32.mrf.mxu1 }
 0x6d3   :  { %v3901_v20 = vadd.f32 %v3897_v2, %v3824_v18  ;;  %v3902_v24 = vmax.f32 %v3900_v43, 0.0 }
 0x6d5   :  { %v3903_v9 = vmax.f32 %v3901_v20, 0.0 }
 0x6d7   :  { %v3906_v45 = vcombine.low %v3902_v24, %v3903_v9 }
 0x6d9   :  { %3909 = vst [vmem:[#allocation11 + $0x8] sm:$0xff] %v3906_v45 }
 0x6da   :  { %4637 = shalt.err (!%p4634_p10)
}
 0x6db   :  { %3921 = dma.vmem_to_hbm [thread:$0]  %s3916_s4, 256, %s5320_s7, [#allocation5], %s4655_s30, %s4655_s30, %s4656_s8  }
 0x6dc   :  { %4652 = dma.done.wait [#allocation5], 256  }
 0x6dd   :  { %4653 = vsyncadd [#allocation5], 4294967040 }
 0x6de   :  { %3925 = vsyncpa [#allocation4], 1 }
 0x6df   :  { %3926 = vsyncpa [#allocation9], 1 }
 0x6e0   :  { %3927 = vsyncpa [#allocation5], 1 }
 0x6e1   :  { %3928 = vsyncpa [#allocation6], 1 }

</bundles_post_ra>
